<compile_context>
chip_gen: v7x
topology: tpu7x:2x2x1
jax: 0.10.0
libtpu: 0.0.40
codegen_flags: <defaults>
</compile_context>

<pallas_src>
from functools import partial

import numpy as np
import jax
import jax.numpy as jnp
from jax import lax
from jax.experimental import pallas as pl
from jax.experimental.pallas import tpu as pltpu

EPS = 1e-3


# ----------------------------- fused Pallas kernel --------------------------

def _inception_a_kernel(xp_ref,                        # (1, H+2, W+2, 384) f32 zero-padded input
                        w1_ref, s1_ref, b1_ref,        # fused stage-1 1x1: (384,224) bf16, (1,224) f32 x2
                        w11_ref, s11_ref, b11_ref,     # branch1 3x3: (9,64,96) bf16, (1,96) f32 x2
                        w21_ref, s21_ref, b21_ref,     # branch2 3x3 #1: (9,64,96)
                        w22_ref, s22_ref, b22_ref,     # branch2 3x3 #2: (9,96,96)
                        w3_ref, s3_ref, b3_ref,        # branch3 1x1: (384,96)
                        inv_ref,                       # (H*W, 1) f32: 1/valid_count for avgpool
                        o_ref,                         # (1, H, W, 384) f32
                        pad1_ref, pad2_ref, pad3_ref,  # VMEM scratch padded planes
                        *, H, W):
    M = H * W
    CIN = xp_ref.shape[-1]

    def conv3x3(pad_ref, w_ref, s_ref, b_ref, cout):
        # SAME 3x3 conv as 9 full-plane (M, Cin) x (Cin, cout) MXU matmuls,
        # accumulated in f32, + folded BN + ReLU.
        acc = jnp.zeros((M, cout), jnp.float32)
        for kh in range(3):
            for kw in range(3):
                tap = pad_ref[kh:kh + H, kw:kw + W, :].reshape(M, -1)
                acc = acc + jnp.dot(tap.astype(jnp.bfloat16),
                                    w_ref[kh * 3 + kw],
                                    preferred_element_type=jnp.float32)
        return jnp.maximum(acc * s_ref[...] + b_ref[...], 0.0)

    def to_padded(pad_ref, val, c):
        # write an (M, c) plane into the interior of a zeroed (H+2, W+2, c) buffer
        pad_ref[...] = jnp.zeros_like(pad_ref)
        pad_ref[1:H + 1, 1:W + 1, :] = val.reshape(H, W, c)

    # ---- fused first-stage 1x1 convs  [b1_0 | b2_0 | b0]  in one matmul ------
    x_in = xp_ref[0, 1:H + 1, 1:W + 1, :].reshape(M, CIN)        # (M, 384) f32
    y1 = jnp.dot(x_in.astype(jnp.bfloat16), w1_ref[...],
                 preferred_element_type=jnp.float32)
    y1 = jnp.maximum(y1 * s1_ref[...] + b1_ref[...], 0.0)        # (M, 224)
    y_b0 = y1[:, 128:224]                                        # branch0 output (96)

    # ---- branch 1 : 1x1(->64) -> 3x3(->96) -----------------------------------
    to_padded(pad1_ref, y1[:, 0:64], 64)
    y_b1 = conv3x3(pad1_ref, w11_ref, s11_ref, b11_ref, 96)

    # ---- branch 2 : 1x1(->64) -> 3x3(->96) -> 3x3(->96) -----------------------
    to_padded(pad2_ref, y1[:, 64:128], 64)
    t2 = conv3x3(pad2_ref, w21_ref, s21_ref, b21_ref, 96)
    to_padded(pad3_ref, t2, 96)
    y_b2 = conv3x3(pad3_ref, w22_ref, s22_ref, b22_ref, 96)

    # ---- branch 3 : avgpool 3x3 (count_include_pad=False) -> 1x1(->96) --------
    pooled = jnp.zeros((M, CIN), jnp.float32)
    for kh in range(3):
        for kw in range(3):
            pooled = pooled + xp_ref[0, kh:kh + H, kw:kw + W, :].reshape(M, CIN)
    pooled = pooled * inv_ref[...]
    y3 = jnp.dot(pooled.astype(jnp.bfloat16), w3_ref[...],
                 preferred_element_type=jnp.float32)
    y_b3 = jnp.maximum(y3 * s3_ref[...] + b3_ref[...], 0.0)

    # ---- lane-dense channel concat, single (H, W, 384) store ------------------
    out = jnp.concatenate([y_b0, y_b1, y_b2, y_b3], axis=-1)     # (M, 384)
    o_ref[0] = out.reshape(H, W, 4 * 96).astype(o_ref.dtype)


# ----------------------------- wrapper --------------------------------------

def inception_a_forward(x_nchw, params):
    """Inception_A forward: accepts / returns PyTorch-style NCHW f32."""
    x = jnp.transpose(x_nchw, (0, 2, 3, 1))            # NCHW -> NHWC boundary only
    N, H, W, Cin = x.shape                             # (keep NHWC end-to-end in a full model)
    Hp, Wp = H + 2, W + 2
    M = H * W

    xp = jnp.pad(x, ((0, 0), (1, 1), (1, 1), (0, 0)))  # spatial zero pad (SAME)

    # --- pack parameters: bf16 matmul operands, f32 folded-BN scale/bias -------
    w_b0, s_b0, o_b0 = params["b0"]
    w_10, s_10, o_10 = params["b1_0"]
    w_20, s_20, o_20 = params["b2_0"]
    # stage-1 output channel order: [b1_0 (64) | b2_0 (64) | b0 (96)]
    w1 = jnp.concatenate([w_10, w_20, w_b0], axis=1).astype(jnp.bfloat16)
    s1 = jnp.concatenate([s_10, s_20, s_b0]).reshape(1, -1)
    b1 = jnp.concatenate([o_10, o_20, o_b0]).reshape(1, -1)

    def pack3x3(p):
        w, s, b = p
        kh, kw, cin, cout = w.shape
        return (w.reshape(kh * kw, cin, cout).astype(jnp.bfloat16),
                s.reshape(1, cout), b.reshape(1, cout))

    w11, s11, b11 = pack3x3(params["b1_1"])
    w21, s21, b21 = pack3x3(params["b2_1"])
    w22, s22, b22 = pack3x3(params["b2_2"])

    w_b3, s_b3, o_b3 = params["b3"]
    w3 = w_b3.astype(jnp.bfloat16)
    s3 = s_b3.reshape(1, -1)
    b3 = o_b3.reshape(1, -1)

    # 1 / (#valid taps) map for count_include_pad=False average pooling
    ones = np.pad(np.ones((H, W), np.float32), ((1, 1), (1, 1)))
    cnt = sum(ones[kh:kh + H, kw:kw + W] for kh in range(3) for kw in range(3))
    inv = jnp.asarray((1.0 / cnt).reshape(M, 1))

    def const_spec(arr):
        zeros = (0,) * arr.ndim
        return pl.BlockSpec(arr.shape, lambda n: zeros)

    weights = (w1, s1, b1, w11, s11, b11, w21, s21, b21,
               w22, s22, b22, w3, s3, b3, inv)

    out_nhwc = pl.pallas_call(
        partial(_inception_a_kernel, H=H, W=W),
        out_shape=jax.ShapeDtypeStruct((N, H, W, 4 * 96), jnp.float32),
        grid_spec=pltpu.PrefetchScalarGridSpec(
            num_scalar_prefetch=0,
            grid=(N,),
            in_specs=[pl.BlockSpec((1, Hp, Wp, Cin), lambda n: (n, 0, 0, 0))]
                     + [const_spec(a) for a in weights],
            out_specs=pl.BlockSpec((1, H, W, 4 * 96), lambda n: (n, 0, 0, 0)),
            scratch_shapes=[
                pltpu.VMEM((Hp, Wp, 64), jnp.float32),   # branch1 padded 1x1 output
                pltpu.VMEM((Hp, Wp, 64), jnp.float32),   # branch2 padded 1x1 output
                pltpu.VMEM((Hp, Wp, 96), jnp.float32),   # branch2 padded 3x3 output
            ],
        ),
        compiler_params=pltpu.CompilerParams(
            dimension_semantics=("parallel",)),
    )(xp, *weights)

    return jnp.transpose(out_nhwc, (0, 3, 1, 2))        # NHWC -> NCHW


# ----------------------------- parameters -----------------------------------

def _bn_fold(key, c):
    k1, k2, k3, k4 = jax.random.split(key, 4)
    gamma = 1.0 + 0.1 * jax.random.normal(k1, (c,), jnp.float32)
    beta = 0.1 * jax.random.normal(k2, (c,), jnp.float32)
    mean = 0.1 * jax.random.normal(k3, (c,), jnp.float32)
    var = jnp.abs(1.0 + 0.1 * jax.random.normal(k4, (c,), jnp.float32))
    scale = gamma / jnp.sqrt(var + EPS)
    bias = beta - mean * scale
    return scale, bias


def _basic_conv_params(key, cin, cout, k):
    kw, kb = jax.random.split(key)
    fan_in = cin * k * k
    w = jax.random.normal(kw, (k, k, cin, cout), jnp.float32) / np.sqrt(fan_in)
    scale, bias = _bn_fold(kb, cout)
    if k == 1:
        w = w.reshape(cin, cout)
    return (w, scale, bias)


def init_inception_a_params(key):
    keys = jax.random.split(key, 7)
    return {
        "b0":   _basic_conv_params(keys[0], 384, 96, 1),
        "b1_0": _basic_conv_params(keys[1], 384, 64, 1),
        "b1_1": _basic_conv_params(keys[2], 64, 96, 3),
        "b2_0": _basic_conv_params(keys[3], 384, 64, 1),
        "b2_1": _basic_conv_params(keys[4], 64, 96, 3),
        "b2_2": _basic_conv_params(keys[5], 96, 96, 3),
        "b3":   _basic_conv_params(keys[6], 384, 96, 1),
    }


# ----------------------------- pure-JAX reference ----------------------------

def _ref_conv_bn_relu(x, w_hwio, scale, bias, padding):
    y = lax.conv_general_dilated(x, w_hwio, (1, 1), padding,
                                 dimension_numbers=("NHWC", "HWIO", "NHWC"))
    return jnp.maximum(y * scale + bias, 0.0)


def _ref_avgpool_cip_false(x):
    s = lax.reduce_window(x, 0.0, lax.add, (1, 3, 3, 1), (1, 1, 1, 1), "SAME")
    c = lax.reduce_window(jnp.ones_like(x[..., :1]), 0.0, lax.add,
                          (1, 3, 3, 1), (1, 1, 1, 1), "SAME")
    return s / c


def inception_a_reference(x_nchw, params):
    x = jnp.transpose(x_nchw, (0, 2, 3, 1))

    def as_hwio(w):
        return w.reshape(1, 1, *w.shape) if w.ndim == 2 else w

    x0 = _ref_conv_bn_relu(x, as_hwio(params["b0"][0]), *params["b0"][1:], "VALID")
    t = _ref_conv_bn_relu(x, as_hwio(params["b1_0"][0]), *params["b1_0"][1:], "VALID")
    x1 = _ref_conv_bn_relu(t, params["b1_1"][0], *params["b1_1"][1:], "SAME")
    t = _ref_conv_bn_relu(x, as_hwio(params["b2_0"][0]), *params["b2_0"][1:], "VALID")
    t = _ref_conv_bn_relu(t, params["b2_1"][0], *params["b2_1"][1:], "SAME")
    x2 = _ref_conv_bn_relu(t, params["b2_2"][0], *params["b2_2"][1:], "SAME")
    p = _ref_avgpool_cip_false(x)
    x3 = _ref_conv_bn_relu(p, as_hwio(params["b3"][0]), *params["b3"][1:], "VALID")
    out = jnp.concatenate([x0, x1, x2, x3], axis=-1)
    return jnp.transpose(out, (0, 3, 1, 2))


# ----------------------------- main ------------------------------------------

if __name__ == "__main__":
    key = jax.random.PRNGKey(0)
    kx, kp = jax.random.split(key)

    N, C, H, W = 2, 384, 8, 8                   # Inception_A requires 384 input channels
    x = jax.random.normal(kx, (N, C, H, W), jnp.float32)
    params = init_inception_a_params(kp)

    out = jax.block_until_ready(jax.jit(inception_a_forward)(x, params))
    assert out.shape == (N, 384, H, W), out.shape

    ref = jax.block_until_ready(jax.jit(inception_a_reference)(x, params))
    # bf16 MXU operands (f32 accumulation) drift slightly from the f32 reference.
    np.testing.assert_allclose(np.asarray(out), np.asarray(ref), rtol=5e-2, atol=5e-2)

    print("KERNEL_OK")
</pallas_src>

<mosaic_0001>
module attributes {stable_mosaic.version = 11 : i64} {
  func.func @_inception_a_kernel(%arg0: i32, %arg1: memref<1x10x10x384xf32, #tpu.memory_space<vmem>>, %arg2: memref<384x224xbf16, #tpu.memory_space<vmem>>, %arg3: memref<1x224xf32, #tpu.memory_space<vmem>>, %arg4: memref<1x224xf32, #tpu.memory_space<vmem>>, %arg5: memref<9x64x96xbf16, #tpu.memory_space<vmem>>, %arg6: memref<1x96xf32, #tpu.memory_space<vmem>>, %arg7: memref<1x96xf32, #tpu.memory_space<vmem>>, %arg8: memref<9x64x96xbf16, #tpu.memory_space<vmem>>, %arg9: memref<1x96xf32, #tpu.memory_space<vmem>>, %arg10: memref<1x96xf32, #tpu.memory_space<vmem>>, %arg11: memref<9x96x96xbf16, #tpu.memory_space<vmem>>, %arg12: memref<1x96xf32, #tpu.memory_space<vmem>>, %arg13: memref<1x96xf32, #tpu.memory_space<vmem>>, %arg14: memref<384x96xbf16, #tpu.memory_space<vmem>>, %arg15: memref<1x96xf32, #tpu.memory_space<vmem>>, %arg16: memref<1x96xf32, #tpu.memory_space<vmem>>, %arg17: memref<64x1xf32, #tpu.memory_space<vmem>>, %arg18: memref<1x8x8x384xf32, #tpu.memory_space<vmem>>, %arg19: memref<10x10x64xf32, #tpu.memory_space<vmem>>, %arg20: memref<10x10x64xf32, #tpu.memory_space<vmem>>, %arg21: memref<10x10x96xf32, #tpu.memory_space<vmem>>) attributes {dimension_semantics = [#tpu.dimension_semantics<parallel>], iteration_bounds = array<i64: 2>, scalar_prefetch = 0 : i64, scratch_operands = 3 : i64, tpu.core_type = #tpu.core_type<tc>, window_params = [{transform_indices = @transform_0, window_bounds = array<i64: 1, 10, 10, 384>}, {pipeline_mode = #tpu.pipeline_mode<synchronous>, transform_indices = @transform_1, window_bounds = array<i64: 384, 224>}, {pipeline_mode = #tpu.pipeline_mode<synchronous>, transform_indices = @transform_2, window_bounds = array<i64: 1, 224>}, {pipeline_mode = #tpu.pipeline_mode<synchronous>, transform_indices = @transform_3, window_bounds = array<i64: 1, 224>}, {pipeline_mode = #tpu.pipeline_mode<synchronous>, transform_indices = @transform_4, window_bounds = array<i64: 9, 64, 96>}, {pipeline_mode = #tpu.pipeline_mode<synchronous>, transform_indices = @transform_5, window_bounds = array<i64: 1, 96>}, {pipeline_mode = #tpu.pipeline_mode<synchronous>, transform_indices = @transform_6, window_bounds = array<i64: 1, 96>}, {pipeline_mode = #tpu.pipeline_mode<synchronous>, transform_indices = @transform_7, window_bounds = array<i64: 9, 64, 96>}, {pipeline_mode = #tpu.pipeline_mode<synchronous>, transform_indices = @transform_8, window_bounds = array<i64: 1, 96>}, {pipeline_mode = #tpu.pipeline_mode<synchronous>, transform_indices = @transform_9, window_bounds = array<i64: 1, 96>}, {pipeline_mode = #tpu.pipeline_mode<synchronous>, transform_indices = @transform_10, window_bounds = array<i64: 9, 96, 96>}, {pipeline_mode = #tpu.pipeline_mode<synchronous>, transform_indices = @transform_11, window_bounds = array<i64: 1, 96>}, {pipeline_mode = #tpu.pipeline_mode<synchronous>, transform_indices = @transform_12, window_bounds = array<i64: 1, 96>}, {pipeline_mode = #tpu.pipeline_mode<synchronous>, transform_indices = @transform_13, window_bounds = array<i64: 384, 96>}, {pipeline_mode = #tpu.pipeline_mode<synchronous>, transform_indices = @transform_14, window_bounds = array<i64: 1, 96>}, {pipeline_mode = #tpu.pipeline_mode<synchronous>, transform_indices = @transform_15, window_bounds = array<i64: 1, 96>}, {pipeline_mode = #tpu.pipeline_mode<synchronous>, transform_indices = @transform_16, window_bounds = array<i64: 64, 1>}, {transform_indices = @transform_17, window_bounds = array<i64: 1, 8, 8, 384>}]} {
    %c0 = arith.constant 0 : index
    %c1 = arith.constant 1 : index
    %c1_0 = arith.constant 1 : index
    %c0_1 = arith.constant 0 : index
    %0 = vector.load %arg1[%c0, %c1, %c1_0, %c0_1] : memref<1x10x10x384xf32, #tpu.memory_space<vmem>>, vector<1x8x8x384xf32>
    %1 = vector.shape_cast %0 : vector<1x8x8x384xf32> to vector<8x8x384xf32>
    %2 = vector.shape_cast %1 : vector<8x8x384xf32> to vector<64x384xf32>
    %3 = arith.truncf %2 : vector<64x384xf32> to vector<64x384xbf16>
    %c0_2 = arith.constant 0 : index
    %c0_3 = arith.constant 0 : index
    %4 = vector.load %arg2[%c0_2, %c0_3] : memref<384x224xbf16, #tpu.memory_space<vmem>>, vector<384x224xbf16>
    %cst = arith.constant dense<0.000000e+00> : vector<64x224xf32>
    %5 = tpu.matmul %3, %4, %cst {dimension_numbers = #tpu.dot_dimension_numbers<[1], [0], [0], [1], [0, 0, 1, 1], [], []>} : vector<64x384xbf16>, vector<384x224xbf16>, vector<64x224xf32> -> vector<64x224xf32>
    %c0_4 = arith.constant 0 : index
    %c0_5 = arith.constant 0 : index
    %6 = vector.load %arg3[%c0_4, %c0_5] : memref<1x224xf32, #tpu.memory_space<vmem>>, vector<1x224xf32>
    %7 = vector.broadcast %6 : vector<1x224xf32> to vector<64x224xf32>
    %8 = arith.mulf %5, %7 : vector<64x224xf32>
    %c0_6 = arith.constant 0 : index
    %c0_7 = arith.constant 0 : index
    %9 = vector.load %arg4[%c0_6, %c0_7] : memref<1x224xf32, #tpu.memory_space<vmem>>, vector<1x224xf32>
    %10 = vector.broadcast %9 : vector<1x224xf32> to vector<64x224xf32>
    %11 = arith.addf %8, %10 : vector<64x224xf32>
    %cst_8 = arith.constant 0.000000e+00 : f32
    %12 = vector.broadcast %cst_8 : f32 to vector<64x224xf32>
    %13 = arith.maximumf %11, %12 : vector<64x224xf32>
    %14 = vector.extract_strided_slice %13 {offsets = [0, 128], sizes = [64, 96], strides = [1, 1]} : vector<64x224xf32> to vector<64x96xf32>
    %15 = vector.extract_strided_slice %13 {offsets = [0, 0], sizes = [64, 64], strides = [1, 1]} : vector<64x224xf32> to vector<64x64xf32>
    %cst_9 = arith.constant 0.000000e+00 : f32
    %16 = vector.broadcast %cst_9 : f32 to vector<10x10x64xf32>
    %c0_10 = arith.constant 0 : index
    %c0_11 = arith.constant 0 : index
    %c0_12 = arith.constant 0 : index
    %17 = vector.load %arg19[%c0_10, %c0_11, %c0_12] : memref<10x10x64xf32, #tpu.memory_space<vmem>>, vector<10x10x64xf32>
    tpu.vector_store %arg19[%c0_10, %c0_11, %c0_12], %16 {strides = array<i32>} : memref<10x10x64xf32, #tpu.memory_space<vmem>>, vector<10x10x64xf32>,
    %18 = vector.shape_cast %15 : vector<64x64xf32> to vector<8x8x64xf32>
    %c1_13 = arith.constant 1 : index
    %c1_14 = arith.constant 1 : index
    %c0_15 = arith.constant 0 : index
    %19 = vector.load %arg19[%c1_13, %c1_14, %c0_15] : memref<10x10x64xf32, #tpu.memory_space<vmem>>, vector<8x8x64xf32>
    tpu.vector_store %arg19[%c1_13, %c1_14, %c0_15], %18 {strides = array<i32>} : memref<10x10x64xf32, #tpu.memory_space<vmem>>, vector<8x8x64xf32>,
    %cst_16 = arith.constant 0.000000e+00 : f32
    %20 = vector.broadcast %cst_16 : f32 to vector<64x96xf32>
    %c0_17 = arith.constant 0 : index
    %c0_18 = arith.constant 0 : index
    %c0_19 = arith.constant 0 : index
    %21 = vector.load %arg19[%c0_17, %c0_18, %c0_19] : memref<10x10x64xf32, #tpu.memory_space<vmem>>, vector<8x8x64xf32>
    %22 = vector.shape_cast %21 : vector<8x8x64xf32> to vector<64x64xf32>
    %23 = arith.truncf %22 : vector<64x64xf32> to vector<64x64xbf16>
    %c0_20 = arith.constant 0 : index
    %c0_21 = arith.constant 0 : index
    %c0_22 = arith.constant 0 : index
    %24 = vector.load %arg5[%c0_20, %c0_21, %c0_22] : memref<9x64x96xbf16, #tpu.memory_space<vmem>>, vector<1x64x96xbf16>
    %25 = vector.shape_cast %24 : vector<1x64x96xbf16> to vector<64x96xbf16>
    %cst_23 = arith.constant dense<0.000000e+00> : vector<64x96xf32>
    %26 = tpu.matmul %23, %25, %cst_23 {dimension_numbers = #tpu.dot_dimension_numbers<[1], [0], [0], [1], [0, 0, 1, 1], [], []>} : vector<64x64xbf16>, vector<64x96xbf16>, vector<64x96xf32> -> vector<64x96xf32>
    %27 = arith.addf %20, %26 : vector<64x96xf32>
    %c0_24 = arith.constant 0 : index
    %c1_25 = arith.constant 1 : index
    %c0_26 = arith.constant 0 : index
    %28 = vector.load %arg19[%c0_24, %c1_25, %c0_26] : memref<10x10x64xf32, #tpu.memory_space<vmem>>, vector<8x8x64xf32>
    %29 = vector.shape_cast %28 : vector<8x8x64xf32> to vector<64x64xf32>
    %30 = arith.truncf %29 : vector<64x64xf32> to vector<64x64xbf16>
    %c1_27 = arith.constant 1 : index
    %c0_28 = arith.constant 0 : index
    %c0_29 = arith.constant 0 : index
    %31 = vector.load %arg5[%c1_27, %c0_28, %c0_29] : memref<9x64x96xbf16, #tpu.memory_space<vmem>>, vector<1x64x96xbf16>
    %32 = vector.shape_cast %31 : vector<1x64x96xbf16> to vector<64x96xbf16>
    %cst_30 = arith.constant dense<0.000000e+00> : vector<64x96xf32>
    %33 = tpu.matmul %30, %32, %cst_30 {dimension_numbers = #tpu.dot_dimension_numbers<[1], [0], [0], [1], [0, 0, 1, 1], [], []>} : vector<64x64xbf16>, vector<64x96xbf16>, vector<64x96xf32> -> vector<64x96xf32>
    %34 = arith.addf %27, %33 : vector<64x96xf32>
    %c0_31 = arith.constant 0 : index
    %c2 = arith.constant 2 : index
    %c0_32 = arith.constant 0 : index
    %35 = vector.load %arg19[%c0_31, %c2, %c0_32] : memref<10x10x64xf32, #tpu.memory_space<vmem>>, vector<8x8x64xf32>
    %36 = vector.shape_cast %35 : vector<8x8x64xf32> to vector<64x64xf32>
    %37 = arith.truncf %36 : vector<64x64xf32> to vector<64x64xbf16>
    %c2_33 = arith.constant 2 : index
    %c0_34 = arith.constant 0 : index
    %c0_35 = arith.constant 0 : index
    %38 = vector.load %arg5[%c2_33, %c0_34, %c0_35] : memref<9x64x96xbf16, #tpu.memory_space<vmem>>, vector<1x64x96xbf16>
    %39 = vector.shape_cast %38 : vector<1x64x96xbf16> to vector<64x96xbf16>
    %cst_36 = arith.constant dense<0.000000e+00> : vector<64x96xf32>
    %40 = tpu.matmul %37, %39, %cst_36 {dimension_numbers = #tpu.dot_dimension_numbers<[1], [0], [0], [1], [0, 0, 1, 1], [], []>} : vector<64x64xbf16>, vector<64x96xbf16>, vector<64x96xf32> -> vector<64x96xf32>
    %41 = arith.addf %34, %40 : vector<64x96xf32>
    %c1_37 = arith.constant 1 : index
    %c0_38 = arith.constant 0 : index
    %c0_39 = arith.constant 0 : index
    %42 = vector.load %arg19[%c1_37, %c0_38, %c0_39] : memref<10x10x64xf32, #tpu.memory_space<vmem>>, vector<8x8x64xf32>
    %43 = vector.shape_cast %42 : vector<8x8x64xf32> to vector<64x64xf32>
    %44 = arith.truncf %43 : vector<64x64xf32> to vector<64x64xbf16>
    %c3 = arith.constant 3 : index
    %c0_40 = arith.constant 0 : index
    %c0_41 = arith.constant 0 : index
    %45 = vector.load %arg5[%c3, %c0_40, %c0_41] : memref<9x64x96xbf16, #tpu.memory_space<vmem>>, vector<1x64x96xbf16>
    %46 = vector.shape_cast %45 : vector<1x64x96xbf16> to vector<64x96xbf16>
    %cst_42 = arith.constant dense<0.000000e+00> : vector<64x96xf32>
    %47 = tpu.matmul %44, %46, %cst_42 {dimension_numbers = #tpu.dot_dimension_numbers<[1], [0], [0], [1], [0, 0, 1, 1], [], []>} : vector<64x64xbf16>, vector<64x96xbf16>, vector<64x96xf32> -> vector<64x96xf32>
    %48 = arith.addf %41, %47 : vector<64x96xf32>
    %c1_43 = arith.constant 1 : index
    %c1_44 = arith.constant 1 : index
    %c0_45 = arith.constant 0 : index
    %49 = vector.load %arg19[%c1_43, %c1_44, %c0_45] : memref<10x10x64xf32, #tpu.memory_space<vmem>>, vector<8x8x64xf32>
    %50 = vector.shape_cast %49 : vector<8x8x64xf32> to vector<64x64xf32>
    %51 = arith.truncf %50 : vector<64x64xf32> to vector<64x64xbf16>
    %c4 = arith.constant 4 : index
    %c0_46 = arith.constant 0 : index
    %c0_47 = arith.constant 0 : index
    %52 = vector.load %arg5[%c4, %c0_46, %c0_47] : memref<9x64x96xbf16, #tpu.memory_space<vmem>>, vector<1x64x96xbf16>
    %53 = vector.shape_cast %52 : vector<1x64x96xbf16> to vector<64x96xbf16>
    %cst_48 = arith.constant dense<0.000000e+00> : vector<64x96xf32>
    %54 = tpu.matmul %51, %53, %cst_48 {dimension_numbers = #tpu.dot_dimension_numbers<[1], [0], [0], [1], [0, 0, 1, 1], [], []>} : vector<64x64xbf16>, vector<64x96xbf16>, vector<64x96xf32> -> vector<64x96xf32>
    %55 = arith.addf %48, %54 : vector<64x96xf32>
    %c1_49 = arith.constant 1 : index
    %c2_50 = arith.constant 2 : index
    %c0_51 = arith.constant 0 : index
    %56 = vector.load %arg19[%c1_49, %c2_50, %c0_51] : memref<10x10x64xf32, #tpu.memory_space<vmem>>, vector<8x8x64xf32>
    %57 = vector.shape_cast %56 : vector<8x8x64xf32> to vector<64x64xf32>
    %58 = arith.truncf %57 : vector<64x64xf32> to vector<64x64xbf16>
    %c5 = arith.constant 5 : index
    %c0_52 = arith.constant 0 : index
    %c0_53 = arith.constant 0 : index
    %59 = vector.load %arg5[%c5, %c0_52, %c0_53] : memref<9x64x96xbf16, #tpu.memory_space<vmem>>, vector<1x64x96xbf16>
    %60 = vector.shape_cast %59 : vector<1x64x96xbf16> to vector<64x96xbf16>
    %cst_54 = arith.constant dense<0.000000e+00> : vector<64x96xf32>
    %61 = tpu.matmul %58, %60, %cst_54 {dimension_numbers = #tpu.dot_dimension_numbers<[1], [0], [0], [1], [0, 0, 1, 1], [], []>} : vector<64x64xbf16>, vector<64x96xbf16>, vector<64x96xf32> -> vector<64x96xf32>
    %62 = arith.addf %55, %61 : vector<64x96xf32>
    %c2_55 = arith.constant 2 : index
    %c0_56 = arith.constant 0 : index
    %c0_57 = arith.constant 0 : index
    %63 = vector.load %arg19[%c2_55, %c0_56, %c0_57] : memref<10x10x64xf32, #tpu.memory_space<vmem>>, vector<8x8x64xf32>
    %64 = vector.shape_cast %63 : vector<8x8x64xf32> to vector<64x64xf32>
    %65 = arith.truncf %64 : vector<64x64xf32> to vector<64x64xbf16>
    %c6 = arith.constant 6 : index
    %c0_58 = arith.constant 0 : index
    %c0_59 = arith.constant 0 : index
    %66 = vector.load %arg5[%c6, %c0_58, %c0_59] : memref<9x64x96xbf16, #tpu.memory_space<vmem>>, vector<1x64x96xbf16>
    %67 = vector.shape_cast %66 : vector<1x64x96xbf16> to vector<64x96xbf16>
    %cst_60 = arith.constant dense<0.000000e+00> : vector<64x96xf32>
    %68 = tpu.matmul %65, %67, %cst_60 {dimension_numbers = #tpu.dot_dimension_numbers<[1], [0], [0], [1], [0, 0, 1, 1], [], []>} : vector<64x64xbf16>, vector<64x96xbf16>, vector<64x96xf32> -> vector<64x96xf32>
    %69 = arith.addf %62, %68 : vector<64x96xf32>
    %c2_61 = arith.constant 2 : index
    %c1_62 = arith.constant 1 : index
    %c0_63 = arith.constant 0 : index
    %70 = vector.load %arg19[%c2_61, %c1_62, %c0_63] : memref<10x10x64xf32, #tpu.memory_space<vmem>>, vector<8x8x64xf32>
    %71 = vector.shape_cast %70 : vector<8x8x64xf32> to vector<64x64xf32>
    %72 = arith.truncf %71 : vector<64x64xf32> to vector<64x64xbf16>
    %c7 = arith.constant 7 : index
    %c0_64 = arith.constant 0 : index
    %c0_65 = arith.constant 0 : index
    %73 = vector.load %arg5[%c7, %c0_64, %c0_65] : memref<9x64x96xbf16, #tpu.memory_space<vmem>>, vector<1x64x96xbf16>
    %74 = vector.shape_cast %73 : vector<1x64x96xbf16> to vector<64x96xbf16>
    %cst_66 = arith.constant dense<0.000000e+00> : vector<64x96xf32>
    %75 = tpu.matmul %72, %74, %cst_66 {dimension_numbers = #tpu.dot_dimension_numbers<[1], [0], [0], [1], [0, 0, 1, 1], [], []>} : vector<64x64xbf16>, vector<64x96xbf16>, vector<64x96xf32> -> vector<64x96xf32>
    %76 = arith.addf %69, %75 : vector<64x96xf32>
    %c2_67 = arith.constant 2 : index
    %c2_68 = arith.constant 2 : index
    %c0_69 = arith.constant 0 : index
    %77 = vector.load %arg19[%c2_67, %c2_68, %c0_69] : memref<10x10x64xf32, #tpu.memory_space<vmem>>, vector<8x8x64xf32>
    %78 = vector.shape_cast %77 : vector<8x8x64xf32> to vector<64x64xf32>
    %79 = arith.truncf %78 : vector<64x64xf32> to vector<64x64xbf16>
    %c8 = arith.constant 8 : index
    %c0_70 = arith.constant 0 : index
    %c0_71 = arith.constant 0 : index
    %80 = vector.load %arg5[%c8, %c0_70, %c0_71] : memref<9x64x96xbf16, #tpu.memory_space<vmem>>, vector<1x64x96xbf16>
    %81 = vector.shape_cast %80 : vector<1x64x96xbf16> to vector<64x96xbf16>
    %cst_72 = arith.constant dense<0.000000e+00> : vector<64x96xf32>
    %82 = tpu.matmul %79, %81, %cst_72 {dimension_numbers = #tpu.dot_dimension_numbers<[1], [0], [0], [1], [0, 0, 1, 1], [], []>} : vector<64x64xbf16>, vector<64x96xbf16>, vector<64x96xf32> -> vector<64x96xf32>
    %83 = arith.addf %76, %82 : vector<64x96xf32>
    %c0_73 = arith.constant 0 : index
    %c0_74 = arith.constant 0 : index
    %84 = vector.load %arg6[%c0_73, %c0_74] : memref<1x96xf32, #tpu.memory_space<vmem>>, vector<1x96xf32>
    %85 = vector.broadcast %84 : vector<1x96xf32> to vector<64x96xf32>
    %86 = arith.mulf %83, %85 : vector<64x96xf32>
    %c0_75 = arith.constant 0 : index
    %c0_76 = arith.constant 0 : index
    %87 = vector.load %arg7[%c0_75, %c0_76] : memref<1x96xf32, #tpu.memory_space<vmem>>, vector<1x96xf32>
    %88 = vector.broadcast %87 : vector<1x96xf32> to vector<64x96xf32>
    %89 = arith.addf %86, %88 : vector<64x96xf32>
    %cst_77 = arith.constant 0.000000e+00 : f32
    %90 = vector.broadcast %cst_77 : f32 to vector<64x96xf32>
    %91 = arith.maximumf %89, %90 : vector<64x96xf32>
    %92 = vector.extract_strided_slice %13 {offsets = [0, 64], sizes = [64, 64], strides = [1, 1]} : vector<64x224xf32> to vector<64x64xf32>
    %cst_78 = arith.constant 0.000000e+00 : f32
    %93 = vector.broadcast %cst_78 : f32 to vector<10x10x64xf32>
    %c0_79 = arith.constant 0 : index
    %c0_80 = arith.constant 0 : index
    %c0_81 = arith.constant 0 : index
    %94 = vector.load %arg20[%c0_79, %c0_80, %c0_81] : memref<10x10x64xf32, #tpu.memory_space<vmem>>, vector<10x10x64xf32>
    tpu.vector_store %arg20[%c0_79, %c0_80, %c0_81], %93 {strides = array<i32>} : memref<10x10x64xf32, #tpu.memory_space<vmem>>, vector<10x10x64xf32>,
    %95 = vector.shape_cast %92 : vector<64x64xf32> to vector<8x8x64xf32>
    %c1_82 = arith.constant 1 : index
    %c1_83 = arith.constant 1 : index
    %c0_84 = arith.constant 0 : index
    %96 = vector.load %arg20[%c1_82, %c1_83, %c0_84] : memref<10x10x64xf32, #tpu.memory_space<vmem>>, vector<8x8x64xf32>
    tpu.vector_store %arg20[%c1_82, %c1_83, %c0_84], %95 {strides = array<i32>} : memref<10x10x64xf32, #tpu.memory_space<vmem>>, vector<8x8x64xf32>,
    %cst_85 = arith.constant 0.000000e+00 : f32
    %97 = vector.broadcast %cst_85 : f32 to vector<64x96xf32>
    %c0_86 = arith.constant 0 : index
    %c0_87 = arith.constant 0 : index
    %c0_88 = arith.constant 0 : index
    %98 = vector.load %arg20[%c0_86, %c0_87, %c0_88] : memref<10x10x64xf32, #tpu.memory_space<vmem>>, vector<8x8x64xf32>
    %99 = vector.shape_cast %98 : vector<8x8x64xf32> to vector<64x64xf32>
    %100 = arith.truncf %99 : vector<64x64xf32> to vector<64x64xbf16>
    %c0_89 = arith.constant 0 : index
    %c0_90 = arith.constant 0 : index
    %c0_91 = arith.constant 0 : index
    %101 = vector.load %arg8[%c0_89, %c0_90, %c0_91] : memref<9x64x96xbf16, #tpu.memory_space<vmem>>, vector<1x64x96xbf16>
    %102 = vector.shape_cast %101 : vector<1x64x96xbf16> to vector<64x96xbf16>
    %cst_92 = arith.constant dense<0.000000e+00> : vector<64x96xf32>
    %103 = tpu.matmul %100, %102, %cst_92 {dimension_numbers = #tpu.dot_dimension_numbers<[1], [0], [0], [1], [0, 0, 1, 1], [], []>} : vector<64x64xbf16>, vector<64x96xbf16>, vector<64x96xf32> -> vector<64x96xf32>
    %104 = arith.addf %97, %103 : vector<64x96xf32>
    %c0_93 = arith.constant 0 : index
    %c1_94 = arith.constant 1 : index
    %c0_95 = arith.constant 0 : index
    %105 = vector.load %arg20[%c0_93, %c1_94, %c0_95] : memref<10x10x64xf32, #tpu.memory_space<vmem>>, vector<8x8x64xf32>
    %106 = vector.shape_cast %105 : vector<8x8x64xf32> to vector<64x64xf32>
    %107 = arith.truncf %106 : vector<64x64xf32> to vector<64x64xbf16>
    %c1_96 = arith.constant 1 : index
    %c0_97 = arith.constant 0 : index
    %c0_98 = arith.constant 0 : index
    %108 = vector.load %arg8[%c1_96, %c0_97, %c0_98] : memref<9x64x96xbf16, #tpu.memory_space<vmem>>, vector<1x64x96xbf16>
    %109 = vector.shape_cast %108 : vector<1x64x96xbf16> to vector<64x96xbf16>
    %cst_99 = arith.constant dense<0.000000e+00> : vector<64x96xf32>
    %110 = tpu.matmul %107, %109, %cst_99 {dimension_numbers = #tpu.dot_dimension_numbers<[1], [0], [0], [1], [0, 0, 1, 1], [], []>} : vector<64x64xbf16>, vector<64x96xbf16>, vector<64x96xf32> -> vector<64x96xf32>
    %111 = arith.addf %104, %110 : vector<64x96xf32>
    %c0_100 = arith.constant 0 : index
    %c2_101 = arith.constant 2 : index
    %c0_102 = arith.constant 0 : index
    %112 = vector.load %arg20[%c0_100, %c2_101, %c0_102] : memref<10x10x64xf32, #tpu.memory_space<vmem>>, vector<8x8x64xf32>
    %113 = vector.shape_cast %112 : vector<8x8x64xf32> to vector<64x64xf32>
    %114 = arith.truncf %113 : vector<64x64xf32> to vector<64x64xbf16>
    %c2_103 = arith.constant 2 : index
    %c0_104 = arith.constant 0 : index
    %c0_105 = arith.constant 0 : index
    %115 = vector.load %arg8[%c2_103, %c0_104, %c0_105] : memref<9x64x96xbf16, #tpu.memory_space<vmem>>, vector<1x64x96xbf16>
    %116 = vector.shape_cast %115 : vector<1x64x96xbf16> to vector<64x96xbf16>
    %cst_106 = arith.constant dense<0.000000e+00> : vector<64x96xf32>
    %117 = tpu.matmul %114, %116, %cst_106 {dimension_numbers = #tpu.dot_dimension_numbers<[1], [0], [0], [1], [0, 0, 1, 1], [], []>} : vector<64x64xbf16>, vector<64x96xbf16>, vector<64x96xf32> -> vector<64x96xf32>
    %118 = arith.addf %111, %117 : vector<64x96xf32>
    %c1_107 = arith.constant 1 : index
    %c0_108 = arith.constant 0 : index
    %c0_109 = arith.constant 0 : index
    %119 = vector.load %arg20[%c1_107, %c0_108, %c0_109] : memref<10x10x64xf32, #tpu.memory_space<vmem>>, vector<8x8x64xf32>
    %120 = vector.shape_cast %119 : vector<8x8x64xf32> to vector<64x64xf32>
    %121 = arith.truncf %120 : vector<64x64xf32> to vector<64x64xbf16>
    %c3_110 = arith.constant 3 : index
    %c0_111 = arith.constant 0 : index
    %c0_112 = arith.constant 0 : index
    %122 = vector.load %arg8[%c3_110, %c0_111, %c0_112] : memref<9x64x96xbf16, #tpu.memory_space<vmem>>, vector<1x64x96xbf16>
    %123 = vector.shape_cast %122 : vector<1x64x96xbf16> to vector<64x96xbf16>
    %cst_113 = arith.constant dense<0.000000e+00> : vector<64x96xf32>
    %124 = tpu.matmul %121, %123, %cst_113 {dimension_numbers = #tpu.dot_dimension_numbers<[1], [0], [0], [1], [0, 0, 1, 1], [], []>} : vector<64x64xbf16>, vector<64x96xbf16>, vector<64x96xf32> -> vector<64x96xf32>
    %125 = arith.addf %118, %124 : vector<64x96xf32>
    %c1_114 = arith.constant 1 : index
    %c1_115 = arith.constant 1 : index
    %c0_116 = arith.constant 0 : index
    %126 = vector.load %arg20[%c1_114, %c1_115, %c0_116] : memref<10x10x64xf32, #tpu.memory_space<vmem>>, vector<8x8x64xf32>
    %127 = vector.shape_cast %126 : vector<8x8x64xf32> to vector<64x64xf32>
    %128 = arith.truncf %127 : vector<64x64xf32> to vector<64x64xbf16>
    %c4_117 = arith.constant 4 : index
    %c0_118 = arith.constant 0 : index
    %c0_119 = arith.constant 0 : index
    %129 = vector.load %arg8[%c4_117, %c0_118, %c0_119] : memref<9x64x96xbf16, #tpu.memory_space<vmem>>, vector<1x64x96xbf16>
    %130 = vector.shape_cast %129 : vector<1x64x96xbf16> to vector<64x96xbf16>
    %cst_120 = arith.constant dense<0.000000e+00> : vector<64x96xf32>
    %131 = tpu.matmul %128, %130, %cst_120 {dimension_numbers = #tpu.dot_dimension_numbers<[1], [0], [0], [1], [0, 0, 1, 1], [], []>} : vector<64x64xbf16>, vector<64x96xbf16>, vector<64x96xf32> -> vector<64x96xf32>
    %132 = arith.addf %125, %131 : vector<64x96xf32>
    %c1_121 = arith.constant 1 : index
    %c2_122 = arith.constant 2 : index
    %c0_123 = arith.constant 0 : index
    %133 = vector.load %arg20[%c1_121, %c2_122, %c0_123] : memref<10x10x64xf32, #tpu.memory_space<vmem>>, vector<8x8x64xf32>
    %134 = vector.shape_cast %133 : vector<8x8x64xf32> to vector<64x64xf32>
    %135 = arith.truncf %134 : vector<64x64xf32> to vector<64x64xbf16>
    %c5_124 = arith.constant 5 : index
    %c0_125 = arith.constant 0 : index
    %c0_126 = arith.constant 0 : index
    %136 = vector.load %arg8[%c5_124, %c0_125, %c0_126] : memref<9x64x96xbf16, #tpu.memory_space<vmem>>, vector<1x64x96xbf16>
    %137 = vector.shape_cast %136 : vector<1x64x96xbf16> to vector<64x96xbf16>
    %cst_127 = arith.constant dense<0.000000e+00> : vector<64x96xf32>
    %138 = tpu.matmul %135, %137, %cst_127 {dimension_numbers = #tpu.dot_dimension_numbers<[1], [0], [0], [1], [0, 0, 1, 1], [], []>} : vector<64x64xbf16>, vector<64x96xbf16>, vector<64x96xf32> -> vector<64x96xf32>
    %139 = arith.addf %132, %138 : vector<64x96xf32>
    %c2_128 = arith.constant 2 : index
    %c0_129 = arith.constant 0 : index
    %c0_130 = arith.constant 0 : index
    %140 = vector.load %arg20[%c2_128, %c0_129, %c0_130] : memref<10x10x64xf32, #tpu.memory_space<vmem>>, vector<8x8x64xf32>
    %141 = vector.shape_cast %140 : vector<8x8x64xf32> to vector<64x64xf32>
    %142 = arith.truncf %141 : vector<64x64xf32> to vector<64x64xbf16>
    %c6_131 = arith.constant 6 : index
    %c0_132 = arith.constant 0 : index
    %c0_133 = arith.constant 0 : index
    %143 = vector.load %arg8[%c6_131, %c0_132, %c0_133] : memref<9x64x96xbf16, #tpu.memory_space<vmem>>, vector<1x64x96xbf16>
    %144 = vector.shape_cast %143 : vector<1x64x96xbf16> to vector<64x96xbf16>
    %cst_134 = arith.constant dense<0.000000e+00> : vector<64x96xf32>
    %145 = tpu.matmul %142, %144, %cst_134 {dimension_numbers = #tpu.dot_dimension_numbers<[1], [0], [0], [1], [0, 0, 1, 1], [], []>} : vector<64x64xbf16>, vector<64x96xbf16>, vector<64x96xf32> -> vector<64x96xf32>
    %146 = arith.addf %139, %145 : vector<64x96xf32>
    %c2_135 = arith.constant 2 : index
    %c1_136 = arith.constant 1 : index
    %c0_137 = arith.constant 0 : index
    %147 = vector.load %arg20[%c2_135, %c1_136, %c0_137] : memref<10x10x64xf32, #tpu.memory_space<vmem>>, vector<8x8x64xf32>
    %148 = vector.shape_cast %147 : vector<8x8x64xf32> to vector<64x64xf32>
    %149 = arith.truncf %148 : vector<64x64xf32> to vector<64x64xbf16>
    %c7_138 = arith.constant 7 : index
    %c0_139 = arith.constant 0 : index
    %c0_140 = arith.constant 0 : index
    %150 = vector.load %arg8[%c7_138, %c0_139, %c0_140] : memref<9x64x96xbf16, #tpu.memory_space<vmem>>, vector<1x64x96xbf16>
    %151 = vector.shape_cast %150 : vector<1x64x96xbf16> to vector<64x96xbf16>
    %cst_141 = arith.constant dense<0.000000e+00> : vector<64x96xf32>
    %152 = tpu.matmul %149, %151, %cst_141 {dimension_numbers = #tpu.dot_dimension_numbers<[1], [0], [0], [1], [0, 0, 1, 1], [], []>} : vector<64x64xbf16>, vector<64x96xbf16>, vector<64x96xf32> -> vector<64x96xf32>
    %153 = arith.addf %146, %152 : vector<64x96xf32>
    %c2_142 = arith.constant 2 : index
    %c2_143 = arith.constant 2 : index
    %c0_144 = arith.constant 0 : index
    %154 = vector.load %arg20[%c2_142, %c2_143, %c0_144] : memref<10x10x64xf32, #tpu.memory_space<vmem>>, vector<8x8x64xf32>
    %155 = vector.shape_cast %154 : vector<8x8x64xf32> to vector<64x64xf32>
    %156 = arith.truncf %155 : vector<64x64xf32> to vector<64x64xbf16>
    %c8_145 = arith.constant 8 : index
    %c0_146 = arith.constant 0 : index
    %c0_147 = arith.constant 0 : index
    %157 = vector.load %arg8[%c8_145, %c0_146, %c0_147] : memref<9x64x96xbf16, #tpu.memory_space<vmem>>, vector<1x64x96xbf16>
    %158 = vector.shape_cast %157 : vector<1x64x96xbf16> to vector<64x96xbf16>
    %cst_148 = arith.constant dense<0.000000e+00> : vector<64x96xf32>
    %159 = tpu.matmul %156, %158, %cst_148 {dimension_numbers = #tpu.dot_dimension_numbers<[1], [0], [0], [1], [0, 0, 1, 1], [], []>} : vector<64x64xbf16>, vector<64x96xbf16>, vector<64x96xf32> -> vector<64x96xf32>
    %160 = arith.addf %153, %159 : vector<64x96xf32>
    %c0_149 = arith.constant 0 : index
    %c0_150 = arith.constant 0 : index
    %161 = vector.load %arg9[%c0_149, %c0_150] : memref<1x96xf32, #tpu.memory_space<vmem>>, vector<1x96xf32>
    %162 = vector.broadcast %161 : vector<1x96xf32> to vector<64x96xf32>
    %163 = arith.mulf %160, %162 : vector<64x96xf32>
    %c0_151 = arith.constant 0 : index
    %c0_152 = arith.constant 0 : index
    %164 = vector.load %arg10[%c0_151, %c0_152] : memref<1x96xf32, #tpu.memory_space<vmem>>, vector<1x96xf32>
    %165 = vector.broadcast %164 : vector<1x96xf32> to vector<64x96xf32>
    %166 = arith.addf %163, %165 : vector<64x96xf32>
    %cst_153 = arith.constant 0.000000e+00 : f32
    %167 = vector.broadcast %cst_153 : f32 to vector<64x96xf32>
    %168 = arith.maximumf %166, %167 : vector<64x96xf32>
    %cst_154 = arith.constant 0.000000e+00 : f32
    %169 = vector.broadcast %cst_154 : f32 to vector<10x10x96xf32>
    %c0_155 = arith.constant 0 : index
    %c0_156 = arith.constant 0 : index
    %c0_157 = arith.constant 0 : index
    %170 = vector.load %arg21[%c0_155, %c0_156, %c0_157] : memref<10x10x96xf32, #tpu.memory_space<vmem>>, vector<10x10x96xf32>
    tpu.vector_store %arg21[%c0_155, %c0_156, %c0_157], %169 {strides = array<i32>} : memref<10x10x96xf32, #tpu.memory_space<vmem>>, vector<10x10x96xf32>,
    %171 = vector.shape_cast %168 : vector<64x96xf32> to vector<8x8x96xf32>
    %c1_158 = arith.constant 1 : index
    %c1_159 = arith.constant 1 : index
    %c0_160 = arith.constant 0 : index
    %172 = vector.load %arg21[%c1_158, %c1_159, %c0_160] : memref<10x10x96xf32, #tpu.memory_space<vmem>>, vector<8x8x96xf32>
    tpu.vector_store %arg21[%c1_158, %c1_159, %c0_160], %171 {strides = array<i32>} : memref<10x10x96xf32, #tpu.memory_space<vmem>>, vector<8x8x96xf32>,
    %cst_161 = arith.constant 0.000000e+00 : f32
    %173 = vector.broadcast %cst_161 : f32 to vector<64x96xf32>
    %c0_162 = arith.constant 0 : index
    %c0_163 = arith.constant 0 : index
    %c0_164 = arith.constant 0 : index
    %174 = vector.load %arg21[%c0_162, %c0_163, %c0_164] : memref<10x10x96xf32, #tpu.memory_space<vmem>>, vector<8x8x96xf32>
    %175 = vector.shape_cast %174 : vector<8x8x96xf32> to vector<64x96xf32>
    %176 = arith.truncf %175 : vector<64x96xf32> to vector<64x96xbf16>
    %c0_165 = arith.constant 0 : index
    %c0_166 = arith.constant 0 : index
    %c0_167 = arith.constant 0 : index
    %177 = vector.load %arg11[%c0_165, %c0_166, %c0_167] : memref<9x96x96xbf16, #tpu.memory_space<vmem>>, vector<1x96x96xbf16>
    %178 = vector.shape_cast %177 : vector<1x96x96xbf16> to vector<96x96xbf16>
    %cst_168 = arith.constant dense<0.000000e+00> : vector<64x96xf32>
    %179 = tpu.matmul %176, %178, %cst_168 {dimension_numbers = #tpu.dot_dimension_numbers<[1], [0], [0], [1], [0, 0, 1, 1], [], []>} : vector<64x96xbf16>, vector<96x96xbf16>, vector<64x96xf32> -> vector<64x96xf32>
    %180 = arith.addf %173, %179 : vector<64x96xf32>
    %c0_169 = arith.constant 0 : index
    %c1_170 = arith.constant 1 : index
    %c0_171 = arith.constant 0 : index
    %181 = vector.load %arg21[%c0_169, %c1_170, %c0_171] : memref<10x10x96xf32, #tpu.memory_space<vmem>>, vector<8x8x96xf32>
    %182 = vector.shape_cast %181 : vector<8x8x96xf32> to vector<64x96xf32>
    %183 = arith.truncf %182 : vector<64x96xf32> to vector<64x96xbf16>
    %c1_172 = arith.constant 1 : index
    %c0_173 = arith.constant 0 : index
    %c0_174 = arith.constant 0 : index
    %184 = vector.load %arg11[%c1_172, %c0_173, %c0_174] : memref<9x96x96xbf16, #tpu.memory_space<vmem>>, vector<1x96x96xbf16>
    %185 = vector.shape_cast %184 : vector<1x96x96xbf16> to vector<96x96xbf16>
    %cst_175 = arith.constant dense<0.000000e+00> : vector<64x96xf32>
    %186 = tpu.matmul %183, %185, %cst_175 {dimension_numbers = #tpu.dot_dimension_numbers<[1], [0], [0], [1], [0, 0, 1, 1], [], []>} : vector<64x96xbf16>, vector<96x96xbf16>, vector<64x96xf32> -> vector<64x96xf32>
    %187 = arith.addf %180, %186 : vector<64x96xf32>
    %c0_176 = arith.constant 0 : index
    %c2_177 = arith.constant 2 : index
    %c0_178 = arith.constant 0 : index
    %188 = vector.load %arg21[%c0_176, %c2_177, %c0_178] : memref<10x10x96xf32, #tpu.memory_space<vmem>>, vector<8x8x96xf32>
    %189 = vector.shape_cast %188 : vector<8x8x96xf32> to vector<64x96xf32>
    %190 = arith.truncf %189 : vector<64x96xf32> to vector<64x96xbf16>
    %c2_179 = arith.constant 2 : index
    %c0_180 = arith.constant 0 : index
    %c0_181 = arith.constant 0 : index
    %191 = vector.load %arg11[%c2_179, %c0_180, %c0_181] : memref<9x96x96xbf16, #tpu.memory_space<vmem>>, vector<1x96x96xbf16>
    %192 = vector.shape_cast %191 : vector<1x96x96xbf16> to vector<96x96xbf16>
    %cst_182 = arith.constant dense<0.000000e+00> : vector<64x96xf32>
    %193 = tpu.matmul %190, %192, %cst_182 {dimension_numbers = #tpu.dot_dimension_numbers<[1], [0], [0], [1], [0, 0, 1, 1], [], []>} : vector<64x96xbf16>, vector<96x96xbf16>, vector<64x96xf32> -> vector<64x96xf32>
    %194 = arith.addf %187, %193 : vector<64x96xf32>
    %c1_183 = arith.constant 1 : index
    %c0_184 = arith.constant 0 : index
    %c0_185 = arith.constant 0 : index
    %195 = vector.load %arg21[%c1_183, %c0_184, %c0_185] : memref<10x10x96xf32, #tpu.memory_space<vmem>>, vector<8x8x96xf32>
    %196 = vector.shape_cast %195 : vector<8x8x96xf32> to vector<64x96xf32>
    %197 = arith.truncf %196 : vector<64x96xf32> to vector<64x96xbf16>
    %c3_186 = arith.constant 3 : index
    %c0_187 = arith.constant 0 : index
    %c0_188 = arith.constant 0 : index
    %198 = vector.load %arg11[%c3_186, %c0_187, %c0_188] : memref<9x96x96xbf16, #tpu.memory_space<vmem>>, vector<1x96x96xbf16>
    %199 = vector.shape_cast %198 : vector<1x96x96xbf16> to vector<96x96xbf16>
    %cst_189 = arith.constant dense<0.000000e+00> : vector<64x96xf32>
    %200 = tpu.matmul %197, %199, %cst_189 {dimension_numbers = #tpu.dot_dimension_numbers<[1], [0], [0], [1], [0, 0, 1, 1], [], []>} : vector<64x96xbf16>, vector<96x96xbf16>, vector<64x96xf32> -> vector<64x96xf32>
    %201 = arith.addf %194, %200 : vector<64x96xf32>
    %c1_190 = arith.constant 1 : index
    %c1_191 = arith.constant 1 : index
    %c0_192 = arith.constant 0 : index
    %202 = vector.load %arg21[%c1_190, %c1_191, %c0_192] : memref<10x10x96xf32, #tpu.memory_space<vmem>>, vector<8x8x96xf32>
    %203 = vector.shape_cast %202 : vector<8x8x96xf32> to vector<64x96xf32>
    %204 = arith.truncf %203 : vector<64x96xf32> to vector<64x96xbf16>
    %c4_193 = arith.constant 4 : index
    %c0_194 = arith.constant 0 : index
    %c0_195 = arith.constant 0 : index
    %205 = vector.load %arg11[%c4_193, %c0_194, %c0_195] : memref<9x96x96xbf16, #tpu.memory_space<vmem>>, vector<1x96x96xbf16>
    %206 = vector.shape_cast %205 : vector<1x96x96xbf16> to vector<96x96xbf16>
    %cst_196 = arith.constant dense<0.000000e+00> : vector<64x96xf32>
    %207 = tpu.matmul %204, %206, %cst_196 {dimension_numbers = #tpu.dot_dimension_numbers<[1], [0], [0], [1], [0, 0, 1, 1], [], []>} : vector<64x96xbf16>, vector<96x96xbf16>, vector<64x96xf32> -> vector<64x96xf32>
    %208 = arith.addf %201, %207 : vector<64x96xf32>
    %c1_197 = arith.constant 1 : index
    %c2_198 = arith.constant 2 : index
    %c0_199 = arith.constant 0 : index
    %209 = vector.load %arg21[%c1_197, %c2_198, %c0_199] : memref<10x10x96xf32, #tpu.memory_space<vmem>>, vector<8x8x96xf32>
    %210 = vector.shape_cast %209 : vector<8x8x96xf32> to vector<64x96xf32>
    %211 = arith.truncf %210 : vector<64x96xf32> to vector<64x96xbf16>
    %c5_200 = arith.constant 5 : index
    %c0_201 = arith.constant 0 : index
    %c0_202 = arith.constant 0 : index
    %212 = vector.load %arg11[%c5_200, %c0_201, %c0_202] : memref<9x96x96xbf16, #tpu.memory_space<vmem>>, vector<1x96x96xbf16>
    %213 = vector.shape_cast %212 : vector<1x96x96xbf16> to vector<96x96xbf16>
    %cst_203 = arith.constant dense<0.000000e+00> : vector<64x96xf32>
    %214 = tpu.matmul %211, %213, %cst_203 {dimension_numbers = #tpu.dot_dimension_numbers<[1], [0], [0], [1], [0, 0, 1, 1], [], []>} : vector<64x96xbf16>, vector<96x96xbf16>, vector<64x96xf32> -> vector<64x96xf32>
    %215 = arith.addf %208, %214 : vector<64x96xf32>
    %c2_204 = arith.constant 2 : index
    %c0_205 = arith.constant 0 : index
    %c0_206 = arith.constant 0 : index
    %216 = vector.load %arg21[%c2_204, %c0_205, %c0_206] : memref<10x10x96xf32, #tpu.memory_space<vmem>>, vector<8x8x96xf32>
    %217 = vector.shape_cast %216 : vector<8x8x96xf32> to vector<64x96xf32>
    %218 = arith.truncf %217 : vector<64x96xf32> to vector<64x96xbf16>
    %c6_207 = arith.constant 6 : index
    %c0_208 = arith.constant 0 : index
    %c0_209 = arith.constant 0 : index
    %219 = vector.load %arg11[%c6_207, %c0_208, %c0_209] : memref<9x96x96xbf16, #tpu.memory_space<vmem>>, vector<1x96x96xbf16>
    %220 = vector.shape_cast %219 : vector<1x96x96xbf16> to vector<96x96xbf16>
    %cst_210 = arith.constant dense<0.000000e+00> : vector<64x96xf32>
    %221 = tpu.matmul %218, %220, %cst_210 {dimension_numbers = #tpu.dot_dimension_numbers<[1], [0], [0], [1], [0, 0, 1, 1], [], []>} : vector<64x96xbf16>, vector<96x96xbf16>, vector<64x96xf32> -> vector<64x96xf32>
    %222 = arith.addf %215, %221 : vector<64x96xf32>
    %c2_211 = arith.constant 2 : index
    %c1_212 = arith.constant 1 : index
    %c0_213 = arith.constant 0 : index
    %223 = vector.load %arg21[%c2_211, %c1_212, %c0_213] : memref<10x10x96xf32, #tpu.memory_space<vmem>>, vector<8x8x96xf32>
    %224 = vector.shape_cast %223 : vector<8x8x96xf32> to vector<64x96xf32>
    %225 = arith.truncf %224 : vector<64x96xf32> to vector<64x96xbf16>
    %c7_214 = arith.constant 7 : index
    %c0_215 = arith.constant 0 : index
    %c0_216 = arith.constant 0 : index
    %226 = vector.load %arg11[%c7_214, %c0_215, %c0_216] : memref<9x96x96xbf16, #tpu.memory_space<vmem>>, vector<1x96x96xbf16>
    %227 = vector.shape_cast %226 : vector<1x96x96xbf16> to vector<96x96xbf16>
    %cst_217 = arith.constant dense<0.000000e+00> : vector<64x96xf32>
    %228 = tpu.matmul %225, %227, %cst_217 {dimension_numbers = #tpu.dot_dimension_numbers<[1], [0], [0], [1], [0, 0, 1, 1], [], []>} : vector<64x96xbf16>, vector<96x96xbf16>, vector<64x96xf32> -> vector<64x96xf32>
    %229 = arith.addf %222, %228 : vector<64x96xf32>
    %c2_218 = arith.constant 2 : index
    %c2_219 = arith.constant 2 : index
    %c0_220 = arith.constant 0 : index
    %230 = vector.load %arg21[%c2_218, %c2_219, %c0_220] : memref<10x10x96xf32, #tpu.memory_space<vmem>>, vector<8x8x96xf32>
    %231 = vector.shape_cast %230 : vector<8x8x96xf32> to vector<64x96xf32>
    %232 = arith.truncf %231 : vector<64x96xf32> to vector<64x96xbf16>
    %c8_221 = arith.constant 8 : index
    %c0_222 = arith.constant 0 : index
    %c0_223 = arith.constant 0 : index
    %233 = vector.load %arg11[%c8_221, %c0_222, %c0_223] : memref<9x96x96xbf16, #tpu.memory_space<vmem>>, vector<1x96x96xbf16>
    %234 = vector.shape_cast %233 : vector<1x96x96xbf16> to vector<96x96xbf16>
    %cst_224 = arith.constant dense<0.000000e+00> : vector<64x96xf32>
    %235 = tpu.matmul %232, %234, %cst_224 {dimension_numbers = #tpu.dot_dimension_numbers<[1], [0], [0], [1], [0, 0, 1, 1], [], []>} : vector<64x96xbf16>, vector<96x96xbf16>, vector<64x96xf32> -> vector<64x96xf32>
    %236 = arith.addf %229, %235 : vector<64x96xf32>
    %c0_225 = arith.constant 0 : index
    %c0_226 = arith.constant 0 : index
    %237 = vector.load %arg12[%c0_225, %c0_226] : memref<1x96xf32, #tpu.memory_space<vmem>>, vector<1x96xf32>
    %238 = vector.broadcast %237 : vector<1x96xf32> to vector<64x96xf32>
    %239 = arith.mulf %236, %238 : vector<64x96xf32>
    %c0_227 = arith.constant 0 : index
    %c0_228 = arith.constant 0 : index
    %240 = vector.load %arg13[%c0_227, %c0_228] : memref<1x96xf32, #tpu.memory_space<vmem>>, vector<1x96xf32>
    %241 = vector.broadcast %240 : vector<1x96xf32> to vector<64x96xf32>
    %242 = arith.addf %239, %241 : vector<64x96xf32>
    %cst_229 = arith.constant 0.000000e+00 : f32
    %243 = vector.broadcast %cst_229 : f32 to vector<64x96xf32>
    %244 = arith.maximumf %242, %243 : vector<64x96xf32>
    %cst_230 = arith.constant 0.000000e+00 : f32
    %245 = vector.broadcast %cst_230 : f32 to vector<64x384xf32>
    %c0_231 = arith.constant 0 : index
    %c0_232 = arith.constant 0 : index
    %c0_233 = arith.constant 0 : index
    %c0_234 = arith.constant 0 : index
    %246 = vector.load %arg1[%c0_231, %c0_232, %c0_233, %c0_234] : memref<1x10x10x384xf32, #tpu.memory_space<vmem>>, vector<1x8x8x384xf32>
    %247 = vector.shape_cast %246 : vector<1x8x8x384xf32> to vector<8x8x384xf32>
    %248 = vector.shape_cast %247 : vector<8x8x384xf32> to vector<64x384xf32>
    %249 = arith.addf %245, %248 : vector<64x384xf32>
    %c0_235 = arith.constant 0 : index
    %c0_236 = arith.constant 0 : index
    %c1_237 = arith.constant 1 : index
    %c0_238 = arith.constant 0 : index
    %250 = vector.load %arg1[%c0_235, %c0_236, %c1_237, %c0_238] : memref<1x10x10x384xf32, #tpu.memory_space<vmem>>, vector<1x8x8x384xf32>
    %251 = vector.shape_cast %250 : vector<1x8x8x384xf32> to vector<8x8x384xf32>
    %252 = vector.shape_cast %251 : vector<8x8x384xf32> to vector<64x384xf32>
    %253 = arith.addf %249, %252 : vector<64x384xf32>
    %c0_239 = arith.constant 0 : index
    %c0_240 = arith.constant 0 : index
    %c2_241 = arith.constant 2 : index
    %c0_242 = arith.constant 0 : index
    %254 = vector.load %arg1[%c0_239, %c0_240, %c2_241, %c0_242] : memref<1x10x10x384xf32, #tpu.memory_space<vmem>>, vector<1x8x8x384xf32>
    %255 = vector.shape_cast %254 : vector<1x8x8x384xf32> to vector<8x8x384xf32>
    %256 = vector.shape_cast %255 : vector<8x8x384xf32> to vector<64x384xf32>
    %257 = arith.addf %253, %256 : vector<64x384xf32>
    %c0_243 = arith.constant 0 : index
    %c1_244 = arith.constant 1 : index
    %c0_245 = arith.constant 0 : index
    %c0_246 = arith.constant 0 : index
    %258 = vector.load %arg1[%c0_243, %c1_244, %c0_245, %c0_246] : memref<1x10x10x384xf32, #tpu.memory_space<vmem>>, vector<1x8x8x384xf32>
    %259 = vector.shape_cast %258 : vector<1x8x8x384xf32> to vector<8x8x384xf32>
    %260 = vector.shape_cast %259 : vector<8x8x384xf32> to vector<64x384xf32>
    %261 = arith.addf %257, %260 : vector<64x384xf32>
    %c0_247 = arith.constant 0 : index
    %c1_248 = arith.constant 1 : index
    %c1_249 = arith.constant 1 : index
    %c0_250 = arith.constant 0 : index
    %262 = vector.load %arg1[%c0_247, %c1_248, %c1_249, %c0_250] : memref<1x10x10x384xf32, #tpu.memory_space<vmem>>, vector<1x8x8x384xf32>
    %263 = vector.shape_cast %262 : vector<1x8x8x384xf32> to vector<8x8x384xf32>
    %264 = vector.shape_cast %263 : vector<8x8x384xf32> to vector<64x384xf32>
    %265 = arith.addf %261, %264 : vector<64x384xf32>
    %c0_251 = arith.constant 0 : index
    %c1_252 = arith.constant 1 : index
    %c2_253 = arith.constant 2 : index
    %c0_254 = arith.constant 0 : index
    %266 = vector.load %arg1[%c0_251, %c1_252, %c2_253, %c0_254] : memref<1x10x10x384xf32, #tpu.memory_space<vmem>>, vector<1x8x8x384xf32>
    %267 = vector.shape_cast %266 : vector<1x8x8x384xf32> to vector<8x8x384xf32>
    %268 = vector.shape_cast %267 : vector<8x8x384xf32> to vector<64x384xf32>
    %269 = arith.addf %265, %268 : vector<64x384xf32>
    %c0_255 = arith.constant 0 : index
    %c2_256 = arith.constant 2 : index
    %c0_257 = arith.constant 0 : index
    %c0_258 = arith.constant 0 : index
    %270 = vector.load %arg1[%c0_255, %c2_256, %c0_257, %c0_258] : memref<1x10x10x384xf32, #tpu.memory_space<vmem>>, vector<1x8x8x384xf32>
    %271 = vector.shape_cast %270 : vector<1x8x8x384xf32> to vector<8x8x384xf32>
    %272 = vector.shape_cast %271 : vector<8x8x384xf32> to vector<64x384xf32>
    %273 = arith.addf %269, %272 : vector<64x384xf32>
    %c0_259 = arith.constant 0 : index
    %c2_260 = arith.constant 2 : index
    %c1_261 = arith.constant 1 : index
    %c0_262 = arith.constant 0 : index
    %274 = vector.load %arg1[%c0_259, %c2_260, %c1_261, %c0_262] : memref<1x10x10x384xf32, #tpu.memory_space<vmem>>, vector<1x8x8x384xf32>
    %275 = vector.shape_cast %274 : vector<1x8x8x384xf32> to vector<8x8x384xf32>
    %276 = vector.shape_cast %275 : vector<8x8x384xf32> to vector<64x384xf32>
    %277 = arith.addf %273, %276 : vector<64x384xf32>
    %c0_263 = arith.constant 0 : index
    %c2_264 = arith.constant 2 : index
    %c2_265 = arith.constant 2 : index
    %c0_266 = arith.constant 0 : index
    %278 = vector.load %arg1[%c0_263, %c2_264, %c2_265, %c0_266] : memref<1x10x10x384xf32, #tpu.memory_space<vmem>>, vector<1x8x8x384xf32>
    %279 = vector.shape_cast %278 : vector<1x8x8x384xf32> to vector<8x8x384xf32>
    %280 = vector.shape_cast %279 : vector<8x8x384xf32> to vector<64x384xf32>
    %281 = arith.addf %277, %280 : vector<64x384xf32>
    %c0_267 = arith.constant 0 : index
    %c0_268 = arith.constant 0 : index
    %282 = vector.load %arg17[%c0_267, %c0_268] : memref<64x1xf32, #tpu.memory_space<vmem>>, vector<64x1xf32>
    %283 = vector.broadcast %282 : vector<64x1xf32> to vector<64x384xf32>
    %284 = arith.mulf %281, %283 : vector<64x384xf32>
    %285 = arith.truncf %284 : vector<64x384xf32> to vector<64x384xbf16>
    %c0_269 = arith.constant 0 : index
    %c0_270 = arith.constant 0 : index
    %286 = vector.load %arg14[%c0_269, %c0_270] : memref<384x96xbf16, #tpu.memory_space<vmem>>, vector<384x96xbf16>
    %cst_271 = arith.constant dense<0.000000e+00> : vector<64x96xf32>
    %287 = tpu.matmul %285, %286, %cst_271 {dimension_numbers = #tpu.dot_dimension_numbers<[1], [0], [0], [1], [0, 0, 1, 1], [], []>} : vector<64x384xbf16>, vector<384x96xbf16>, vector<64x96xf32> -> vector<64x96xf32>
    %c0_272 = arith.constant 0 : index
    %c0_273 = arith.constant 0 : index
    %288 = vector.load %arg15[%c0_272, %c0_273] : memref<1x96xf32, #tpu.memory_space<vmem>>, vector<1x96xf32>
    %289 = vector.broadcast %288 : vector<1x96xf32> to vector<64x96xf32>
    %290 = arith.mulf %287, %289 : vector<64x96xf32>
    %c0_274 = arith.constant 0 : index
    %c0_275 = arith.constant 0 : index
    %291 = vector.load %arg16[%c0_274, %c0_275] : memref<1x96xf32, #tpu.memory_space<vmem>>, vector<1x96xf32>
    %292 = vector.broadcast %291 : vector<1x96xf32> to vector<64x96xf32>
    %293 = arith.addf %290, %292 : vector<64x96xf32>
    %cst_276 = arith.constant 0.000000e+00 : f32
    %294 = vector.broadcast %cst_276 : f32 to vector<64x96xf32>
    %295 = arith.maximumf %293, %294 : vector<64x96xf32>
    %296 = tpu.concatenate %14, %91, %244, %295 in 1 : vector<64x96xf32>, vector<64x96xf32>, vector<64x96xf32>, vector<64x96xf32> -> vector<64x384xf32>
    %297 = vector.shape_cast %296 : vector<64x384xf32> to vector<8x8x384xf32>
    %c0_277 = arith.constant 0 : index
    %c0_278 = arith.constant 0 : index
    %c0_279 = arith.constant 0 : index
    %c0_280 = arith.constant 0 : index
    %298 = vector.load %arg18[%c0_277, %c0_278, %c0_279, %c0_280] : memref<1x8x8x384xf32, #tpu.memory_space<vmem>>, vector<1x8x8x384xf32>
    %299 = vector.shape_cast %298 : vector<1x8x8x384xf32> to vector<8x8x384xf32>
    %300 = vector.shape_cast %297 : vector<8x8x384xf32> to vector<1x8x8x384xf32>
    tpu.vector_store %arg18[%c0_277, %c0_278, %c0_279, %c0_280], %300 {strides = array<i32>} : memref<1x8x8x384xf32, #tpu.memory_space<vmem>>, vector<1x8x8x384xf32>,
    return
  }
  func.func @transform_0(%arg0: i32) -> (i32, i32, i32, i32) {
    %c0_i32 = arith.constant 0 : i32
    %c0_i32_0 = arith.constant 0 : i32
    %c0_i32_1 = arith.constant 0 : i32
    %c0_i32_2 = arith.constant 0 : i32
    return %arg0, %c0_i32, %c0_i32_0, %c0_i32_1 : i32, i32, i32, i32
  }
  func.func @transform_1(%arg0: i32) -> (i32, i32) {
    %c0_i32 = arith.constant 0 : i32
    %c0_i32_0 = arith.constant 0 : i32
    %c0_i32_1 = arith.constant 0 : i32
    return %c0_i32, %c0_i32_0 : i32, i32
  }
  func.func @transform_2(%arg0: i32) -> (i32, i32) {
    %c0_i32 = arith.constant 0 : i32
    %c0_i32_0 = arith.constant 0 : i32
    %c0_i32_1 = arith.constant 0 : i32
    return %c0_i32, %c0_i32_0 : i32, i32
  }
  func.func @transform_3(%arg0: i32) -> (i32, i32) {
    %c0_i32 = arith.constant 0 : i32
    %c0_i32_0 = arith.constant 0 : i32
    %c0_i32_1 = arith.constant 0 : i32
    return %c0_i32, %c0_i32_0 : i32, i32
  }
  func.func @transform_4(%arg0: i32) -> (i32, i32, i32) {
    %c0_i32 = arith.constant 0 : i32
    %c0_i32_0 = arith.constant 0 : i32
    %c0_i32_1 = arith.constant 0 : i32
    %c0_i32_2 = arith.constant 0 : i32
    return %c0_i32, %c0_i32_0, %c0_i32_1 : i32, i32, i32
  }
  func.func @transform_5(%arg0: i32) -> (i32, i32) {
    %c0_i32 = arith.constant 0 : i32
    %c0_i32_0 = arith.constant 0 : i32
    %c0_i32_1 = arith.constant 0 : i32
    return %c0_i32, %c0_i32_0 : i32, i32
  }
  func.func @transform_6(%arg0: i32) -> (i32, i32) {
    %c0_i32 = arith.constant 0 : i32
    %c0_i32_0 = arith.constant 0 : i32
    %c0_i32_1 = arith.constant 0 : i32
    return %c0_i32, %c0_i32_0 : i32, i32
  }
  func.func @transform_7(%arg0: i32) -> (i32, i32, i32) {
    %c0_i32 = arith.constant 0 : i32
    %c0_i32_0 = arith.constant 0 : i32
    %c0_i32_1 = arith.constant 0 : i32
    %c0_i32_2 = arith.constant 0 : i32
    return %c0_i32, %c0_i32_0, %c0_i32_1 : i32, i32, i32
  }
  func.func @transform_8(%arg0: i32) -> (i32, i32) {
    %c0_i32 = arith.constant 0 : i32
    %c0_i32_0 = arith.constant 0 : i32
    %c0_i32_1 = arith.constant 0 : i32
    return %c0_i32, %c0_i32_0 : i32, i32
  }
  func.func @transform_9(%arg0: i32) -> (i32, i32) {
    %c0_i32 = arith.constant 0 : i32
    %c0_i32_0 = arith.constant 0 : i32
    %c0_i32_1 = arith.constant 0 : i32
    return %c0_i32, %c0_i32_0 : i32, i32
  }
  func.func @transform_10(%arg0: i32) -> (i32, i32, i32) {
    %c0_i32 = arith.constant 0 : i32
    %c0_i32_0 = arith.constant 0 : i32
    %c0_i32_1 = arith.constant 0 : i32
    %c0_i32_2 = arith.constant 0 : i32
    return %c0_i32, %c0_i32_0, %c0_i32_1 : i32, i32, i32
  }
  func.func @transform_11(%arg0: i32) -> (i32, i32) {
    %c0_i32 = arith.constant 0 : i32
    %c0_i32_0 = arith.constant 0 : i32
    %c0_i32_1 = arith.constant 0 : i32
    return %c0_i32, %c0_i32_0 : i32, i32
  }
  func.func @transform_12(%arg0: i32) -> (i32, i32) {
    %c0_i32 = arith.constant 0 : i32
    %c0_i32_0 = arith.constant 0 : i32
    %c0_i32_1 = arith.constant 0 : i32
    return %c0_i32, %c0_i32_0 : i32, i32
  }
  func.func @transform_13(%arg0: i32) -> (i32, i32) {
    %c0_i32 = arith.constant 0 : i32
    %c0_i32_0 = arith.constant 0 : i32
    %c0_i32_1 = arith.constant 0 : i32
    return %c0_i32, %c0_i32_0 : i32, i32
  }
  func.func @transform_14(%arg0: i32) -> (i32, i32) {
    %c0_i32 = arith.constant 0 : i32
    %c0_i32_0 = arith.constant 0 : i32
    %c0_i32_1 = arith.constant 0 : i32
    return %c0_i32, %c0_i32_0 : i32, i32
  }
  func.func @transform_15(%arg0: i32) -> (i32, i32) {
    %c0_i32 = arith.constant 0 : i32
    %c0_i32_0 = arith.constant 0 : i32
    %c0_i32_1 = arith.constant 0 : i32
    return %c0_i32, %c0_i32_0 : i32, i32
  }
  func.func @transform_16(%arg0: i32) -> (i32, i32) {
    %c0_i32 = arith.constant 0 : i32
    %c0_i32_0 = arith.constant 0 : i32
    %c0_i32_1 = arith.constant 0 : i32
    return %c0_i32, %c0_i32_0 : i32, i32
  }
  func.func @transform_17(%arg0: i32) -> (i32, i32, i32, i32) {
    %c0_i32 = arith.constant 0 : i32
    %c0_i32_0 = arith.constant 0 : i32
    %c0_i32_1 = arith.constant 0 : i32
    %c0_i32_2 = arith.constant 0 : i32
    return %arg0, %c0_i32, %c0_i32_0, %c0_i32_1 : i32, i32, i32, i32
  }
}

</mosaic_0001>

<bundles_post_ra>
// kernel: inception_a_forward.1
= control target key start
LH: loop header
LB: loop body
LE: loop exit
PB: predicated region body
PF: predicated region fallthrough
CT: control target
= control target key end

     0   :  { %s12301_s0 = inlined_call_operand.vmem [shape: f32[2,10,10,384], index: 0, kind: input, shape index: {}]   ;;  %s12302_s1 = inlined_call_operand.vmem [shape: bf16[384,224], index: 1, kind: input, shape index: {}]   ;;  %s12303_s2 = inlined_call_operand.vmem [shape: f32[1,224], index: 2, kind: input, shape index: {}]   ;;  %s12304_s3 = inlined_call_operand.vmem [shape: f32[1,224], index: 3, kind: input, shape index: {}]   ;;  %s12305_s4 = inlined_call_operand.vmem [shape: bf16[9,64,96], index: 4, kind: input, shape index: {}]   ;;  %s12306_s5 = inlined_call_operand.vmem [shape: f32[1,96], index: 5, kind: input, shape index: {}]   ;;  %s12307_s6 = inlined_call_operand.vmem [shape: f32[1,96], index: 6, kind: input, shape index: {}]   ;;  %s12308_s7 = inlined_call_operand.vmem [shape: bf16[9,64,96], index: 7, kind: input, shape index: {}]   ;;  %s12309_s8 = inlined_call_operand.vmem [shape: f32[1,96], index: 8, kind: input, shape index: {}]   ;;  %s12310_s9 = inlined_call_operand.vmem [shape: f32[1,96], index: 9, kind: input, shape index: {}]   ;;  %s12311_s10 = inlined_call_operand.vmem [shape: bf16[9,96,96], index: 10, kind: input, shape index: {}]   ;;  %s12312_s11 = inlined_call_operand.vmem [shape: f32[1,96], index: 11, kind: input, shape index: {}]   ;;  %s12313_s12 = inlined_call_operand.vmem [shape: f32[1,96], index: 12, kind: input, shape index: {}]   ;;  %s12314_s13 = inlined_call_operand.vmem [shape: bf16[384,96], index: 13, kind: input, shape index: {}]   ;;  %s12315_s14 = inlined_call_operand.vmem [shape: f32[1,96], index: 14, kind: input, shape index: {}]   ;;  %s12316_s15 = inlined_call_operand.vmem [shape: f32[1,96], index: 15, kind: input, shape index: {}]   ;;  %s12317_s16 = inlined_call_operand.vmem [shape: f32[64,1], index: 16, kind: input, shape index: {}]   ;;  %s12318_s17 = inlined_call_operand.hbm [shape: f32[2,8,8,384], index: 17, kind: output, shape index: {}]  }
   0x1   :  { %12337 = sst [smem:[#allocation26_spill]] %s12301_s0 }
   0x2   :  { %12338 = sst [smem:[#allocation27_spill]] %s12302_s1 }
   0x3   :  { %12339 = sst [smem:[#allocation28_spill]] %s12303_s2 }
   0x4   :  { %12340 = sst [smem:[#allocation29_spill]] %s12318_s17 }
   0x5   :  { %22 = vsyncpa [#allocation6], 0 }
   0x6   :  { %24 = vsyncpa [#allocation6 + $0x1], 0  ;;  %s9466_s24 = smov 0   ;;  %s9468_s25 = smov 0  }
   0x7   :  { %s9470_s26 = smov 0   ;;  %s9472_s27 = smov 0  }
   0x8 LB: > { %12341 = sst [smem:[#allocation8_spill]] %s9354_s24  ;;  %s9487_s28 = sadd.s32 4294967295, %s9366_s27   ;;  %s9366_s27 = sphi %s9472_s27, %s12427_s27   ;;  %s9362_s26 = sphi %s9470_s26, %s12429_s26   ;;  %s9358_s25 = sphi %s9468_s25, %s12431_s25   ;;  %s9354_s24 = sphi %s9466_s24, %s12430_s24  }
   0x9   : > { %12342 = sst [smem:[#allocation9_spill]] %s9362_s26  ;;  %s7210_s29 = sadd.s32 4294967294, %s9366_s27  }
   0xa   : > { %12343 = sst [smem:[#allocation10_spill]] %s9366_s27  ;;  %s9491_s0 = sadd.s32 1, %s9366_s27  }
   0xb   : > { %12344 = sst [smem:[#allocation11_spill]] %s9491_s0  ;;  %s399_s30 = sadd.s32 1, %s9362_s26 }
   0xc   : > { %s396_s18 = ssub.s32 %s9366_s27, %s9491_s0  ;;  %p409_p0 = scmp.ne.s32.totalorder %s9362_s26, %s9358_s25 }
   0xd   : > { %p397_p1 = scmp.eq.s32.totalorder %s396_s18, 0  ;;  %p410_p2 = scmp.eq.s32.totalorder %s9487_s28, 1 }
   0xe   : > { %p415_p3 = scmp.ne.s32.totalorder %s9358_s25, %s9354_s24  ;;  %p416_p4 = scmp.eq.s32.totalorder %s7210_s29, 1 }
   0xf   : > { %s9502_s19 = scalar_select %p397_p1, %s9362_s26, %s399_s30  }
  0x10   : > { %p9504_p5 = por %p410_p2, %p409_p0  ;;  %p9508_p6 = por %p416_p4, %p415_p3 }
  0x11   : > { %12345 = sst [smem:[#allocation12_spill]] %s9502_s19  ;;  %p7213_p7 = scmp.ge.s32.totalorder %s9366_s27, 1 }
  0x12   : > { %s12347_s20 = scalar_select %p9508_p6, 1, 0 }
  0x13   : > { %p490_p8 = scmp.lt.s32.totalorder %s9366_s27, 3 }
  0x14   : > { %12348 = sst [smem:[#allocation13_spill]] %s12347_s20 }
  0x15   : > { %p491_p9 = pnand %p7213_p7, %p490_p8 }
  0x17   : > { %494 = sbr.rel (%p491_p9) target bundleno = 1416 (0x588), region = 88 }
  0x1e   : > { %s12349_s23 = sld [smem:[#allocation27_spill]]  ;;  %v12327_v3 = vmov 0   ;;  %p542_p10 = scmp.lt.s32.totalorder %s9487_s28, 1  ;;  %vm645_vm0 = vcmask 1046528   ;;  %vm1260_vm1 = vcmask 523264   ;;  %vm1262_vm2 = vcmask 517120  }
  0x1f   : > { %9080 = vset.pattern.permute.xlu1 %v12327_v3  ;;  %9079 = vset.pattern.permute.xlu0 %v12327_v3  ;;  %s12350_s20 = sld [smem:[#allocation26_spill]]  ;;  %s12383_s2 = sld [smem:[#allocation28_spill]]  ;;  %vm5463_vm3 = vcmask 1045504   ;;  %vm3736_vm4 = vcmask 785408   ;;  %vm3738_vm5 = vcmask 779264   ;;  %vm7101_vm6 = vcmask 261120  }
  0x20   : > { %s543_s26 = scalar_select %p542_p10, %s9487_s28, 1 }
  0x21   : > { %s9371_s30 = smov 96   ;;  %s539_s29 = sand.u32 1, %s9358_s25  }
  0x22   : > { %s9031_s24 = smul.u32 480, %s543_s26  ;;  %s9372_s18 = smov 32  }
  0x23   : > { %s11598_s27 = smul.u32 192, %s539_s29  ;;  %s12260_s26 = scalar_lea.sflag [#allocation6], %s539_s29 }
  0x24   : > { %v9081_v0 = vld [vmem:[%s12349_s23 + $0x4] ss:$8 sps:$4 sm:$0xff]   ;;  %v9083_v1 = vld [vmem:[%s12349_s23] ss:$8 sps:$4 sm:$0xff]   ;;  %v9084_v2 = vld [vmem:[%s12349_s23 + $0x14] ss:$8 sps:$4 sm:$0xff]  }
  0x25   : > { %1042 = vmatprep.subr.bf16.mxu0 %v9081_v0  ;;  %v9086_v4 = vld [vmem:[%s12349_s23 + $0x10] ss:$8 sps:$4 sm:$0xff]   ;;  %v9087_v5 = vld [vmem:[%s12349_s23 + $0x24] ss:$8 sps:$4 sm:$0xff]   ;;  %v9089_v6 = vld [vmem:[%s12349_s23 + $0x20] ss:$8 sps:$4 sm:$0xff]   ;;  %s9554_s0 = scalar_lea.vmem %s12350_s20, %s9031_s24 }
  0x26   : > { %1043 = vmatpush1.bf16.msra.mxu0 %v9083_v1  ;;  %v9090_v7 = vld [vmem:[%s12349_s23 + $0x34] ss:$8 sps:$4 sm:$0xff]   ;;  %v9092_v8 = vld [vmem:[%s12349_s23 + $0x30] ss:$8 sps:$4 sm:$0xff]   ;;  %v9093_v9 = vld [vmem:[%s12349_s23 + $0x44] ss:$8 sps:$4 sm:$0xff]  }
  0x27   : > { %1044 = vmatprep.subr.bf16.mxu0 %v9084_v2  ;;  %v9095_v10 = vld [vmem:[%s12349_s23 + $0x40] ss:$8 sps:$4 sm:$0xff]   ;;  %v9096_v11 = vld [vmem:[%s12349_s23 + $0x54] ss:$8 sps:$4 sm:$0xff]   ;;  %v9098_v12 = vld [vmem:[%s12349_s23 + $0x50] ss:$8 sps:$4 sm:$0xff]  }
  0x28   : > { %v9099_v13 = vld [vmem:[%s12349_s23 + $0x64] ss:$8 sps:$4 sm:$0xff]   ;;  %v7216_v14 = vld [vmem:[%s9554_s0 + $0x38] sm:$0xfe]  ;;  %v7219_v15 = vld [vmem:[%s9554_s0 + $0x50] sm:$0x1] }
  0x29   : > { %v7222_v16 = vld [vmem:[%s9554_s0 + $0x68] sm:$0xfe]  ;;  %v7225_v17 = vld [vmem:[%s9554_s0 + $0x80] sm:$0x1]  ;;  %v649_v18 = vrot.slane %v7216_v14, 1  ;;  %v650_v19 = vrot.slane %v7219_v15, 1 }
  0x2a   : > { %1045 = vmatpush1.bf16.msra.mxu0 %v9086_v4  ;;  %v9101_v20 = vld [vmem:[%s12349_s23 + $0x60] ss:$8 sps:$4 sm:$0xff]   ;;  %v658_v21 = vrot.slane %v7222_v16, 1  ;;  %v659_v22 = vrot.slane %v7225_v17, 1  ;;  %v9102_v23 = vld [vmem:[%s12349_s23 + $0x74] ss:$8 sps:$4 sm:$0xff]  }
  0x2b   : > { %1046 = vmatprep.subr.bf16.mxu0 %v9087_v5  ;;  %v651_v24 = vsel %vm645_vm0, %v649_v18, %v650_v19  ;;  %v9104_v27 = vld [vmem:[%s12349_s23 + $0x70] ss:$8 sps:$4 sm:$0xff]   ;;  %v9105_v28 = vld [vmem:[%s12349_s23 + $0x84] ss:$8 sps:$4 sm:$0xff]   ;;  %v9584_v30 = vld [vmem:[%s9554_s0 + $0x48] sm:$0x1] }
  0x2c   : > { %v660_v25 = vsel %vm645_vm0, %v658_v21, %v659_v22  ;;  %v9581_v29 = vld [vmem:[%s9554_s0 + $0x30] sm:$0xfe]  ;;  %v9587_v31 = vld [vmem:[%s9554_s0 + $0x60] sm:$0xfe]  ;;  %v9590_v32 = vld [vmem:[%s9554_s0 + $0x78] sm:$0x1] }
  0x2d   : > { %v743_v26 = vpack.c.bf16 %v660_v25, %v651_v24  ;;  %v9107_v33 = vld [vmem:[%s12349_s23 + $0x80] ss:$8 sps:$4 sm:$0xff]   ;;  %v9108_v34 = vld [vmem:[%s12349_s23 + $0x94] ss:$8 sps:$4 sm:$0xff]   ;;  %v646_v35 = vrot.slane %v9581_v29, 1  ;;  %v647_v36 = vrot.slane %v9584_v30, 1 }
  0x2e   : > { %1047 = vmatpush1.bf16.msra.mxu0 %v9089_v6  ;;  %v655_v37 = vrot.slane %v9587_v31, 1  ;;  %v656_v38 = vrot.slane %v9590_v32, 1  ;;  %v9603_v39 = vld [vmem:[%s9554_s0 + $0x98] sm:$0xfe]  ;;  %v9609_v41 = vld [vmem:[%s9554_s0 + $0xb0] sm:$0x1] }
  0x2f   : > { %1048 = vmatprep.subr.bf16.mxu0 %v9090_v7  ;;  %1074 = vmatprep.mubr.bf16.mxu0 %v743_v26  ;;  %v9110_v40 = vld [vmem:[%s12349_s23 + $0x90] ss:$8 sps:$4 sm:$0xff]   ;;  %v9612_v42 = vld [vmem:[%s9554_s0 + $0xc8] sm:$0xfe]  ;;  %v9615_v43 = vld [vmem:[%s9554_s0 + $0xe0] sm:$0x1]  ;;  %v648_v17 = vsel %vm645_vm0, %v646_v35, %v647_v36 }
  0x30   : > { %v9111_v44 = vld [vmem:[%s12349_s23 + $0xa4] ss:$8 sps:$4 sm:$0xff]   ;;  %v9621_v45 = vld [vmem:[%s9554_s0 + $0x90] sm:$0xfe]  ;;  %v9624_v46 = vld [vmem:[%s9554_s0 + $0xa8] sm:$0x1] }
  0x31   : > { %v9627_v47 = vld [vmem:[%s9554_s0 + $0xc0] sm:$0xfe]  ;;  %v667_v48 = vrot.slane %v9603_v39, 1  ;;  %v9631_v49 = vld [vmem:[%s9554_s0 + $0xd8] sm:$0x1]  ;;  %v668_v55 = vrot.slane %v9609_v41, 1 }
  0x32   : > { %1049 = vmatpush1.bf16.msra.mxu0 %v9092_v8  ;;  %v9634_v50 = vld [vmem:[%s9554_s0 + $0xf8] sm:$0xfe]  ;;  %v9637_v51 = vld [vmem:[%s9554_s0 + $0x110] sm:$0x1]  ;;  %v9640_v52 = vld [vmem:[%s9554_s0 + $0x128] sm:$0xfe] }
  0x33   : > { %1050 = vmatprep.subr.bf16.mxu0 %v9093_v9  ;;  %v9643_v53 = vld [vmem:[%s9554_s0 + $0x140] sm:$0x1]  ;;  %v676_v56 = vrot.slane %v9612_v42, 1  ;;  %v677_v57 = vrot.slane %v9615_v43, 1  ;;  %v664_v58 = vrot.slane %v9621_v45, 1  ;;  %v665_v60 = vrot.slane %v9624_v46, 1 }
  0x34   : > { %v9113_v54 = vld [vmem:[%s12349_s23 + $0xa0] ss:$8 sps:$4 sm:$0xff]   ;;  %v9114_v59 = vld [vmem:[%s12349_s23 + $0xb4] ss:$8 sps:$4 sm:$0xff]   ;;  %v674_v62 = vrot.slane %v9631_v49, 1  ;;  %v12351_v39 = vrot.slane %v9627_v47, 1 }
  0x35   : > { %v9659_v63 = vld [vmem:[%s9554_s0 + $0xf0] sm:$0xfe]  ;;  %v9666_v5 = vld [vmem:[%s9554_s0 + $0x108] sm:$0x1]  ;;  %v9669_v6 = vld [vmem:[%s9554_s0 + $0x120] sm:$0xfe]  ;;  %v678_v29 = vsel %vm645_vm0, %v676_v56, %v677_v57 }
  0x36   : > { %1051 = vmatpush1.bf16.msra.mxu0 %v9095_v10  ;;  %v9672_v7 = vld [vmem:[%s9554_s0 + $0x138] sm:$0x1]  ;;  %v9675_v8 = vld [vmem:[%s9554_s0 + $0x158] sm:$0xfe]  ;;  %v9691_v14 = vld [vmem:[%s9554_s0 + $0x1a0] sm:$0x1]  ;;  %v675_v41 = vsel %vm645_vm0, %v12351_v39, %v674_v62 }
  0x37   : > { %1052 = vmatprep.subr.bf16.mxu0 %v9096_v11  ;;  %v9116_v9 = vld [vmem:[%s12349_s23 + $0xb0] ss:$8 sps:$4 sm:$0xff]   ;;  %v9697_v16 = vld [vmem:[%s9554_s0 + $0x168] sm:$0x1]  ;;  %v9705_v22 = vld [vmem:[%s9554_s0 + $0x180] sm:$0xfe] }
  0x38   : > { %v9682_v11 = vld [vmem:[%s9554_s0 + $0x170] sm:$0x1]  ;;  %v9694_v15 = vld [vmem:[%s9554_s0 + $0x150] sm:$0xfe]  ;;  %v9119_v24 = vld [vmem:[%s12349_s23 + $0xc0] ss:$8 sps:$4 sm:$0xff]  }
  0x39   : > { %v9737_v25 = vld [vmem:[%s9554_s0 + $0xa0] sm:$0xfe]  ;;  %v9742_v21 = vld [vmem:[%s9554_s0 + $0xb8] sm:$0x1]  ;;  %v9767_v10 = vld [vmem:[%s9554_s0 + $0x130] sm:$0xfe] }
  0x3a   : > { %1053 = vmatpush1.bf16.msra.mxu0 %v9098_v12  ;;  %v9685_v12 = vld [vmem:[%s9554_s0 + $0x188] sm:$0xfe]  ;;  %v9756_v26 = vld [vmem:[%s9554_s0 + $0x100] sm:$0xfe]  ;;  %v9764_v19 = vld [vmem:[%s9554_s0 + $0x118] sm:$0x1] }
  0x3b   : > { %1054 = vmatprep.subr.bf16.mxu0 %v9099_v13  ;;  %v9117_v13 = vld [vmem:[%s12349_s23 + $0xc4] ss:$8 sps:$4 sm:$0xff]   ;;  %v9780_v0 = vld [vmem:[%s9554_s0 + $0x178] sm:$0x1]  ;;  %v9783_v18 = vld [vmem:[%s9554_s0 + $0x190] sm:$0xfe] }
  0x3c   : > { %v9775_v2 = vld [vmem:[%s9554_s0 + $0x160] sm:$0xfe]  ;;  %v9789_v1 = vld [vmem:[%s9554_s0 + $0x1a8] sm:$0x1]  ;;  %v715_v4 = vrot.slane %v9783_v18, 1  ;;  %v12352_v42 = vrot.slane %v9637_v51, 1 }
  0x3d   : > { %v716_v3 = vrot.slane %v9789_v1, 1  ;;  %v9128_v61 = vld [vmem:[%s12349_s23 + $0xf0] ss:$8 sps:$4 sm:$0xff]   ;;  %v9129_v30 = vld [vmem:[%s12349_s23 + $0x100] ss:$8 sps:$4 sm:$0xff]   ;;  %v12353_v43 = vrot.slane %v9634_v50, 1 }
  0x3e   : > { %1055 = vmatpush1.bf16.msra.mxu0 %v9101_v20  ;;  %v9123_v20 = vld [vmem:[%s12349_s23 + $0xe4] ss:$8 sps:$4 sm:$0xff]   ;;  %v9134_v32 = vld [vmem:[%s12349_s23 + $0x114] ss:$8 sps:$4 sm:$0xff]   ;;  %v9132_v36 = vld [vmem:[%s12349_s23 + $0x110] ss:$8 sps:$4 sm:$0xff]  }
  0x3f   : > { %1056 = vmatprep.subr.bf16.mxu0 %v9102_v23  ;;  %v9708_v23 = vld [vmem:[%s9554_s0 + $0x198] sm:$0x1]  ;;  %v12355_v46 = vrot.slane %v9640_v52, 1  ;;  %v9135_v49 = vld [vmem:[%s12349_s23 + $0x120] ss:$8 sps:$4 sm:$0xff]   ;;  %v12357_v57 = vrot.slane %v9659_v63, 1 }
  0x40   : > { %v9140_v56 = vld [vmem:[%s12349_s23 + $0x134] ss:$8 sps:$4 sm:$0xff]   ;;  %v9138_v50 = vld [vmem:[%s12349_s23 + $0x130] ss:$8 sps:$4 sm:$0xff]   ;;  %v9143_v52 = vld [vmem:[%s12349_s23 + $0x144] ss:$8 sps:$4 sm:$0xff]  }
  0x41   : > { %v9977_v1 = vld [vmem:[%s12304_s3] sm:$0x3]  ;;  %s9370_s20 = smov 64   ;;  %s11658_s19 = scalar_lea.vmem [#allocation5], %s11598_s27 }
  0x42   : > { %1057 = vmatpush1.bf16.msra.mxu0 %v9104_v27  ;;  %v9122_v27 = vld [vmem:[%s12349_s23 + $0xd0] ss:$8 sps:$4 sm:$0xff]   ;;  %v9153_v18 = vld [vmem:[%s12305_s4 + $0x20] sm:$0xff]   ;;  %s7148_s17 = sshll.u32 %s11658_s19, 4  ;;  %s12422_s27 = sld [smem:[#allocation29_spill]]  ;;  %s12248_s17 = int_to_ptr.vmem [resolvable:$true] %s7148_s17 }
  0x43   : > { %1058 = vmatprep.subr.bf16.mxu0 %v9105_v28  ;;  %v9770_v28 = vld [vmem:[%s9554_s0 + $0x148] sm:$0x1]  ;;  %s9304_s21 = scalar_lea.vmem %s12248_s17, 3072  ;;  %s9373_s22 = smov [#allocation5]  }
  0x44   : > { %p9305_p11 = scmp.ne.s32.totalorder %s12248_s17, %s9304_s21 }
  0x46   : > { %1059 = vmatpush1.bf16.msra.mxu0 %v9107_v33  ;;  %v9718_v33 = vld [vmem:[%s9554_s0 + $0x40] sm:$0xfe]  ;;  %p9306_p12 = pnand %p9305_p11, %p9504_p5 }
  0x47   : > { %1060 = vmatprep.subr.bf16.mxu0 %v9108_v34  ;;  %v9120_v34 = vld [vmem:[%s12349_s23 + $0xd4] ss:$8 sps:$4 sm:$0xff]  }
  0x48   : > { %p9307_p13 = pneg %p9306_p12 }
  0x4a   : > { %1061 = vmatpush1.bf16.msra.mxu0 %v9110_v40  ;;  %v9724_v40 = vld [vmem:[%s9554_s0 + $0x58] sm:$0x1] }
  0x4b   : > { %1062 = vmatprep.subr.bf16.mxu0 %v9111_v44  ;;  %v9727_v44 = vld [vmem:[%s9554_s0 + $0x70] sm:$0xfe] }
  0x4e   : > { %1063 = vmatpush1.bf16.msra.mxu0 %v9113_v54  ;;  %v9730_v54 = vld [vmem:[%s9554_s0 + $0x88] sm:$0x1] }
  0x4f   : > { %1064 = vmatprep.subr.bf16.mxu0 %v9114_v59  ;;  %v9751_v59 = vld [vmem:[%s9554_s0 + $0xe8] sm:$0x1]  ;;  %v12371_v39 = vrot.slane %v9730_v54, 1 }
  0x52   : > { %1065 = vmatpush1.bf16.msra.mxu0 %v9116_v9  ;;  %v9745_v9 = vld [vmem:[%s9554_s0 + $0xd0] sm:$0xfe] }
  0x53   : > { %1066 = vmatprep.subr.bf16.mxu0 %v9117_v13  ;;  %v9131_v13 = vld [vmem:[%s12349_s23 + $0x104] ss:$8 sps:$4 sm:$0xff]   ;;  %v12376_v54 = vrot.slane %v9745_v9, 1  ;;  %v12381_v9 = vrot.slane %v9780_v0, 1 }
  0x56   : > { %1067 = vmatpush1.bf16.msra.mxu0 %v9119_v24  ;;  %v9125_v24 = vld [vmem:[%s12349_s23 + $0xe0] ss:$8 sps:$4 sm:$0xff]  }
  0x57   : > { %1068 = vmatprep.subr.bf16.mxu0 %v9120_v34  ;;  %v9126_v34 = vld [vmem:[%s12349_s23 + $0xf4] ss:$8 sps:$4 sm:$0xff]  }
  0x5a   : > { %1069 = vmatpush1.bf16.msra.mxu0 %v9122_v27  ;;  %v669_v27 = vsel %vm645_vm0, %v667_v48, %v668_v55  ;;  %v687_v48 = vsel %vm645_vm0, %v12353_v43, %v12352_v42  ;;  %v12354_v55 = vrot.slane %v9643_v53, 1  ;;  %v12356_v53 = vrot.slane %v9666_v5, 1 }
  0x5b   : > { %1070 = vmatprep.subr.bf16.mxu0 %v9123_v20  ;;  %v657_v20 = vsel %vm645_vm0, %v655_v37, %v656_v38  ;;  %v746_v35 = vpack.c.bf16 %v678_v29, %v669_v27  ;;  %v9137_v37 = vld [vmem:[%s12349_s23 + $0x124] ss:$8 sps:$4 sm:$0xff]   ;;  %v666_v38 = vsel %vm645_vm0, %v664_v58, %v665_v60  ;;  %v12358_v60 = vrot.slane %v9672_v7, 1  ;;  %v9141_v7 = vld [vmem:[%s12349_s23 + $0x140] ss:$8 sps:$4 sm:$0xff]  }
  0x5c   : > { %v742_v31 = vpack.c.bf16 %v657_v20, %v648_v17  ;;  %v696_v45 = vsel %vm645_vm0, %v12355_v46, %v12354_v55  ;;  %v745_v47 = vpack.c.bf16 %v675_v41, %v666_v38  ;;  %v684_v58 = vsel %vm645_vm0, %v12357_v57, %v12356_v53  ;;  %v9146_v20 = vld [vmem:[%s12349_s23 + $0x154] ss:$8 sps:$4 sm:$0xff]   ;;  %v9154_v53 = vld [vmem:[%s12305_s4] sm:$0xff]   ;;  %v9155_v57 = vld [vmem:[%s12305_s4 + $0x28] sm:$0xff]  }
  0x5d   : > { %v749_v51 = vpack.c.bf16 %v696_v45, %v687_v48  ;;  %v12360_v17 = vrot.slane %v9682_v11, 1  ;;  %v12363_v5 = vrot.slane %v9685_v12, 1  ;;  %v9149_v12 = vld [vmem:[%s12349_s23 + $0x164] ss:$8 sps:$4 sm:$0xff]   ;;  %v12365_v27 = vrot.slane %v9694_v15, 1  ;;  %8346 = vmatprep.subr.bf16.mxu1 %v9154_v53 }
  0x5e   : > { %1071 = vmatpush1.bf16.msra.mxu0 %v9125_v24  ;;  %v9150_v15 = vld [vmem:[%s12349_s23 + $0x170] ss:$8 sps:$4 sm:$0xff]   ;;  %v12372_v41 = vrot.slane %v9727_v44, 1  ;;  %v12373_v48 = vrot.slane %v9742_v21, 1  ;;  %v12375_v55 = vrot.slane %v9751_v59, 1  ;;  %v12377_v45 = vrot.slane %v9764_v19, 1  ;;  %8347 = vmatpush3.bf16.msra.mxu1 %v9154_v53 }
  0x5f   : > { %1072 = vmatprep.subr.bf16.mxu0 %v9126_v34  ;;  %v12362_v34 = vrot.slane %v9691_v14, 1  ;;  %v12364_v14 = vrot.slane %v9697_v16, 1  ;;  %v9152_v16 = vld [vmem:[%s12349_s23 + $0x174] ss:$8 sps:$4 sm:$0xff]  }
  0x60   : > { %v663_v42 = vsel %vm645_vm0, %v12372_v41, %v12371_v39  ;;  %v681_v44 = vsel %vm645_vm0, %v12376_v54, %v12375_v55 }
  0x61   : > { %v714_v63 = vsel %vm645_vm0, %v12363_v5, %v12362_v34  ;;  %v702_v29 = vsel %vm645_vm0, %v12365_v27, %v12364_v14  ;;  %v10096_v34 = vld [vmem:[%s12308_s7 + $0x20] sm:$0xff]  }
  0x62   : > { %1073 = vmatpush1.bf16.msra.mxu0 %v9128_v61  ;;  %v12359_v61 = vrot.slane %v9669_v6, 1 }
  0x63   : > { %1115 = vmatprep.subr.bf16.mxu0 %v9131_v13  ;;  %v12361_v13 = vrot.slane %v9675_v8, 1  ;;  %v9144_v8 = vld [vmem:[%s12349_s23 + $0x150] ss:$8 sps:$4 sm:$0xff]  }
  0x64   : > { %v693_v62 = vsel %vm645_vm0, %v12359_v61, %v12358_v60  ;;  %v9157_v60 = vld [vmem:[%s12305_s4 + $0x30] sm:$0xff]  }
  0x65   : > { %1075 = vmatmul.mubr.bf16.vlgmr.msra.gmra.mrb[0].mxu0 %v742_v31  ;;  %v705_v24 = vsel %vm645_vm0, %v12361_v13, %v12360_v17  ;;  %v748_v6 = vpack.c.bf16 %v693_v62, %v684_v58  ;;  %v12367_v31 = vrot.slane %v9705_v22, 1  ;;  %v12368_v22 = vmov 0   ;;  %v9156_v58 = vld [vmem:[%s12305_s4 + $0x8] sm:$0xff]   ;;  %v9158_v61 = vld [vmem:[%s12305_s4 + $0x10] sm:$0xff]   ;;  %v9159_v62 = vld [vmem:[%s12305_s4 + $0x38] sm:$0xff]  }
  0x66   : > { %1116 = vmatpush1.bf16.msra.mxu0 %v9129_v30  ;;  %1084 = vmatprep.mubr.bf16.mxu0 %v746_v35  ;;  %v752_v11 = vpack.c.bf16 %v714_v63, %v705_v24  ;;  %v12366_v30 = vrot.slane %v9708_v23, 1  ;;  %v9147_v35 = vld [vmem:[%s12349_s23 + $0x160] ss:$8 sps:$4 sm:$0xff]   ;;  %v12369_v23 = vrot.slane %v9724_v40, 1  ;;  %v12374_v40 = vrot.slane %v9737_v25, 1  ;;  %v9160_v17 = vld [vmem:[%s12305_s4 + $0x18] sm:$0xff]  }
  0x67   : > { %1117 = vmatprep.subr.bf16.mxu0 %v9134_v32  ;;  %v12379_v25 = vrot.slane %v9770_v28, 1  ;;  %8348 = vmatprep.subr.bf16.mxu1 %v9156_v58  ;;  %v10089_v13 = vld [vmem:[%s12305_s4 + $0x40] sm:$0xff]  }
  0x68   : > { %v711_v32 = vsel %vm645_vm0, %v12367_v31, %v12366_v30  ;;  %8349 = vmatpush3.bf16.msra.mxu1 %v9156_v58 }
  0x69   : > { %8350 = vmatprep.subr.bf16.mxu1 %v9158_v61 }
  0x6a   : > { %1118 = vmatpush1.bf16.msra.mxu0 %v9132_v36  ;;  %v751_v36 = vpack.c.bf16 %v711_v32, %v702_v29 }
  0x6b   : > { %1119 = vmatprep.subr.bf16.mxu0 %v9137_v37  ;;  %v12370_v37 = vrot.slane %v9718_v33, 1  ;;  %v672_v33 = vsel %vm645_vm0, %v12374_v40, %v12373_v48 }
  0x6c   : > { %v747_v46 = vpack.c.bf16 %v681_v44, %v672_v33  ;;  %8351 = vmatpush3.bf16.msra.mxu1 %v9158_v61 }
  0x6d   : > { %1085 = vmatmul.mubr.bf16.gmra.mrb[4].mxu0 %v745_v47  ;;  %v654_v38 = vsel %vm645_vm0, %v12370_v37, %v12369_v23  ;;  %v12380_v47 = vrot.slane %v9767_v10, 1  ;;  %v1190_v10 = vlaneseq  ;;  %8352 = vmatprep.subr.bf16.mxu1 %v9160_v17 }
  0x6e   : > { %1120 = vmatpush1.bf16.msra.mxu0 %v9135_v49  ;;  %1094 = vmatprep.mubr.bf16.mxu0 %v749_v51  ;;  %v744_v43 = vpack.c.bf16 %v663_v42, %v654_v38  ;;  %v12378_v49 = vrot.slane %v9756_v26, 1  ;;  %v12382_v51 = vrot.slane %v9775_v2, 1  ;;  %v717_v26 = vsel %vm645_vm0, %v715_v4, %v716_v3 }
  0x6f   : > { %1121 = vmatprep.subr.bf16.mxu0 %v9140_v56  ;;  %v699_v59 = vsel %vm645_vm0, %v12380_v47, %v12379_v25  ;;  %v12329_v4 = vmov 0.0  }
  0x70   : > { %v690_v21 = vsel %vm645_vm0, %v12378_v49, %v12377_v45  ;;  %v708_v19 = vsel %vm645_vm0, %v12382_v51, %v12381_v9  ;;  %1266 = vst.msk [vmem:[#allocation2 + $0x20] sm:$0xff] %vm1260_vm1, %v12329_v4  ;;  %1261 = vst.msk [vmem:[#allocation2] sm:$0xff] %vm1260_vm1, %v12329_v4  ;;  %8353 = vmatpush3.bf16.msra.mxu1 %v9160_v17 }
  0x71   : > { %v750_v56 = vpack.c.bf16 %v699_v59, %v690_v21  ;;  %v753_v28 = vpack.c.bf16 %v717_v26, %v708_v19  ;;  %1267 = vst.msk [vmem:[#allocation2 + $0x28] sm:$0x3] %vm1262_vm2, %v12329_v4  ;;  %1263 = vst.msk [vmem:[#allocation2 + $0x8] sm:$0x3] %vm1262_vm2, %v12329_v4  ;;  %8362 = vmatprep.subr.bf16.mxu1 %v10089_v13 }
  0x72   : > { %1122 = vmatpush1.bf16.msra.mxu0 %v9138_v50  ;;  %v9963_v50 = vshrl.u32 %v1190_v10, 7  ;;  %1264 = vst.msk [vmem:[#allocation2 + $0x10] sm:$0xff] %vm1260_vm1, %v12329_v4  ;;  %1268 = vst.msk [vmem:[#allocation2 + $0x30] sm:$0xff] %vm1260_vm1, %v12329_v4 }
  0x73   : > { %1123 = vmatprep.subr.bf16.mxu0 %v9143_v52  ;;  %v9968_v52 = vld [vmem:[%s12383_s2] sm:$0x3]  ;;  %1265 = vst.msk [vmem:[#allocation2 + $0x18] sm:$0x3] %vm1262_vm2, %v12329_v4  ;;  %1269 = vst.msk [vmem:[#allocation2 + $0x38] sm:$0x3] %vm1262_vm2, %v12329_v4 }
  0x74   : > { %v1196_v0 = vsub.s32 1, %v9963_v50  ;;  %1270 = vst.msk [vmem:[#allocation2 + $0x40] sm:$0xff] %vm1260_vm1, %v12329_v4  ;;  %1272 = vst.msk [vmem:[#allocation2 + $0x50] sm:$0xff] %vm1260_vm1, %v12329_v4  ;;  %v1192_v24 = vsub.s32 0, %v9963_v50 }
  0x75   : > { %1095 = vmatmul.mubr.bf16.gmra.mrb[8].mxu0 %v748_v6  ;;  %1271 = vst.msk [vmem:[#allocation2 + $0x48] sm:$0x3] %vm1262_vm2, %v12329_v4  ;;  %1273 = vst.msk [vmem:[#allocation2 + $0x58] sm:$0x3] %vm1262_vm2, %v12329_v4 }
  0x76   : > { %1124 = vmatpush1.bf16.msra.mxu0 %v9141_v7  ;;  %1104 = vmatprep.mubr.bf16.mxu0 %v752_v11  ;;  %v9972_v2 = vrot.slane %v9968_v52, %v1196_v0  ;;  %v9980_v3 = vrot.slane %v9977_v1, %v1196_v0  ;;  %1274 = vst.msk [vmem:[#allocation2 + $0x60] sm:$0xff] %vm1260_vm1, %v12329_v4  ;;  %1276 = vst.msk [vmem:[#allocation2 + $0x70] sm:$0xff] %vm1260_vm1, %v12329_v4 }
  0x77   : > { %1125 = vmatprep.subr.bf16.mxu0 %v9146_v20  ;;  %1275 = vst.msk [vmem:[#allocation2 + $0x68] sm:$0x3] %vm1262_vm2, %v12329_v4  ;;  %1277 = vst.msk [vmem:[#allocation2 + $0x78] sm:$0x3] %vm1262_vm2, %v12329_v4  ;;  %v10100_v5 = vrot.slane %v9968_v52, %v1192_v24  ;;  %v10103_v63 = vrot.slane %v9977_v1, %v1192_v24  ;;  %v1291_v40 = vld [vmem:[#allocation2] sm:$0xff]  ;;  %v9186_v24 = vld [vmem:[%s12308_s7 + $0x28] sm:$0xff]  }
  0x78   : > { %1278 = vst.msk [vmem:[#allocation2 + $0x80] sm:$0xff] %vm1260_vm1, %v12329_v4  ;;  %1280 = vst.msk [vmem:[#allocation2 + $0x90] sm:$0xff] %vm1260_vm1, %v12329_v4  ;;  %v1311_v48 = vld [vmem:[#allocation2 + $0x1] sm:$0xff] }
  0x79   : > { %1279 = vst.msk [vmem:[#allocation2 + $0x88] sm:$0x3] %vm1262_vm2, %v12329_v4  ;;  %1281 = vst.msk [vmem:[#allocation2 + $0x98] sm:$0x3] %vm1262_vm2, %v12329_v4 }
  0x7a   : > { %1126 = vmatpush1.bf16.msra.mxu0 %v9144_v8  ;;  %2483 = vst.msk [vmem:[#allocation3] sm:$0xff] %vm1260_vm1, %v12329_v4  ;;  %2485 = vst.msk [vmem:[#allocation3 + $0x10] sm:$0xff] %vm1260_vm1, %v12329_v4 }
  0x7b   : > { %1127 = vmatprep.subr.bf16.mxu0 %v9149_v12  ;;  %2484 = vst.msk [vmem:[#allocation3 + $0x8] sm:$0x3] %vm1262_vm2, %v12329_v4  ;;  %2486 = vst.msk [vmem:[#allocation3 + $0x18] sm:$0x3] %vm1262_vm2, %v12329_v4 }
  0x7c   : > { %2487 = vst.msk [vmem:[#allocation3 + $0x20] sm:$0xff] %vm1260_vm1, %v12329_v4  ;;  %2489 = vst.msk [vmem:[#allocation3 + $0x30] sm:$0xff] %vm1260_vm1, %v12329_v4 }
  0x7d   : > { %1105 = vmatmul.mubr.bf16.gmra.mrb[12].mxu0 %v751_v36  ;;  %2488 = vst.msk [vmem:[#allocation3 + $0x28] sm:$0x3] %vm1262_vm2, %v12329_v4  ;;  %2490 = vst.msk [vmem:[#allocation3 + $0x38] sm:$0x3] %vm1262_vm2, %v12329_v4 }
  0x7e   : > { %1128 = vmatpush1.bf16.msra.mxu0 %v9147_v35  ;;  %1147 = vmatprep.mubr.bf16.mxu0 %v12368_v22  ;;  %2491 = vst.msk [vmem:[#allocation3 + $0x40] sm:$0xff] %vm1260_vm1, %v12329_v4  ;;  %2493 = vst.msk [vmem:[#allocation3 + $0x50] sm:$0xff] %vm1260_vm1, %v12329_v4 }
  0x7f   : > { %1129 = vmatprep.subr.bf16.mxu0 %v9152_v16  ;;  %2492 = vst.msk [vmem:[#allocation3 + $0x48] sm:$0x3] %vm1262_vm2, %v12329_v4  ;;  %2494 = vst.msk [vmem:[#allocation3 + $0x58] sm:$0x3] %vm1262_vm2, %v12329_v4 }
  0x80   : > { %2495 = vst.msk [vmem:[#allocation3 + $0x60] sm:$0xff] %vm1260_vm1, %v12329_v4  ;;  %2497 = vst.msk [vmem:[#allocation3 + $0x70] sm:$0xff] %vm1260_vm1, %v12329_v4 }
  0x81   : > { %2496 = vst.msk [vmem:[#allocation3 + $0x68] sm:$0x3] %vm1262_vm2, %v12329_v4  ;;  %2498 = vst.msk [vmem:[#allocation3 + $0x78] sm:$0x3] %vm1262_vm2, %v12329_v4 }
  0x82   : > { %1130 = vmatpush1.bf16.msra.mxu0 %v9150_v15  ;;  %2499 = vst.msk [vmem:[#allocation3 + $0x80] sm:$0xff] %vm1260_vm1, %v12329_v4  ;;  %2501 = vst.msk [vmem:[#allocation3 + $0x90] sm:$0xff] %vm1260_vm1, %v12329_v4 }
  0x83   : > { %2500 = vst.msk [vmem:[#allocation3 + $0x88] sm:$0x3] %vm1262_vm2, %v12329_v4  ;;  %2502 = vst.msk [vmem:[#allocation3 + $0x98] sm:$0x3] %vm1262_vm2, %v12329_v4  ;;  %8330 = vmatprep.subr.bf16.mxu0 %v9153_v18 }
  0x85   : > { %1148 = vmatmul.mubr.bf16.vlgmr.msra.gmra.mrb[0].mxu0 %v744_v43 }
  0x86   : > { %1157 = vmatprep.mubr.bf16.mxu0 %v12368_v22  ;;  %8331 = vmatpush3.bf16.msra.mxu0 %v9153_v18 }
  0x87   : > { %8332 = vmatprep.subr.bf16.mxu0 %v9155_v57 }
  0x8a   : > { %8333 = vmatpush3.bf16.msra.mxu0 %v9155_v57 }
  0x8b   : > { %8334 = vmatprep.subr.bf16.mxu0 %v9157_v60 }
  0x8d   : > { %1158 = vmatmul.mubr.bf16.gmra.mrb[4].mxu0 %v747_v46 }
  0x8e   : > { %1167 = vmatprep.mubr.bf16.mxu0 %v12368_v22  ;;  %8335 = vmatpush3.bf16.msra.mxu0 %v9157_v60 }
  0x8f   : > { %8336 = vmatprep.subr.bf16.mxu0 %v9159_v62 }
  0x92   : > { %8337 = vmatpush3.bf16.msra.mxu0 %v9159_v62  ;;  %v9162_v62 = vld [vmem:[%s12305_s4 + $0x48] sm:$0xff]  }
  0x93   : > { %8474 = vmatprep.subr.bf16.mxu0 %v10096_v34 }
  0x95   : > { %1168 = vmatmul.mubr.bf16.gmra.mrb[8].mxu0 %v750_v56 }
  0x96   : > { %1177 = vmatprep.mubr.bf16.mxu0 %v12368_v22 }
  0x9d   : > { %1178 = vmatmul.mubr.bf16.gmra.mrb[12].mxu0 %v753_v28 }
 0x158   : > { %v1149_v7 = vpop.f32.mrb[0].mxu0 }
 0x159   : > { %v1200_v6 = vmul.f32 %v10100_v5, %v1149_v7  ;;  %v1151_v20 = vpop.f32.mrb[1].mxu0 }
 0x15a   : > { %v1201_v11 = vmul.f32 %v9972_v2, %v1151_v20  ;;  %v1153_v8 = vpop.f32.mrb[2].mxu0 }
 0x15b   : > { %v1202_v12 = vmul.f32 %v10100_v5, %v1153_v8  ;;  %v1155_v14 = vpop.f32.mrb[3].mxu0  ;;  %v1228_v27 = vadd.f32 %v10103_v63, %v1200_v6 }
 0x15c   : > { %v10110_v29 = vadd.f32 %v9980_v3, %v1201_v11  ;;  %v1203_v30 = vmul.f32 %v9972_v2, %v1155_v14 }
 0x15d   : > { %v1230_v31 = vadd.f32 %v10103_v63, %v1202_v12  ;;  %v1244_v32 = vmax.f32 %v1228_v27, 0.0  ;;  %v9163_v27 = vld [vmem:[%s12305_s4 + $0x50] sm:$0xff]  }
 0x15e   : > { %v10115_v35 = vadd.f32 %v9980_v3, %v1203_v30 }
 0x15f   : > { %v1246_v36 = vmax.f32 %v1230_v31, 0.0  ;;  %2511 = vrot.lane.b32.xlu0 %v1244_v32, %s9370_s20  ;;  %1283 = vst.msk [vmem:[#allocation2 + $0x11] sm:$0xff] %vm1260_vm1, %v1244_v32 }
 0x160   : > { %v1159_v16 = vpop.f32.mrb[4].mxu0 }
 0x161   : > { %1284 = vst.msk [vmem:[#allocation2 + $0x21] sm:$0xff] %vm1260_vm1, %v1246_v36  ;;  %v1204_v15 = vmul.f32 %v10100_v5, %v1159_v16  ;;  %v1161_v22 = vpop.f32.mrb[5].mxu0 }
 0x162   : > { %v1205_v23 = vmul.f32 %v9972_v2, %v1161_v22  ;;  %v1163_v37 = vpop.f32.mrb[6].mxu0 }
 0x163   : > { %v1206_v38 = vmul.f32 %v10100_v5, %v1163_v37  ;;  %2513 = vrot.lane.b32.xlu0 %v1246_v36, %s9370_s20  ;;  %v1165_v39 = vpop.f32.mrb[7].mxu0  ;;  %v1232_v41 = vadd.f32 %v10103_v63, %v1204_v15  ;;  %v9190_v37 = vld [vmem:[%s12308_s7 + $0x38] sm:$0xff]  }
 0x164   : > { %v10126_v42 = vadd.f32 %v9980_v3, %v1205_v23  ;;  %v1207_v43 = vmul.f32 %v9972_v2, %v1165_v39  ;;  %v9188_v23 = vld [vmem:[%s12308_s7 + $0x30] sm:$0xff]   ;;  %v1534_v39 = vld [vmem:[#allocation2 + $0x2] sm:$0xff] }
 0x165   : > { %v1234_v33 = vadd.f32 %v10103_v63, %v1206_v38  ;;  %v1248_v55 = vmax.f32 %v1232_v41, 0.0  ;;  %v9165_v38 = vld [vmem:[%s12305_s4 + $0x60] sm:$0xff]  }
 0x166   : > { %v10131_v54 = vadd.f32 %v9980_v3, %v1207_v43  ;;  %v10133_v44 = vld [vmem:[#allocation2 + $0x11] sm:$0xff] }
 0x167   : > { %v10135_v46 = vld [vmem:[#allocation2 + $0x10] sm:$0xff]  ;;  %v1250_v45 = vmax.f32 %v1234_v33, 0.0  ;;  %2515 = vrot.lane.b32.xlu1 %v1248_v55, %s9370_s20  ;;  %1285 = vst.msk [vmem:[#allocation2 + $0x31] sm:$0xff] %vm1260_vm1, %v1248_v55  ;;  %v1319_v49 = vpack.c.bf16 %v10133_v44, %v1311_v48  ;;  %v10247_v48 = vld [vmem:[%s12308_s7] sm:$0xff]  }
 0x168   : > { %v1299_v21 = vpack.c.bf16 %v10135_v46, %v1291_v40  ;;  %v1169_v25 = vpop.f32.mrb[8].mxu0  ;;  %v10154_v0 = vld [vmem:[#allocation2 + $0x21] sm:$0xff]  ;;  %v10242_v43 = vld [vmem:[#allocation2 + $0x12] sm:$0xff] }
 0x169   : > { %1286 = vst.msk [vmem:[#allocation2 + $0x41] sm:$0xff] %vm1260_vm1, %v1250_v45  ;;  %v1208_v47 = vmul.f32 %v10100_v5, %v1169_v25  ;;  %v1171_v59 = vpop.f32.mrb[9].mxu0  ;;  %8338 = vmatprep.mubr.msk.bf16.mxu0 %vm1260_vm1, %v1319_v49  ;;  %v10161_v53 = vld [vmem:[#allocation2 + $0x20] sm:$0xff] }
 0x16a   : > { %8354 = vmatprep.mubr.msk.bf16.mxu1 %vm1260_vm1, %v1299_v21  ;;  %v1209_v56 = vmul.f32 %v9972_v2, %v1171_v59  ;;  %v1173_v9 = vpop.f32.mrb[10].mxu0  ;;  %v1542_v21 = vpack.c.bf16 %v10242_v43, %v1534_v39  ;;  %v1536_v59 = vld [vmem:[#allocation2 + $0x22] sm:$0xff]  ;;  %v2062_v39 = vld [vmem:[#allocation2 + $0x90] sm:$0xff] }
 0x16b   : > { %v1236_v51 = vadd.f32 %v10103_v63, %v1208_v47  ;;  %v1210_v19 = vmul.f32 %v10100_v5, %v1173_v9  ;;  %2517 = vrot.lane.b32.xlu1 %v1250_v45, %s9370_s20  ;;  %v1175_v26 = vpop.f32.mrb[11].mxu0 }
 0x16c   : > { %v10150_v28 = vadd.f32 %v9980_v3, %v1209_v56  ;;  %v1211_v10 = vmul.f32 %v9972_v2, %v1175_v26  ;;  %v9167_v26 = vld [vmem:[%s12305_s4 + $0x70] sm:$0xff]  }
 0x16d   : > { %v1252_v50 = vmax.f32 %v1236_v51, 0.0  ;;  %v1238_v52 = vadd.f32 %v10103_v63, %v1210_v19  ;;  %v9166_v51 = vld [vmem:[%s12305_s4 + $0x68] sm:$0xff]  }
 0x16e   : > { %v10157_v1 = vadd.f32 %v9980_v3, %v1211_v10  ;;  %v10159_v18 = vld [vmem:[#allocation2 + $0x31] sm:$0xff] }
 0x16f   : > { %v10163_v57 = vld [vmem:[#allocation2 + $0x30] sm:$0xff]  ;;  %1287 = vst.msk [vmem:[#allocation2 + $0x51] sm:$0xff] %vm1260_vm1, %v1252_v50  ;;  %v1254_v58 = vmax.f32 %v1238_v52, 0.0  ;;  %2519 = vrot.lane.b32.xlu0 %v1252_v50, %s9370_s20  ;;  %v10169_v60 = vpack.c.bf16 %v10159_v18, %v10154_v0 }
 0x170   : > { %12384 = vst [vmem:[#allocation14_spill] sm:$0xff] %v10157_v1  ;;  %v10173_v61 = vpack.c.bf16 %v10163_v57, %v10161_v53  ;;  %v1179_v17 = vpop.f32.mrb[12].mxu0  ;;  %v10201_v36 = vld [vmem:[#allocation2 + $0x41] sm:$0xff]  ;;  %v10264_v25 = vld [vmem:[#allocation2 + $0x32] sm:$0xff] }
 0x171   : > { %1288 = vst.msk [vmem:[#allocation2 + $0x61] sm:$0xff] %vm1260_vm1, %v1254_v58  ;;  %v1212_v7 = vmul.f32 %v10100_v5, %v1179_v17  ;;  %8339 = vmatmul.mubr.msk.bf16.vlgmr.msra.gmra.mrb[16].mxu0 %vm1260_vm1, %v10169_v60  ;;  %v1181_v6 = vpop.f32.mrb[13].mxu0  ;;  %2521 = vrot.lane.b32.xlu1 %v1254_v58, %s9370_s20  ;;  %v10208_v15 = vld [vmem:[#allocation2 + $0x40] sm:$0xff]  ;;  %v10269_v56 = vpack.c.bf16 %v10264_v25, %v1536_v59  ;;  %v9168_v58 = vld [vmem:[%s12305_s4 + $0x78] sm:$0xff]  }
 0x172   : > { %8355 = vmatmul.mubr.msk.bf16.vlgmr.msra.gmra.mrb[0].mxu1 %vm1260_vm1, %v10173_v61  ;;  %v1213_v20 = vmul.f32 %v9972_v2, %v1181_v6  ;;  %v1183_v11 = vpop.f32.mrb[14].mxu0  ;;  %8475 = vmatpush3.bf16.msra.mxu0 %v10096_v34  ;;  %v10271_v9 = vld [vmem:[#allocation2 + $0x42] sm:$0xff] }
 0x173   : > { %8363 = vmatpush3.bf16.msra.mxu1 %v10089_v13  ;;  %v1240_v8 = vadd.f32 %v10103_v63, %v1212_v7  ;;  %v1214_v12 = vmul.f32 %v10100_v5, %v1183_v11  ;;  %v1185_v14 = vpop.f32.mrb[15].mxu0  ;;  %8476 = vmatprep.subr.bf16.mxu0 %v9186_v24  ;;  %v9169_v17 = vld [vmem:[%s12305_s4 + $0x80] sm:$0xff]   ;;  %v9171_v7 = vld [vmem:[%s12305_s4 + $0x90] sm:$0xff]   ;;  %v1802_v11 = vpack.c.bf16 %v10154_v0, %v10133_v44 }
 0x174   : > { %8364 = vmatprep.subr.bf16.mxu1 %v9162_v62  ;;  %v10197_v30 = vadd.f32 %v9980_v3, %v1213_v20  ;;  %v1215_v31 = vmul.f32 %v9972_v2, %v1185_v14  ;;  %v9172_v20 = vld [vmem:[%s12305_s4 + $0x98] sm:$0xff]   ;;  %v9174_v14 = vld [vmem:[%s12305_s4 + $0xa8] sm:$0xff]   ;;  %v9175_v0 = vld [vmem:[%s12305_s4 + $0xb0] sm:$0xff]  }
 0x175   : > { %v1256_v32 = vmax.f32 %v1240_v8, 0.0  ;;  %v1242_v13 = vadd.f32 %v10103_v63, %v1214_v12  ;;  %v9164_v63 = vld [vmem:[%s12305_s4 + $0x58] sm:$0xff]   ;;  %v9173_v8 = vld [vmem:[%s12305_s4 + $0xa0] sm:$0xff]   ;;  %v1803_v12 = vpack.c.bf16 %v10201_v36, %v10159_v18 }
 0x176   : > { %v10204_v5 = vadd.f32 %v9980_v3, %v1215_v31  ;;  %v10206_v16 = vld [vmem:[#allocation2 + $0x51] sm:$0xff]  ;;  %8477 = vmatpush3.bf16.msra.mxu0 %v9186_v24  ;;  %v1673_v24 = vpack.c.bf16 %v10208_v15, %v10163_v57 }
 0x177   : > { %v10210_v22 = vld [vmem:[#allocation2 + $0x50] sm:$0xff]  ;;  %8365 = vmatpush3.bf16.msra.mxu1 %v9162_v62  ;;  %1289 = vst.msk [vmem:[#allocation2 + $0x71] sm:$0xff] %vm1260_vm1, %v1256_v32  ;;  %v1258_v34 = vmax.f32 %v1242_v13, 0.0  ;;  %2523 = vrot.lane.b32.xlu0 %v1256_v32, %s9370_s20  ;;  %v10216_v2 = vpack.c.bf16 %v10206_v16, %v10201_v36  ;;  %v1672_v62 = vpack.c.bf16 %v10161_v53, %v10135_v46  ;;  %v9170_v46 = vld [vmem:[%s12305_s4 + $0x88] sm:$0xff]   ;;  %v9176_v31 = vld [vmem:[%s12305_s4 + $0xb8] sm:$0xff]  }
 0x178   : > { %v10220_v3 = vpack.c.bf16 %v10210_v22, %v10208_v15  ;;  %8366 = vmatprep.subr.bf16.mxu1 %v9163_v27  ;;  %8478 = vmatprep.subr.bf16.mxu0 %v9188_v23  ;;  %v10240_v41 = vld [vmem:[#allocation2 + $0x61] sm:$0xff]  ;;  %v10266_v47 = vld [vmem:[#allocation2 + $0x52] sm:$0xff]  ;;  %v1932_v32 = vpack.c.bf16 %v1536_v59, %v10242_v43  ;;  %v1933_v36 = vpack.c.bf16 %v10271_v9, %v10264_v25 }
 0x179   : > { %1290 = vst.msk [vmem:[#allocation2 + $0x81] sm:$0xff] %vm1260_vm1, %v1258_v34  ;;  %8342 = vmatprep.mubr.msk.bf16.mxu0 %vm1260_vm1, %v10216_v2  ;;  %2525 = vrot.lane.b32.xlu1 %v1258_v34, %s9370_s20  ;;  %v1297_v33 = vld [vmem:[#allocation2 + $0x60] sm:$0xff]  ;;  %v10278_v19 = vpack.c.bf16 %v10266_v47, %v10271_v9  ;;  %v1804_v44 = vpack.c.bf16 %v10240_v41, %v10206_v16  ;;  %v9178_v16 = vld [vmem:[%s12305_s4 + $0xc8] sm:$0xff]   ;;  %v9185_v43 = vld [vmem:[%s12305_s4 + $0xf8] sm:$0xff]  }
 0x17a   : > { %8358 = vmatprep.mubr.msk.bf16.mxu1 %vm1260_vm1, %v10220_v3  ;;  %8479 = vmatpush3.bf16.msra.mxu0 %v9188_v23  ;;  %v1540_v50 = vld [vmem:[#allocation2 + $0x62] sm:$0xff]  ;;  %v1674_v53 = vpack.c.bf16 %v1297_v33, %v10210_v22  ;;  %v9179_v22 = vld [vmem:[%s12305_s4 + $0xd0] sm:$0xff]   ;;  %v9180_v23 = vld [vmem:[%s12305_s4 + $0xd8] sm:$0xff]  }
 0x17b   : > { %8367 = vmatpush3.bf16.msra.mxu1 %v9163_v27  ;;  %8480 = vmatprep.subr.bf16.mxu0 %v9190_v37  ;;  %v9177_v13 = vld [vmem:[%s12305_s4 + $0xc0] sm:$0xff]   ;;  %v1934_v15 = vpack.c.bf16 %v1540_v50, %v10266_v47  ;;  %v9191_v47 = vld [vmem:[%s12305_s4 + $0x110] sm:$0xff]  }
 0x17c   : > { %8368 = vmatprep.subr.bf16.mxu1 %v9164_v63  ;;  %v2192_v59 = vld [vmem:[#allocation2 + $0x91] sm:$0xff] }
 0x17e   : > { %v10249_v40 = vld [vmem:[#allocation2 + $0x71] sm:$0xff]  ;;  %8481 = vmatpush3.bf16.msra.mxu0 %v9190_v37  ;;  %v9181_v37 = vld [vmem:[%s12305_s4 + $0xe0] sm:$0xff]  }
 0x17f   : > { %v1298_v55 = vld [vmem:[#allocation2 + $0x70] sm:$0xff]  ;;  %8369 = vmatpush3.bf16.msra.mxu1 %v9164_v63  ;;  %v10253_v45 = vpack.c.bf16 %v10249_v40, %v10240_v41  ;;  %8490 = vmatprep.subr.bf16.mxu0 %v10247_v48 }
 0x180   : > { %v10255_v49 = vpack.c.bf16 %v1298_v55, %v1297_v33  ;;  %8378 = vmatprep.subr.bf16.mxu1 %v9165_v38  ;;  %v10287_v10 = vld [vmem:[#allocation2 + $0x72] sm:$0xff]  ;;  %v10314_v6 = vld [vmem:[#allocation2 + $0x80] sm:$0xff] }
 0x181   : > { %8343 = vmatmul.mubr.msk.bf16.gmra.mrb[20].mxu0 %vm1260_vm1, %v10253_v45  ;;  %v10290_v52 = vpack.c.bf16 %v10287_v10, %v1540_v50  ;;  %v1675_v57 = vpack.c.bf16 %v10314_v6, %v1298_v55  ;;  %v10339_v27 = vld [vmem:[#allocation2 + $0x81] sm:$0xff]  ;;  %v2066_v41 = vpack.c.bf16 %v2062_v39, %v10314_v6  ;;  %v9196_v6 = vld [vmem:[%s12308_s7 + $0x18] sm:$0xff]   ;;  %v6551_v39 = vld [vmem:[%s12317_s16 + $0x30] sm:$0xff] }
 0x182   : > { %8359 = vmatmul.mubr.msk.bf16.gmra.mrb[4].mxu1 %vm1260_vm1, %v10255_v49  ;;  %v1805_v18 = vpack.c.bf16 %v10339_v27, %v10249_v40  ;;  %v10363_v34 = vld [vmem:[#allocation2 + $0x82] sm:$0xff] }
 0x183   : > { %8370 = vmatprep.mubr.msk.bf16.mxu1 %vm1260_vm1, %v1542_v21  ;;  %v1935_v63 = vpack.c.bf16 %v10363_v34, %v10287_v10  ;;  %v2564_v55 = vld [vmem:[#allocation3 + $0x1] sm:$0xff] }
 0x18a   : > { %8371 = vmatmul.mubr.msk.bf16.vlgmr.msra.gmra.mrb[0].mxu1 %vm1260_vm1, %v10269_v56 }
 0x18b   : > { %8374 = vmatprep.mubr.msk.bf16.mxu1 %vm1260_vm1, %v10278_v19  ;;  %8379 = vmatpush3.bf16.msra.mxu1 %v9165_v38  ;;  %v9182_v38 = vld [vmem:[%s12305_s4 + $0xe8] sm:$0xff]  }
 0x18c   : > { %8380 = vmatprep.subr.bf16.mxu1 %v9166_v51 }
 0x18f   : > { %8381 = vmatpush3.bf16.msra.mxu1 %v9166_v51  ;;  %v2196_v51 = vpack.c.bf16 %v2192_v59, %v10339_v27  ;;  %v6546_v27 = vld [vmem:[%s12317_s16 + $0x8] sm:$0xff] }
 0x190   : > { %8382 = vmatprep.subr.bf16.mxu1 %v9167_v26  ;;  %6560 = vperm.xlu1 %9080, %v6546_v27  }
 0x192   : > { %8375 = vmatmul.mubr.msk.bf16.gmra.mrb[4].mxu1 %vm1260_vm1, %v10290_v52 }
 0x193   : > { %8383 = vmatpush3.bf16.msra.mxu1 %v9167_v26  ;;  %8386 = vmatprep.mubr.msk.bf16.mxu1 %vm1260_vm1, %v1672_v62  ;;  %v9192_v26 = vld [vmem:[%s12305_s4 + $0x118] sm:$0xff]   ;;  %v9194_v62 = vld [vmem:[%s12308_s7 + $0x8] sm:$0xff]  }
 0x194   : > { %8384 = vmatprep.subr.bf16.mxu1 %v9168_v58 }
 0x197   : > { %8385 = vmatpush3.bf16.msra.mxu1 %v9168_v58 }
 0x198   : > { %8394 = vmatprep.subr.bf16.mxu1 %v9169_v17 }
 0x19a   : > { %8387 = vmatmul.mubr.msk.bf16.vlgmr.msra.gmra.mrb[0].mxu1 %vm1260_vm1, %v1673_v24 }
 0x19b   : > { %8390 = vmatprep.mubr.msk.bf16.mxu1 %vm1260_vm1, %v1674_v53  ;;  %8395 = vmatpush3.bf16.msra.mxu1 %v9169_v17 }
 0x19c   : > { %8396 = vmatprep.subr.bf16.mxu1 %v9170_v46 }
 0x19f   : > { %8397 = vmatpush3.bf16.msra.mxu1 %v9170_v46 }
 0x1a0   : > { %8398 = vmatprep.subr.bf16.mxu1 %v9171_v7 }
 0x1a2   : > { %8391 = vmatmul.mubr.msk.bf16.gmra.mrb[4].mxu1 %vm1260_vm1, %v1675_v57 }
 0x1a3   : > { %8399 = vmatpush3.bf16.msra.mxu1 %v9171_v7  ;;  %8402 = vmatprep.mubr.msk.bf16.mxu1 %vm1260_vm1, %v1802_v11  ;;  %v2544_v11 = vld [vmem:[#allocation3] sm:$0xff] }
 0x1a4   : > { %8400 = vmatprep.subr.bf16.mxu1 %v9172_v20 }
 0x1a7   : > { %8401 = vmatpush3.bf16.msra.mxu1 %v9172_v20 }
 0x1a8   : > { %8410 = vmatprep.subr.bf16.mxu1 %v9173_v8 }
 0x1aa   : > { %8403 = vmatmul.mubr.msk.bf16.vlgmr.msra.gmra.mrb[0].mxu1 %vm1260_vm1, %v1803_v12 }
 0x1ab   : > { %8406 = vmatprep.mubr.msk.bf16.mxu1 %vm1260_vm1, %v1804_v44  ;;  %8411 = vmatpush3.bf16.msra.mxu1 %v9173_v8 }
 0x1ac   : > { %8412 = vmatprep.subr.bf16.mxu1 %v9174_v14 }
 0x1af   : > { %8413 = vmatpush3.bf16.msra.mxu1 %v9174_v14 }
 0x1b0   : > { %8414 = vmatprep.subr.bf16.mxu1 %v9175_v0 }
 0x1b2   : > { %8407 = vmatmul.mubr.msk.bf16.gmra.mrb[4].mxu1 %vm1260_vm1, %v1805_v18  ;;  %v6545_v18 = vld [vmem:[%s12317_s16] sm:$0xff] }
 0x1b3   : > { %8415 = vmatpush3.bf16.msra.mxu1 %v9175_v0  ;;  %8418 = vmatprep.mubr.msk.bf16.mxu1 %vm1260_vm1, %v1932_v32  ;;  %v6547_v32 = vld [vmem:[%s12317_s16 + $0x10] sm:$0xff] }
 0x1b4   : > { %8416 = vmatprep.subr.bf16.mxu1 %v9176_v31  ;;  %6555 = vperm.xlu0 %9079, %v6545_v18   ;;  %v9208_v18 = vld [vmem:[%s12308_s7 + $0x98] sm:$0xff]  }
 0x1b5   : > { %6565 = vperm.xlu1 %9080, %v6547_v32   ;;  %v9210_v32 = vld [vmem:[%s12308_s7 + $0xa8] sm:$0xff]  }
 0x1b7   : > { %8417 = vmatpush3.bf16.msra.mxu1 %v9176_v31 }
 0x1b8   : > { %8426 = vmatprep.subr.bf16.mxu1 %v9177_v13 }
 0x1ba   : > { %8419 = vmatmul.mubr.msk.bf16.vlgmr.msra.gmra.mrb[0].mxu1 %vm1260_vm1, %v1933_v36 }
 0x1bb   : > { %8422 = vmatprep.mubr.msk.bf16.mxu1 %vm1260_vm1, %v1934_v15  ;;  %8427 = vmatpush3.bf16.msra.mxu1 %v9177_v13  ;;  %v6548_v13 = vld [vmem:[%s12317_s16 + $0x18] sm:$0xff] }
 0x1bc   : > { %8428 = vmatprep.subr.bf16.mxu1 %v9178_v16  ;;  %6570 = vperm.xlu0 %9079, %v6548_v13  }
 0x1bf   : > { %8429 = vmatpush3.bf16.msra.mxu1 %v9178_v16 }
 0x1c0   : > { %8430 = vmatprep.subr.bf16.mxu1 %v9179_v22 }
 0x1c2   : > { %8423 = vmatmul.mubr.msk.bf16.gmra.mrb[4].mxu1 %vm1260_vm1, %v1935_v63 }
 0x1c3   : > { %8431 = vmatpush3.bf16.msra.mxu1 %v9179_v22  ;;  %8434 = vmatprep.mubr.msk.bf16.mxu1 %vm1260_vm1, %v10173_v61  ;;  %v9183_v61 = vld [vmem:[%s12305_s4 + $0xf0] sm:$0xff]  }
 0x1c4   : > { %8432 = vmatprep.subr.bf16.mxu1 %v9180_v23 }
 0x1c7   : > { %8433 = vmatpush3.bf16.msra.mxu1 %v9180_v23  ;;  %v6549_v23 = vld [vmem:[%s12317_s16 + $0x20] sm:$0xff] }
 0x1c8   : > { %8442 = vmatprep.subr.bf16.mxu1 %v9181_v37  ;;  %6575 = vperm.xlu1 %9080, %v6549_v23  }
 0x1ca   : > { %8435 = vmatmul.mubr.msk.bf16.vlgmr.msra.gmra.mrb[0].mxu1 %vm1260_vm1, %v10220_v3  ;;  %v9187_v3 = vld [vmem:[%s12305_s4 + $0x100] sm:$0xff]  }
 0x1cb   : > { %8438 = vmatprep.mubr.msk.bf16.mxu1 %vm1260_vm1, %v10255_v49  ;;  %8443 = vmatpush3.bf16.msra.mxu1 %v9181_v37  ;;  %v9189_v49 = vld [vmem:[%s12305_s4 + $0x108] sm:$0xff]  }
 0x1cc   : > { %8444 = vmatprep.subr.bf16.mxu1 %v9182_v38  ;;  %v6550_v37 = vld [vmem:[%s12317_s16 + $0x28] sm:$0xff]  ;;  %6585 = vperm.xlu1 %9080, %v6551_v39  }
 0x1cd   : > { %6580 = vperm.xlu0 %9079, %v6550_v37  }
 0x1cf   : > { %8445 = vmatpush3.bf16.msra.mxu1 %v9182_v38  ;;  %v9199_v38 = vld [vmem:[%s12308_s7 + $0x50] sm:$0xff]  }
 0x1d0   : > { %8446 = vmatprep.subr.bf16.mxu1 %v9183_v61 }
 0x1d1   : > { %v2512_v40 = vpop.permute.xlu0 %2511 }
 0x1d2   : > { %8439 = vmatmul.mubr.msk.bf16.gmra.mrb[4].mxu1 %vm1260_vm1, %v2066_v41  ;;  %2536 = vst.msk [vmem:[#allocation3 + $0x11] sm:$0xff] %vm1260_vm1, %v2512_v40  ;;  %v2787_v41 = vld [vmem:[#allocation3 + $0x2] sm:$0xff]  ;;  %v6552_v40 = vld [vmem:[%s12317_s16 + $0x38] sm:$0xff] }
 0x1d3   : > { %8447 = vmatpush3.bf16.msra.mxu1 %v9183_v61  ;;  %8450 = vmatprep.mubr.msk.bf16.mxu1 %vm1260_vm1, %v10169_v60 }
 0x1d4   : > { %8448 = vmatprep.subr.bf16.mxu1 %v9185_v43  ;;  %6590 = vperm.xlu0 %9079, %v6552_v40  }
 0x1d5   : > { %v2514_v33 = vpop.permute.xlu0 %2513 }
 0x1d6   : > { %2537 = vst.msk [vmem:[#allocation3 + $0x21] sm:$0xff] %vm1260_vm1, %v2514_v33 }
 0x1d7   : > { %8449 = vmatpush3.bf16.msra.mxu1 %v9185_v43 }
 0x1d8   : > { %8458 = vmatprep.subr.bf16.mxu1 %v9187_v3 }
 0x1d9   : > { %v2516_v21 = vpop.permute.xlu1 %2515  ;;  %v10403_v60 = vld [vmem:[#allocation3 + $0x11] sm:$0xff] }
 0x1da   : > { %8451 = vmatmul.mubr.msk.bf16.vlgmr.msra.gmra.mrb[0].mxu1 %vm1260_vm1, %v10216_v2  ;;  %2538 = vst.msk [vmem:[#allocation3 + $0x31] sm:$0xff] %vm1260_vm1, %v2516_v21  ;;  %v2572_v25 = vpack.c.bf16 %v10403_v60, %v2564_v55  ;;  %v10467_v8 = vld [vmem:[#allocation3 + $0x10] sm:$0xff]  ;;  %v9200_v55 = vld [vmem:[%s12308_s7 + $0x58] sm:$0xff]   ;;  %v9201_v21 = vld [vmem:[%s12308_s7 + $0x60] sm:$0xff]  }
 0x1db   : > { %8454 = vmatprep.mubr.msk.bf16.mxu1 %vm1260_vm1, %v10253_v45  ;;  %8459 = vmatpush3.bf16.msra.mxu1 %v9187_v3  ;;  %v2552_v0 = vpack.c.bf16 %v10467_v8, %v2544_v11  ;;  %v10526_v43 = vld [vmem:[#allocation3 + $0x12] sm:$0xff] }
 0x1dc   : > { %8460 = vmatprep.subr.bf16.mxu1 %v9189_v49  ;;  %8482 = vmatprep.mubr.msk.bf16.mxu0 %vm1260_vm1, %v2572_v25 }
 0x1dd   : > { %v2518_v9 = vpop.permute.xlu1 %2517  ;;  %v10413_v2 = vld [vmem:[#allocation3 + $0x21] sm:$0xff] }
 0x1de   : > { %2539 = vst.msk [vmem:[#allocation3 + $0x41] sm:$0xff] %vm1260_vm1, %v2518_v9  ;;  %v3055_v45 = vpack.c.bf16 %v10413_v2, %v10403_v60  ;;  %v2546_v16 = vld [vmem:[#allocation3 + $0x20] sm:$0xff]  ;;  %v9211_v60 = vld [vmem:[%s12308_s7 + $0xb0] sm:$0xff]  }
 0x1df   : > { %8461 = vmatpush3.bf16.msra.mxu1 %v9189_v49  ;;  %v2795_v49 = vpack.c.bf16 %v10526_v43, %v2787_v41  ;;  %v2789_v59 = vld [vmem:[#allocation3 + $0x22] sm:$0xff] }
 0x1e0   : > { %8462 = vmatprep.subr.bf16.mxu1 %v9191_v47  ;;  %v9218_v41 = vld [vmem:[%s12308_s7 + $0xe8] sm:$0xff]  }
 0x1e1   : > { %v2520_v10 = vpop.permute.xlu0 %2519  ;;  %v10423_v50 = vld [vmem:[#allocation3 + $0x31] sm:$0xff] }
 0x1e2   : > { %8455 = vmatmul.mubr.msk.bf16.gmra.mrb[4].mxu1 %vm1260_vm1, %v2196_v51  ;;  %2540 = vst.msk [vmem:[#allocation3 + $0x51] sm:$0xff] %vm1260_vm1, %v2520_v10  ;;  %v10430_v58 = vpack.c.bf16 %v10423_v50, %v10413_v2  ;;  %v10488_v31 = vld [vmem:[#allocation3 + $0x30] sm:$0xff] }
 0x1e3   : > { %8463 = vmatpush3.bf16.msra.mxu1 %v9191_v47  ;;  %8466 = vmatprep.mubr.msk.bf16.mxu1 %vm1260_vm1, %v10269_v56  ;;  %v2522_v17 = vpop.permute.xlu1 %2521  ;;  %v9195_v56 = vld [vmem:[%s12308_s7 + $0x10] sm:$0xff]   ;;  %v10499_v15 = vpack.c.bf16 %v10488_v31, %v2546_v16 }
 0x1e4   : > { %8464 = vmatprep.subr.bf16.mxu1 %v9192_v26  ;;  %8483 = vmatmul.mubr.msk.bf16.vlgmr.msra.gmra.mrb[24].mxu0 %vm1260_vm1, %v10430_v58  ;;  %2541 = vst.msk [vmem:[#allocation3 + $0x61] sm:$0xff] %vm1260_vm1, %v2522_v17  ;;  %v10543_v25 = vld [vmem:[#allocation3 + $0x32] sm:$0xff] }
 0x1e5   : > { %v10438_v24 = vld [vmem:[#allocation3 + $0x41] sm:$0xff]  ;;  %8491 = vmatpush3.bf16.msra.mxu0 %v10247_v48  ;;  %v10548_v9 = vpack.c.bf16 %v10543_v25, %v2789_v59 }
 0x1e6   : > { %8492 = vmatprep.subr.bf16.mxu0 %v9194_v62  ;;  %v3056_v46 = vpack.c.bf16 %v10438_v24, %v10423_v50  ;;  %v10501_v22 = vld [vmem:[#allocation3 + $0x40] sm:$0xff]  ;;  %v9212_v50 = vld [vmem:[%s12308_s7 + $0xb8] sm:$0xff]  }
 0x1e7   : > { %8465 = vmatpush3.bf16.msra.mxu1 %v9192_v26  ;;  %v10550_v51 = vld [vmem:[#allocation3 + $0x42] sm:$0xff] }
 0x1e8   : > { %v9202_v26 = vld [vmem:[%s12308_s7 + $0x68] sm:$0xff]  }
 0x1e9   : > { %v2524_v53 = vpop.permute.xlu0 %2523  ;;  %v10448_v7 = vld [vmem:[#allocation3 + $0x51] sm:$0xff]  ;;  %8493 = vmatpush3.bf16.msra.mxu0 %v9194_v62 }
 0x1ea   : > { %8467 = vmatmul.mubr.msk.bf16.vlgmr.msra.gmra.mrb[0].mxu1 %vm1260_vm1, %v10278_v19  ;;  %2542 = vst.msk [vmem:[#allocation3 + $0x71] sm:$0xff] %vm1260_vm1, %v2524_v53  ;;  %v10455_v48 = vpack.c.bf16 %v10448_v7, %v10438_v24  ;;  %8494 = vmatprep.subr.bf16.mxu0 %v9195_v56  ;;  %v2322_v19 = vld [vmem:[#allocation2 + $0x92] sm:$0xff]  ;;  %v3185_v24 = vpack.c.bf16 %v2789_v59, %v10526_v43 }
 0x1eb   : > { %8470 = vmatprep.mubr.msk.bf16.mxu1 %vm1260_vm1, %v10290_v52  ;;  %v2526_v57 = vpop.permute.xlu1 %2525  ;;  %v9197_v52 = vld [vmem:[%s12308_s7 + $0x40] sm:$0xff]   ;;  %v2326_v20 = vpack.c.bf16 %v2322_v19, %v10363_v34  ;;  %v10496_v36 = vld [vmem:[#allocation3 + $0x50] sm:$0xff]  ;;  %v9198_v34 = vld [vmem:[%s12308_s7 + $0x48] sm:$0xff]  }
 0x1ec   : > { %8486 = vmatprep.mubr.msk.bf16.mxu0 %vm1260_vm1, %v10455_v48  ;;  %2543 = vst.msk [vmem:[#allocation3 + $0x81] sm:$0xff] %vm1260_vm1, %v2526_v57  ;;  %v10470_v12 = vld [vmem:[#allocation3 + $0x61] sm:$0xff]  ;;  %v10508_v63 = vpack.c.bf16 %v10496_v36, %v10501_v22  ;;  %v10545_v47 = vld [vmem:[#allocation3 + $0x52] sm:$0xff]  ;;  %v2925_v57 = vpack.c.bf16 %v2546_v16, %v10467_v8 }
 0x1ed   : > { %8495 = vmatpush3.bf16.msra.mxu0 %v9195_v56  ;;  %v2550_v3 = vld [vmem:[#allocation3 + $0x60] sm:$0xff]  ;;  %v10557_v10 = vpack.c.bf16 %v10545_v47, %v10550_v51  ;;  %v9203_v62 = vld [vmem:[%s12308_s7 + $0x70] sm:$0xff]   ;;  %v3057_v13 = vpack.c.bf16 %v10470_v12, %v10448_v7  ;;  %v3186_v7 = vpack.c.bf16 %v10550_v51, %v10543_v25  ;;  %v9222_v25 = vld [vmem:[%s12308_s7 + $0x108] sm:$0xff]  }
 0x1ee   : > { %8496 = vmatprep.subr.bf16.mxu0 %v9196_v6  ;;  %v2793_v56 = vld [vmem:[#allocation3 + $0x62] sm:$0xff]  ;;  %v2927_v11 = vpack.c.bf16 %v2550_v3, %v10496_v36  ;;  %v9207_v8 = vld [vmem:[%s12308_s7 + $0x90] sm:$0xff]  }
 0x1ef   : > { %v9205_v19 = vld [vmem:[%s12308_s7 + $0x80] sm:$0xff]   ;;  %v9215_v36 = vld [vmem:[%s12308_s7 + $0xd0] sm:$0xff]  }
 0x1f0   : > { %v3315_v43 = vld [vmem:[#allocation3 + $0x90] sm:$0xff] }
 0x1f1   : > { %v10472_v14 = vld [vmem:[#allocation3 + $0x71] sm:$0xff]  ;;  %8497 = vmatpush3.bf16.msra.mxu0 %v9196_v6 }
 0x1f2   : > { %8471 = vmatmul.mubr.msk.bf16.gmra.mrb[4].mxu1 %vm1260_vm1, %v2326_v20  ;;  %v10476_v44 = vpack.c.bf16 %v10472_v14, %v10470_v12  ;;  %8506 = vmatprep.subr.bf16.mxu0 %v9197_v52  ;;  %v2551_v61 = vld [vmem:[#allocation3 + $0x70] sm:$0xff]  ;;  %v9204_v6 = vld [vmem:[%s12308_s7 + $0x78] sm:$0xff]   ;;  %v9206_v20 = vld [vmem:[%s12308_s7 + $0x88] sm:$0xff]  }
 0x1f3   : > { %v10531_v33 = vpack.c.bf16 %v2551_v61, %v2550_v3  ;;  %v10566_v17 = vld [vmem:[#allocation3 + $0x72] sm:$0xff]  ;;  %v10619_v2 = vld [vmem:[#allocation3 + $0x81] sm:$0xff] }
 0x1f4   : > { %8487 = vmatmul.mubr.msk.bf16.gmra.mrb[28].mxu0 %vm1260_vm1, %v10476_v44  ;;  %v10569_v53 = vpack.c.bf16 %v10566_v17, %v2793_v56  ;;  %v9214_v12 = vld [vmem:[%s12308_s7 + $0xc8] sm:$0xff]   ;;  %v9220_v3 = vld [vmem:[%s12308_s7 + $0xf8] sm:$0xff]  }
 0x1f5   : > { %8498 = vmatprep.mubr.msk.bf16.mxu0 %vm1260_vm1, %v2552_v0  ;;  %v10592_v0 = vld [vmem:[#allocation3 + $0x80] sm:$0xff] }
 0x1f6   : > { %v2928_v27 = vpack.c.bf16 %v10592_v0, %v2551_v61  ;;  %v3184_v16 = vld [vmem:[#allocation3 + $0x82] sm:$0xff]  ;;  %v3319_v40 = vpack.c.bf16 %v3315_v43, %v10592_v0 }
 0x1f7   : > { %v9217_v61 = vld [vmem:[%s12308_s7 + $0xe0] sm:$0xff]  }
 0x1fc   : > { %8499 = vmatmul.mubr.msk.bf16.vlgmr.msra.gmra.mrb[24].mxu0 %vm1260_vm1, %v10499_v15 }
 0x1fd   : > { %8502 = vmatprep.mubr.msk.bf16.mxu0 %vm1260_vm1, %v10508_v63  ;;  %8507 = vmatpush3.bf16.msra.mxu0 %v9197_v52  ;;  %v2926_v52 = vpack.c.bf16 %v10501_v22, %v10488_v31  ;;  %v9209_v31 = vld [vmem:[%s12308_s7 + $0xa0] sm:$0xff]   ;;  %v3188_v22 = vpack.c.bf16 %v3184_v16, %v10566_v17 }
 0x1fe   : > { %8508 = vmatprep.subr.bf16.mxu0 %v9198_v34  ;;  %v5159_v17 = vld [vmem:[%s9554_s0 + $0x40] sm:$0xfe] }
 0x201   : > { %8509 = vmatpush3.bf16.msra.mxu0 %v9198_v34  ;;  %v9216_v34 = vld [vmem:[%s12308_s7 + $0xd8] sm:$0xff]  }
 0x202   : > { %8510 = vmatprep.subr.bf16.mxu0 %v9199_v38 }
 0x204   : > { %8503 = vmatmul.mubr.msk.bf16.gmra.mrb[28].mxu0 %vm1260_vm1, %v10531_v33 }
 0x205   : > { %8511 = vmatpush3.bf16.msra.mxu0 %v9199_v38  ;;  %8514 = vmatprep.mubr.msk.bf16.mxu0 %vm1260_vm1, %v2795_v49  ;;  %v9221_v49 = vld [vmem:[%s12308_s7 + $0x100] sm:$0xff]  }
 0x206   : > { %8512 = vmatprep.subr.bf16.mxu0 %v9200_v55 }
 0x209   : > { %8513 = vmatpush3.bf16.msra.mxu0 %v9200_v55 }
 0x20a   : > { %8522 = vmatprep.subr.bf16.mxu0 %v9201_v21 }
 0x20c   : > { %8515 = vmatmul.mubr.msk.bf16.vlgmr.msra.gmra.mrb[24].mxu0 %vm1260_vm1, %v10548_v9 }
 0x20d   : > { %8518 = vmatprep.mubr.msk.bf16.mxu0 %vm1260_vm1, %v10557_v10  ;;  %8523 = vmatpush3.bf16.msra.mxu0 %v9201_v21 }
 0x20e   : > { %8524 = vmatprep.subr.bf16.mxu0 %v9202_v26 }
 0x211   : > { %8525 = vmatpush3.bf16.msra.mxu0 %v9202_v26  ;;  %v5157_v26 = vld [vmem:[%s9554_s0 + $0x30] sm:$0xfe] }
 0x212   : > { %8526 = vmatprep.subr.bf16.mxu0 %v9203_v62 }
 0x214   : > { %8519 = vmatmul.mubr.msk.bf16.gmra.mrb[28].mxu0 %vm1260_vm1, %v10569_v53 }
 0x215   : > { %8527 = vmatpush3.bf16.msra.mxu0 %v9203_v62  ;;  %8530 = vmatprep.mubr.msk.bf16.mxu0 %vm1260_vm1, %v2925_v57  ;;  %v5160_v62 = vld [vmem:[%s9554_s0 + $0x48] sm:$0x1]  ;;  %v5256_v57 = vrot.slane %v5157_v26, 1  ;;  %v7856_v26 = vld [vmem:[%s9554_s0 + $0x78] sm:$0x3] }
 0x216   : > { %8528 = vmatprep.subr.bf16.mxu0 %v9204_v6 }
 0x219   : > { %8529 = vmatpush3.bf16.msra.mxu0 %v9204_v6  ;;  %v5162_v6 = vld [vmem:[%s9554_s0 + $0x58] sm:$0x1] }
 0x21a   : > { %8538 = vmatprep.subr.bf16.mxu0 %v9205_v19  ;;  %v5263_v0 = vrot.slane %v5162_v6, 1 }
 0x21c   : > { %8531 = vmatmul.mubr.msk.bf16.vlgmr.msra.gmra.mrb[24].mxu0 %vm1260_vm1, %v2926_v52  ;;  %v5376_v52 = vld [vmem:[%s9554_s0 + $0x48] sm:$0x3] }
 0x21d   : > { %8534 = vmatprep.mubr.msk.bf16.mxu0 %vm1260_vm1, %v2927_v11  ;;  %8539 = vmatpush3.bf16.msra.mxu0 %v9205_v19  ;;  %v5257_v19 = vrot.slane %v5160_v62, 1 }
 0x21e   : > { %8540 = vmatprep.subr.bf16.mxu0 %v9206_v20 }
 0x221   : > { %8541 = vmatpush3.bf16.msra.mxu0 %v9206_v20 }
 0x222   : > { %8542 = vmatprep.subr.bf16.mxu0 %v9207_v8 }
 0x224   : > { %8535 = vmatmul.mubr.msk.bf16.gmra.mrb[28].mxu0 %vm1260_vm1, %v2928_v27  ;;  %v5258_v27 = vsel %vm645_vm0, %v5256_v57, %v5257_v19 }
 0x225   : > { %8543 = vmatpush3.bf16.msra.mxu0 %v9207_v8  ;;  %8546 = vmatprep.mubr.msk.bf16.mxu0 %vm1260_vm1, %v3055_v45  ;;  %v3058_v45 = vpack.c.bf16 %v10619_v2, %v10472_v14  ;;  %v3187_v14 = vpack.c.bf16 %v2793_v56, %v10545_v47  ;;  %v3445_v47 = vld [vmem:[#allocation3 + $0x91] sm:$0xff]  ;;  %v5161_v56 = vld [vmem:[%s9554_s0 + $0x50] sm:$0x1]  ;;  %v5262_v8 = vrot.slane %v5159_v17, 1  ;;  %v10754_v17 = vld [vmem:[%s9554_s0 + $0x68] sm:$0xff] }
 0x226   : > { %8544 = vmatprep.subr.bf16.mxu0 %v9208_v18  ;;  %v3449_v59 = vpack.c.bf16 %v3445_v47, %v10619_v2  ;;  %v5260_v11 = vrot.slane %v5161_v56, 1  ;;  %v5378_v2 = vld [vmem:[%s9554_s0 + $0x58] sm:$0x3]  ;;  %v7809_v47 = vld [vmem:[%s9554_s0 + $0x80] sm:$0x1] }
 0x227   : > { %v5741_v19 = vrot.slane %v7809_v47, 1 }
 0x229   : > { %8545 = vmatpush3.bf16.msra.mxu0 %v9208_v18  ;;  %v5374_v18 = vld [vmem:[%s9554_s0 + $0x38] sm:$0xfc] }
 0x22a   : > { %8554 = vmatprep.subr.bf16.mxu0 %v9209_v31 }
 0x22c   : > { %8547 = vmatmul.mubr.msk.bf16.vlgmr.msra.gmra.mrb[24].mxu0 %vm1260_vm1, %v3056_v46  ;;  %v9213_v46 = vld [vmem:[%s12308_s7 + $0xc0] sm:$0xff]  }
 0x22d   : > { %8550 = vmatprep.mubr.msk.bf16.mxu0 %vm1260_vm1, %v3057_v13  ;;  %8555 = vmatpush3.bf16.msra.mxu0 %v9209_v31  ;;  %v5377_v31 = vld [vmem:[%s9554_s0 + $0x50] sm:$0x3]  ;;  %v5474_v13 = vrot.slane %v5376_v52, 2  ;;  %v7857_v52 = vld [vmem:[%s9554_s0 + $0x80] sm:$0x3] }
 0x22e   : > { %8556 = vmatprep.subr.bf16.mxu0 %v9210_v32 }
 0x231   : > { %8557 = vmatpush3.bf16.msra.mxu0 %v9210_v32 }
 0x232   : > { %8558 = vmatprep.subr.bf16.mxu0 %v9211_v60 }
 0x234   : > { %8551 = vmatmul.mubr.msk.bf16.gmra.mrb[28].mxu0 %vm1260_vm1, %v3058_v45  ;;  %v10728_v45 = vld [vmem:[%s9554_s0 + $0x38] sm:$0xff] }
 0x235   : > { %8559 = vmatpush3.bf16.msra.mxu0 %v9211_v60  ;;  %8562 = vmatprep.mubr.msk.bf16.mxu0 %vm1260_vm1, %v3185_v24  ;;  %v5375_v60 = vld [vmem:[%s9554_s0 + $0x40] sm:$0xfc] }
 0x236   : > { %8560 = vmatprep.subr.bf16.mxu0 %v9212_v50 }
 0x239   : > { %8561 = vmatpush3.bf16.msra.mxu0 %v9212_v50 }
 0x23a   : > { %8570 = vmatprep.subr.bf16.mxu0 %v9213_v46 }
 0x23c   : > { %8563 = vmatmul.mubr.msk.bf16.vlgmr.msra.gmra.mrb[24].mxu0 %vm1260_vm1, %v3186_v7  ;;  %v5477_v7 = vrot.slane %v5377_v31, 2 }
 0x23d   : > { %8566 = vmatprep.mubr.msk.bf16.mxu0 %vm1260_vm1, %v3187_v14  ;;  %8571 = vmatpush3.bf16.msra.mxu0 %v9213_v46  ;;  %v5476_v46 = vrot.slane %v5374_v18, 2  ;;  %v5264_v14 = vsel %vm645_vm0, %v5262_v8, %v5263_v0  ;;  %v5954_v0 = vrot.slane %v7856_v26, 2 }
 0x23e   : > { %8572 = vmatprep.subr.bf16.mxu0 %v9214_v12 }
 0x23f   : > { %v5478_v43 = vsel %vm5463_vm3, %v5476_v46, %v5477_v7  ;;  %v5154_v46 = vld [vmem:[%s9554_s0 + $0x18] sm:$0x1] }
 0x241   : > { %8573 = vmatpush3.bf16.msra.mxu0 %v9214_v12  ;;  %v10733_v12 = vld [vmem:[%s9554_s0 + $0x40] sm:$0xff] }
 0x242   : > { %8574 = vmatprep.subr.bf16.mxu0 %v9215_v36 }
 0x244   : > { %v10647_v23 = vpop.f32.mrb[16].mxu0  ;;  %8567 = vmatmul.mubr.msk.bf16.gmra.mrb[28].mxu0 %vm1260_vm1, %v3188_v22  ;;  %v5480_v22 = vrot.slane %v5378_v2, 2 }
 0x245   : > { %v10650_v37 = vpop.f32.mrb[17].mxu0  ;;  %8575 = vmatpush3.bf16.msra.mxu0 %v9215_v36  ;;  %8578 = vmatprep.mubr.msk.bf16.mxu0 %vm1260_vm1, %v10499_v15  ;;  %v9219_v15 = vld [vmem:[%s12308_s7 + $0xf0] sm:$0xff]  }
 0x246   : > { %v10654_v38 = vpop.f32.mrb[18].mxu0  ;;  %8576 = vmatprep.subr.bf16.mxu0 %v9216_v34 }
 0x247   : > { %v10659_v39 = vpop.f32.mrb[19].mxu0 }
 0x249   : > { %8577 = vmatpush3.bf16.msra.mxu0 %v9216_v34 }
 0x24a   : > { %8586 = vmatprep.subr.bf16.mxu0 %v9217_v61 }
 0x24c   : > { %8579 = vmatmul.mubr.msk.bf16.vlgmr.msra.gmra.mrb[24].mxu0 %vm1260_vm1, %v10508_v63 }
 0x24d   : > { %8582 = vmatprep.mubr.msk.bf16.mxu0 %vm1260_vm1, %v10531_v33  ;;  %8587 = vmatpush3.bf16.msra.mxu0 %v9217_v61  ;;  %v7805_v61 = vld [vmem:[%s9554_s0 + $0x60] sm:$0xfe] }
 0x24e   : > { %8588 = vmatprep.subr.bf16.mxu0 %v9218_v41 }
 0x251   : > { %8589 = vmatpush3.bf16.msra.mxu0 %v9218_v41  ;;  %v7808_v41 = vld [vmem:[%s9554_s0 + $0x78] sm:$0x1] }
 0x252   : > { %8590 = vmatprep.subr.bf16.mxu0 %v9219_v15 }
 0x254   : > { %v10675_v55 = vpop.f32.mrb[20].mxu0  ;;  %8583 = vmatmul.mubr.msk.bf16.gmra.mrb[28].mxu0 %vm1260_vm1, %v3319_v40 }
 0x255   : > { %v10678_v63 = vpop.f32.mrb[21].mxu0  ;;  %8591 = vmatpush3.bf16.msra.mxu0 %v9219_v15  ;;  %8594 = vmatprep.mubr.msk.bf16.mxu0 %vm1260_vm1, %v10430_v58  ;;  %v9223_v58 = vld [vmem:[%s12308_s7 + $0x110] sm:$0xff]   ;;  %v5348_v15 = vadd.f32 %v5264_v14, %v10733_v12  ;;  %v10817_v14 = vld [vmem:[%s9554_s0 + $0xa0] sm:$0xff] }
 0x256   : > { %v10682_v33 = vpop.f32.mrb[22].mxu0  ;;  %8592 = vmatprep.subr.bf16.mxu0 %v9220_v3 }
 0x257   : > { %v10687_v21 = vpop.f32.mrb[23].mxu0 }
 0x259   : > { %8593 = vmatpush3.bf16.msra.mxu0 %v9220_v3  ;;  %v10743_v3 = vld [vmem:[%s9554_s0 + $0x60] sm:$0xff] }
 0x25a   : > { %8602 = vmatprep.subr.bf16.mxu0 %v9221_v49 }
 0x25c   : > { %8595 = vmatmul.mubr.msk.bf16.vlgmr.msra.gmra.mrb[24].mxu0 %vm1260_vm1, %v10455_v48  ;;  %v9224_v48 = vld [vmem:[%s12308_s7 + $0x118] sm:$0xff]  }
 0x25d   : > { %8598 = vmatprep.mubr.msk.bf16.mxu0 %vm1260_vm1, %v10476_v44  ;;  %8603 = vmatpush3.bf16.msra.mxu0 %v9221_v49  ;;  %v3575_v44 = vld [vmem:[#allocation3 + $0x92] sm:$0xff]  ;;  %v7806_v49 = vld [vmem:[%s9554_s0 + $0x68] sm:$0xfe] }
 0x25e   : > { %8604 = vmatprep.subr.bf16.mxu0 %v9222_v25  ;;  %v3579_v51 = vpack.c.bf16 %v3575_v44, %v3184_v16  ;;  %v5479_v16 = vrot.slane %v5375_v60, 2  ;;  %v5738_v44 = vrot.slane %v7808_v41, 1  ;;  %v5740_v57 = vrot.slane %v7806_v49, 1  ;;  %v5152_v49 = vld [vmem:[%s9554_s0 + $0x8] sm:$0xfe] }
 0x261   : > { %8605 = vmatpush3.bf16.msra.mxu0 %v9222_v25  ;;  %v5481_v25 = vsel %vm5463_vm3, %v5479_v16, %v5480_v22  ;;  %v10771_v16 = vld [vmem:[%s9554_s0 + $0x70] sm:$0xff]  ;;  %v5742_v22 = vsel %vm645_vm0, %v5740_v57, %v5741_v19 }
 0x262   : > { %8606 = vmatprep.subr.bf16.mxu0 %v9223_v58  ;;  %v5565_v56 = vadd.f32 %v5481_v25, %v5348_v15  ;;  %v5155_v25 = vld [vmem:[%s9554_s0 + $0x20] sm:$0x1] }
 0x264   : > { %8599 = vmatmul.mubr.msk.bf16.gmra.mrb[28].mxu0 %vm1260_vm1, %v3449_v59  ;;  %v7810_v59 = vld [vmem:[%s9554_s0 + $0x88] sm:$0x1] }
 0x265   : > { %8607 = vmatpush3.bf16.msra.mxu0 %v9223_v58  ;;  %8610 = vmatprep.mubr.msk.bf16.mxu0 %vm1260_vm1, %v10548_v9  ;;  %v5158_v9 = vld [vmem:[%s9554_s0 + $0x38] sm:$0xfe]  ;;  %v7807_v58 = vld [vmem:[%s9554_s0 + $0x70] sm:$0xfe] }
 0x266   : > { %8608 = vmatprep.subr.bf16.mxu0 %v9224_v48  ;;  %v5259_v20 = vrot.slane %v5158_v9, 1 }
 0x268   : > { %v5261_v50 = vsel %vm645_vm0, %v5259_v20, %v5260_v11  ;;  %v5743_v20 = vrot.slane %v7807_v58, 1  ;;  %v5744_v11 = vrot.slane %v7810_v59, 1  ;;  %v7926_v59 = vld [vmem:[%s9554_s0 + $0x98] sm:$0xfe] }
 0x269   : > { %8609 = vmatpush3.bf16.msra.mxu0 %v9224_v48  ;;  %v5347_v34 = vadd.f32 %v5261_v50, %v10728_v45  ;;  %v5737_v48 = vrot.slane %v7805_v61, 1  ;;  %v5957_v50 = vrot.slane %v7857_v52, 2  ;;  %v5613_v61 = vadd.f32 %v10771_v16, %v5565_v56  ;;  %v5367_v56 = vld [vmem:[%s9554_s0] sm:$0xfc] }
 0x26a   : > { %v5745_v41 = vsel %vm645_vm0, %v5743_v20, %v5744_v11  ;;  %v5250_v52 = vrot.slane %v5152_v49, 1  ;;  %v5251_v20 = vrot.slane %v5155_v25, 1  ;;  %v5104_v49 = vld [vmem:[%s9554_s0 + $0x8] sm:$0xff] }
 0x26b   : > { %v5564_v9 = vadd.f32 %v5478_v43, %v5347_v34  ;;  %v5739_v31 = vsel %vm645_vm0, %v5737_v48, %v5738_v44  ;;  %v7925_v34 = vld [vmem:[%s9554_s0 + $0x90] sm:$0xfe]  ;;  %v5248_v44 = vrot.slane %v5154_v46, 1  ;;  %v5829_v11 = vadd.f32 %v5745_v41, %v5613_v61  ;;  %v7930_v61 = vld [vmem:[%s9554_s0 + $0xb8] sm:$0x1] }
 0x26c   : > { %8611 = vmatmul.mubr.msk.bf16.vlgmr.msra.gmra.mrb[24].mxu0 %vm1260_vm1, %v10557_v10  ;;  %v5373_v10 = vld [vmem:[%s9554_s0 + $0x30] sm:$0xfc]  ;;  %v6218_v57 = vrot.slane %v7925_v34, 1  ;;  %v6221_v41 = vrot.slane %v7926_v59, 1  ;;  %v5252_v25 = vsel %vm645_vm0, %v5250_v52, %v5251_v20  ;;  %v5372_v59 = vld [vmem:[%s9554_s0 + $0x28] sm:$0x3] }
 0x26d   : > { %8614 = vmatprep.mubr.msk.bf16.mxu0 %vm1260_vm1, %v10569_v53  ;;  %v10720_v53 = vld [vmem:[%s9554_s0 + $0x30] sm:$0xff]  ;;  %v5473_v32 = vrot.slane %v5373_v10, 2  ;;  %v7854_v10 = vld [vmem:[%s9554_s0 + $0x68] sm:$0xfc]  ;;  %v5612_v60 = vadd.f32 %v10754_v17, %v5564_v9  ;;  %v7976_v20 = vld [vmem:[%s9554_s0 + $0xa8] sm:$0x3] }
 0x26e   : > { %v5346_v24 = vadd.f32 %v5258_v27, %v10720_v53  ;;  %v5956_v2 = vrot.slane %v7854_v10, 2  ;;  %v7929_v9 = vld [vmem:[%s9554_s0 + $0xb0] sm:$0x1]  ;;  %v5153_v10 = vld [vmem:[%s9554_s0 + $0x10] sm:$0xfe] }
 0x26f   : > { %v5475_v36 = vsel %vm5463_vm3, %v5473_v32, %v5474_v13  ;;  %v7855_v32 = vld [vmem:[%s9554_s0 + $0x70] sm:$0xfc]  ;;  %v7858_v13 = vld [vmem:[%s9554_s0 + $0x88] sm:$0x3]  ;;  %v7978_v27 = vld [vmem:[%s9554_s0 + $0xb8] sm:$0x3] }
 0x270   : > { %v5563_v40 = vadd.f32 %v5475_v36, %v5346_v24  ;;  %v5151_v24 = vld [vmem:[%s9554_s0] sm:$0xfe]  ;;  %v5959_v58 = vrot.slane %v7855_v32, 2  ;;  %v5960_v47 = vrot.slane %v7858_v13, 2  ;;  %v5958_v26 = vsel %vm5463_vm3, %v5956_v2, %v5957_v50  ;;  %v10795_v34 = vld [vmem:[%s9554_s0 + $0x90] sm:$0xff] }
 0x271   : > { %v5247_v48 = vrot.slane %v5151_v24, 1  ;;  %v5371_v32 = vld [vmem:[%s9554_s0 + $0x20] sm:$0x3]  ;;  %v5464_v24 = vrot.slane %v5367_v56, 2  ;;  %v5369_v56 = vld [vmem:[%s9554_s0 + $0x10] sm:$0xfc] }
 0x272   : > { %v5611_v6 = vadd.f32 %v10743_v3, %v5563_v40  ;;  %v7928_v40 = vld [vmem:[%s9554_s0 + $0xa8] sm:$0x1]  ;;  %v5961_v13 = vsel %vm5463_vm3, %v5959_v58, %v5960_v47  ;;  %v5103_v2 = vld [vmem:[%s9554_s0] sm:$0xff] }
 0x273   : > { %v6219_v19 = vrot.slane %v7928_v40, 1  ;;  %v5249_v50 = vsel %vm645_vm0, %v5247_v48, %v5248_v44  ;;  %v7973_v40 = vld [vmem:[%s9554_s0 + $0x90] sm:$0xfc]  ;;  %v5468_v48 = vrot.slane %v5371_v32, 2  ;;  %v6045_v44 = vadd.f32 %v5961_v13, %v5829_v11  ;;  %v7802_v36 = vld [vmem:[%s9554_s0 + $0x48] sm:$0x1] }
 0x274   : > { %8615 = vmatmul.mubr.msk.bf16.gmra.mrb[28].mxu0 %vm1260_vm1, %v3579_v51  ;;  %v7853_v51 = vld [vmem:[%s9554_s0 + $0x60] sm:$0xfc]  ;;  %v5827_v15 = vadd.f32 %v5739_v31, %v5611_v6  ;;  %v5370_v6 = vld [vmem:[%s9554_s0 + $0x18] sm:$0x3]  ;;  %v5368_v31 = vld [vmem:[%s9554_s0 + $0x8] sm:$0xfc] }
 0x275   : > { %v5953_v8 = vrot.slane %v7853_v51, 2  ;;  %v5828_v51 = vadd.f32 %v5742_v22, %v5612_v60  ;;  %v7927_v60 = vld [vmem:[%s9554_s0 + $0xa0] sm:$0xfe]  ;;  %v5465_v46 = vrot.slane %v5370_v6, 2  ;;  %v5467_v47 = vrot.slane %v5368_v31, 2 }
 0x276   : > { %v6224_v52 = vrot.slane %v7927_v60, 1  ;;  %v6225_v13 = vrot.slane %v7930_v61, 1  ;;  %v6434_v61 = vrot.slane %v7973_v40, 2 }
 0x277   : > { %v5955_v43 = vsel %vm5463_vm3, %v5953_v8, %v5954_v0  ;;  %v5156_v0 = vld [vmem:[%s9554_s0 + $0x28] sm:$0x1]  ;;  %v6044_v22 = vadd.f32 %v5958_v26, %v5828_v51  ;;  %v7974_v51 = vld [vmem:[%s9554_s0 + $0x98] sm:$0xfc]  ;;  %v5343_v26 = vadd.f32 %v5249_v50, %v5103_v2  ;;  %v5466_v11 = vsel %vm5463_vm3, %v5464_v24, %v5465_v46  ;;  %v7799_v50 = vld [vmem:[%s9554_s0 + $0x30] sm:$0xfe] }
 0x278   : > { %v6043_v8 = vadd.f32 %v5955_v43, %v5827_v15  ;;  %v6222_v15 = vrot.slane %v7929_v9, 1  ;;  %v5253_v43 = vrot.slane %v5153_v10, 1  ;;  %v5254_v58 = vrot.slane %v5156_v0, 1  ;;  %v10805_v9 = vld [vmem:[%s9554_s0 + $0x98] sm:$0xff]  ;;  %v7977_v0 = vld [vmem:[%s9554_s0 + $0xb0] sm:$0x3] }
 0x279   : > { %v6220_v10 = vsel %vm645_vm0, %v6218_v57, %v6219_v19  ;;  %v6093_v31 = vadd.f32 %v10805_v9, %v6044_v22  ;;  %v5344_v2 = vadd.f32 %v5252_v25, %v5104_v49  ;;  %v5105_v57 = vld [vmem:[%s9554_s0 + $0x10] sm:$0xff]  ;;  %v5469_v60 = vsel %vm5463_vm3, %v5467_v47, %v5468_v48  ;;  %v7800_v49 = vld [vmem:[%s9554_s0 + $0x38] sm:$0xfe] }
 0x27a   : > { %v6092_v6 = vadd.f32 %v10795_v34, %v6043_v8  ;;  %v6223_v32 = vsel %vm645_vm0, %v6221_v41, %v6222_v15  ;;  %v7975_v8 = vld [vmem:[%s9554_s0 + $0xa0] sm:$0xfc]  ;;  %v5255_v19 = vsel %vm645_vm0, %v5253_v43, %v5254_v58  ;;  %v5470_v24 = vrot.slane %v5369_v56, 2  ;;  %v7803_v25 = vld [vmem:[%s9554_s0 + $0x50] sm:$0x1] }
 0x27b   : > { %v5471_v46 = vrot.slane %v5372_v59, 2  ;;  %v6094_v22 = vadd.f32 %v10817_v14, %v6045_v44  ;;  %v6435_v41 = vrot.slane %v7976_v20, 2  ;;  %v5560_v15 = vadd.f32 %v5466_v11, %v5343_v26  ;;  %v7847_v59 = vld [vmem:[%s9554_s0 + $0x30] sm:$0xfc]  ;;  %v7850_v44 = vld [vmem:[%s9554_s0 + $0x48] sm:$0x3] }
 0x27c   : > { %v6437_v62 = vrot.slane %v7974_v51, 2  ;;  %v6438_v7 = vrot.slane %v7977_v0, 2  ;;  %v5728_v18 = vrot.slane %v7799_v50, 1  ;;  %v5729_v43 = vrot.slane %v7802_v36, 1  ;;  %v7801_v26 = vld [vmem:[%s9554_s0 + $0x40] sm:$0xfe] }
 0x27d   : > { %v6226_v58 = vsel %vm645_vm0, %v6224_v52, %v6225_v13  ;;  %v6308_v47 = vadd.f32 %v6220_v10, %v6092_v6  ;;  %v5345_v48 = vadd.f32 %v5255_v19, %v5105_v57  ;;  %v5561_v56 = vadd.f32 %v5469_v60, %v5344_v2  ;;  %v7804_v20 = vld [vmem:[%s9554_s0 + $0x58] sm:$0x1]  ;;  %v7848_v19 = vld [vmem:[%s9554_s0 + $0x38] sm:$0xfc]  ;;  %v7851_v60 = vld [vmem:[%s9554_s0 + $0x50] sm:$0x3] }
 0x27e   : > { %v6309_v4 = vadd.f32 %v6223_v32, %v6093_v31  ;;  %v5472_v40 = vsel %vm5463_vm3, %v5470_v24, %v5471_v46  ;;  %v5731_v11 = vrot.slane %v7800_v49, 1  ;;  %v5732_v1 = vrot.slane %v7803_v25, 1  ;;  %v7852_v49 = vld [vmem:[%s9554_s0 + $0x58] sm:$0x3] }
 0x27f   : > { %v6436_v51 = vsel %vm5463_vm3, %v6434_v61, %v6435_v41  ;;  %v6440_v0 = vrot.slane %v7975_v8, 2  ;;  %v6441_v36 = vrot.slane %v7978_v27, 2  ;;  %v5608_v52 = vadd.f32 %v5560_v15, %v10720_v53  ;;  %v10845_v53 = vld [vmem:[%s12306_s5] ss:$0 sm:$0xff]  ;;  %v7849_v15 = vld [vmem:[%s9554_s0 + $0x40] sm:$0xfc] }
 0x280   : > { %v6439_v6 = vsel %vm5463_vm3, %v6437_v62, %v6438_v7  ;;  %v5730_v10 = vsel %vm645_vm0, %v5728_v18, %v5729_v43  ;;  %v5944_v13 = vrot.slane %v7847_v59, 2  ;;  %v5945_v31 = vrot.slane %v7850_v44, 2  ;;  %v10851_v7 = vld [vmem:[%s12307_s6] ss:$0 sm:$0xff]  ;;  %v7834_v8 = vld [vmem:[%s9554_s0 + $0x148] sm:$0x1] }
 0x281   : > { %v5562_v32 = vadd.f32 %v5472_v40, %v5345_v48  ;;  %v5609_v2 = vadd.f32 %v5561_v56, %v10728_v45  ;;  %v5734_v50 = vrot.slane %v7801_v26, 1  ;;  %v5735_v57 = vrot.slane %v7804_v20, 1  ;;  %v7919_v48 = vld [vmem:[%s9554_s0 + $0x60] sm:$0xfe]  ;;  %v10867_v40 = vld [vmem:[%s9554_s0 + $0x68] sm:$0xfe] }
 0x282   : > { %v6310_v62 = vadd.f32 %v6226_v58, %v6094_v22  ;;  %v5733_v18 = vsel %vm645_vm0, %v5731_v11, %v5732_v1  ;;  %v6442_v24 = vsel %vm5463_vm3, %v6440_v0, %v6441_v36  ;;  %v10854_v46 = vadd.f32 %v6436_v51, %v6308_v47  ;;  %v7922_v26 = vld [vmem:[%s9554_s0 + $0x78] sm:$0x1]  ;;  %v7923_v36 = vld [vmem:[%s9554_s0 + $0x80] sm:$0x1] }
 0x283   : > { %v10856_v61 = vadd.f32 %v6439_v6, %v6309_v4  ;;  %v5824_v41 = vadd.f32 %v5730_v10, %v5608_v52  ;;  %v5946_v25 = vsel %vm5463_vm3, %v5944_v13, %v5945_v31  ;;  %v5947_v43 = vrot.slane %v7848_v19, 2  ;;  %v9225_v10 = vld [vmem:[%s12311_s10 + $0x30] sm:$0xff]  }
 0x284   : > { %v5948_v58 = vrot.slane %v7851_v60, 2  ;;  %v5610_v59 = vadd.f32 %v5562_v32, %v10733_v12  ;;  %v5736_v4 = vsel %vm645_vm0, %v5734_v50, %v5735_v57  ;;  %v5825_v44 = vadd.f32 %v5733_v18, %v5609_v2  ;;  %v10882_v32 = vld [vmem:[%s9554_s0 + $0x70] sm:$0xfe]  ;;  %v5163_v60 = vld [vmem:[%s9554_s0 + $0x60] sm:$0xfe]  ;;  %8618 = vmatprep.subr.bf16.mxu1 %v9225_v10 }
 0x285   : > { %v5950_v51 = vrot.slane %v7849_v15, 2  ;;  %v5951_v0 = vrot.slane %v7852_v49, 2  ;;  %v6040_v52 = vadd.f32 %v5946_v25, %v5824_v41  ;;  %v6209_v6 = vrot.slane %v7919_v48, 1  ;;  %v5164_v49 = vld [vmem:[%s9554_s0 + $0x68] sm:$0xfe]  ;;  %8619 = vmatpush3.bf16.msra.mxu1 %v9225_v10 }
 0x286   : > { %v5949_v31 = vsel %vm5463_vm3, %v5947_v43, %v5948_v58  ;;  %v6210_v2 = vrot.slane %v7922_v26, 1  ;;  %v6212_v57 = vrot.slane %v10867_v40, 1  ;;  %v6213_v19 = vrot.slane %v7923_v36, 1  ;;  %v5167_v48 = vld [vmem:[%s9554_s0 + $0x80] sm:$0x1] }
 0x287   : > { %v5826_v15 = vadd.f32 %v5736_v4, %v5610_v59  ;;  %v6041_v25 = vadd.f32 %v5949_v31, %v5825_v44  ;;  %v10898_v43 = vadd.f32 %v10743_v3, %v6040_v52  ;;  %v6215_v58 = vrot.slane %v10882_v32, 1  ;;  %v10906_v40 = vld [vmem:[%s9554_s0 + $0x88] sm:$0x1]  ;;  %v5380_v31 = vld [vmem:[%s9554_s0 + $0x68] sm:$0xfc]  ;;  %v6561_v32 = vpop.permute.xlu1 %6560 }
 0x288   : > { %v6211_v44 = vsel %vm645_vm0, %v6209_v6, %v6210_v2  ;;  %v5168_v52 = vld [vmem:[%s9554_s0 + $0x88] sm:$0x1]  ;;  %v5269_v6 = vrot.slane %v5167_v48, 1 }
 0x2bd   : > { %v8468_v45 = vpop.f32.mrb[0].mxu1 }
 0x2be   : > { %v8822_v22 = vadd.f32 %v8468_v45, %v10647_v23  ;;  %v2406_v1 = vpop.f32.mrb[1].mxu1 }
 0x2bf   : > { %v8823_v56 = vadd.f32 %v2406_v1, %v10650_v37  ;;  %v8469_v47 = vpop.f32.mrb[2].mxu1  ;;  %v5952_v1 = vsel %vm5463_vm3, %v5950_v51, %v5951_v0  ;;  %v5268_v51 = vrot.slane %v5164_v49, 1 }
 0x2c0   : > { %v2454_v23 = vmul.f32 %v8822_v22, %v10845_v53  ;;  %v8824_v20 = vadd.f32 %v8469_v47, %v10654_v38  ;;  %v2409_v11 = vpop.f32.mrb[3].mxu1  ;;  %v5166_v22 = vld [vmem:[%s9554_s0 + $0x78] sm:$0x1] }
 0x2c1   : > { %v2452_v37 = vmul.f32 %v8823_v56, %v10845_v53  ;;  %v8825_v12 = vadd.f32 %v2409_v11, %v10659_v39  ;;  %v10885_v39 = vadd.f32 %v6442_v24, %v6310_v62  ;;  %v9226_v62 = vld [vmem:[%s12311_s10 + $0x38] sm:$0xff]   ;;  %v5265_v11 = vrot.slane %v5163_v60, 1 }
 0x2c2   : > { %v2455_v13 = vmul.f32 %v8824_v20, %v10845_v53  ;;  %v2469_v38 = vadd.f32 %v10851_v7, %v2454_v23  ;;  %8620 = vmatprep.subr.bf16.mxu1 %v9226_v62  ;;  %v5165_v20 = vld [vmem:[%s9554_s0 + $0x70] sm:$0xfe]  ;;  %v5270_v48 = vsel %vm645_vm0, %v5268_v51, %v5269_v6 }
 0x2c3   : > { %v2453_v50 = vmul.f32 %v8825_v12, %v10845_v53  ;;  %v2467_v41 = vadd.f32 %v10851_v7, %v2452_v37  ;;  %8621 = vmatpush3.bf16.msra.mxu1 %v9226_v62  ;;  %v5271_v49 = vrot.slane %v5165_v20, 1  ;;  %v6090_v20 = vadd.f32 %v10754_v17, %v6041_v25  ;;  %v7969_v25 = vld [vmem:[%s9554_s0 + $0x70] sm:$0xfc] }
 0x2c4   : > { %v2477_v18 = vmax.f32 %v2469_v38, 0.0  ;;  %v2470_v45 = vadd.f32 %v10851_v7, %v2455_v13  ;;  %v6042_v13 = vadd.f32 %v5952_v1, %v5826_v15  ;;  %v10918_v38 = vsel %vm645_vm0, %v6212_v57, %v6213_v19  ;;  %v7967_v15 = vld [vmem:[%s9554_s0 + $0x60] sm:$0xfc]  ;;  %v7970_v57 = vld [vmem:[%s9554_s0 + $0x78] sm:$0x3] }
 0x2c5   : > { %v8472_v24 = vpop.f32.mrb[4].mxu1  ;;  %v2468_v4 = vadd.f32 %v10851_v7, %v2453_v50  ;;  %v2475_v12 = vmax.f32 %v2467_v41, 0.0  ;;  %v5383_v41 = vld [vmem:[%s9554_s0 + $0x80] sm:$0x3] }
 0x2c6   : > { %v8826_v56 = vadd.f32 %v8472_v24, %v10675_v55  ;;  %v2422_v47 = vpop.f32.mrb[5].mxu1  ;;  %7001 = vrot.lane.b32.xlu1 %v2477_v18, %s9371_s30  ;;  %v2478_v59 = vmax.f32 %v2470_v45, 0.0  ;;  %v5266_v55 = vrot.slane %v5166_v22, 1  ;;  %v6216_v18 = vrot.slane %v10906_v40, 1  ;;  %v5382_v45 = vld [vmem:[%s9554_s0 + $0x78] sm:$0x3] }
 0x2c7   : > { %v8827_v26 = vadd.f32 %v2422_v47, %v10678_v63  ;;  %v8473_v23 = vpop.f32.mrb[6].mxu1  ;;  %v2476_v50 = vmax.f32 %v2468_v4, 0.0  ;;  %v5272_v22 = vrot.slane %v5168_v52, 1  ;;  %v5384_v47 = vld [vmem:[%s9554_s0 + $0x88] sm:$0x3]  ;;  %v5485_v4 = vrot.slane %v5380_v31, 2 }
 0x2c8   : > { %v2458_v0 = vmul.f32 %v8826_v56, %v10845_v53  ;;  %v8828_v36 = vadd.f32 %v8473_v23, %v10682_v33  ;;  %v2425_v37 = vpop.f32.mrb[7].mxu1  ;;  %7003 = vrot.lane.b32.xlu0 %v2478_v59, %s9371_s30  ;;  %v5379_v33 = vld [vmem:[%s9554_s0 + $0x60] sm:$0xfc]  ;;  %v5267_v19 = vsel %vm645_vm0, %v5265_v11, %v5266_v55  ;;  %v5381_v56 = vld [vmem:[%s9554_s0 + $0x70] sm:$0xfc]  ;;  %v5483_v59 = vrot.slane %v5382_v45, 2 }
 0x2c9   : > { %v2456_v63 = vmul.f32 %v8827_v26, %v10845_v53  ;;  %v8829_v10 = vadd.f32 %v2425_v37, %v10687_v21  ;;  %v5486_v40 = vrot.slane %v5383_v41, 2  ;;  %v7968_v11 = vld [vmem:[%s9554_s0 + $0x68] sm:$0xfc]  ;;  %v6425_v55 = vrot.slane %v7967_v15, 2  ;;  %v9227_v52 = vld [vmem:[%s12311_s10 + $0x40] sm:$0xff]  }
 0x2ca   : > { %v2459_v2 = vmul.f32 %v8828_v36, %v10845_v53  ;;  %6997 = vrot.lane.b32.xlu1 %v2475_v12, %s9371_s30  ;;  %v2473_v60 = vadd.f32 %v10851_v7, %v2458_v0  ;;  %v7971_v0 = vld [vmem:[%s9554_s0 + $0x80] sm:$0x3]  ;;  %v6426_v36 = vrot.slane %v7970_v57, 2  ;;  %v5273_v51 = vsel %vm645_vm0, %v5271_v49, %v5272_v22  ;;  %v7811_v45 = vld [vmem:[%s9554_s0 + $0x90] sm:$0xfe]  ;;  %8622 = vmatprep.subr.bf16.mxu1 %v9227_v52 }
 0x2cb   : > { %v2457_v21 = vmul.f32 %v8829_v10, %v10845_v53  ;;  %v2471_v1 = vadd.f32 %v10851_v7, %v2456_v63  ;;  %v5482_v53 = vrot.slane %v5379_v33, 2  ;;  %v5488_v37 = vrot.slane %v5381_v56, 2  ;;  %v7972_v63 = vld [vmem:[%s9554_s0 + $0x88] sm:$0x3]  ;;  %8623 = vmatpush3.bf16.msra.mxu1 %v9227_v52  ;;  %v7813_v22 = vld [vmem:[%s9554_s0 + $0xa0] sm:$0xfe] }
 0x2cc   : > { %6999 = vrot.lane.b32.xlu0 %v2476_v50, %s9371_s30  ;;  %v2481_v62 = vmax.f32 %v2473_v60, 0.0  ;;  %v2474_v24 = vadd.f32 %v10851_v7, %v2459_v2  ;;  %v5489_v12 = vrot.slane %v5384_v47, 2  ;;  %v5349_v10 = vadd.f32 %v10743_v3, %v5267_v19  ;;  %v7814_v41 = vld [vmem:[%s9554_s0 + $0xa8] sm:$0x1] }
 0x2cd   : > { %v2472_v23 = vadd.f32 %v10851_v7, %v2457_v21  ;;  %v2479_v6 = vmax.f32 %v2471_v1, 0.0  ;;  %v6305_v7 = vadd.f32 %v6211_v44, %v10898_v43  ;;  %v5350_v33 = vadd.f32 %v10754_v17, %v5270_v48  ;;  %v7815_v21 = vld [vmem:[%s9554_s0 + $0xb0] sm:$0x1]  ;;  %v7859_v1 = vld [vmem:[%s9554_s0 + $0x90] sm:$0xfc] }
 0x2ce   : > { %7009 = vrot.lane.b32.xlu1 %v2481_v62, %s9371_s30  ;;  %v2482_v26 = vmax.f32 %v2474_v24, 0.0  ;;  %v6091_v31 = vadd.f32 %v10771_v16, %v6042_v13  ;;  %v6428_v2 = vrot.slane %v7968_v11, 2  ;;  %v5484_v50 = vsel %vm5463_vm3, %v5482_v53, %v5483_v59  ;;  %v7812_v13 = vld [vmem:[%s9554_s0 + $0x98] sm:$0xfe]  ;;  %v7863_v11 = vld [vmem:[%s9554_s0 + $0xb0] sm:$0x3] }
 0x2cf   : > { %v5487_v60 = vsel %vm5463_vm3, %v5485_v4, %v5486_v40  ;;  %v2480_v43 = vmax.f32 %v2472_v23, 0.0  ;;  %v6217_v3 = vsel %vm645_vm0, %v6215_v58, %v6216_v18  ;;  %v6429_v17 = vrot.slane %v7971_v0, 2  ;;  %v10978_v59 = vld [vmem:[%s9554_s0 + $0x98] sm:$0xfc]  ;;  %v9228_v4 = vld [vmem:[%s12311_s10 + $0x48] sm:$0xff]  }
 0x2d0   : > { %7011 = vrot.lane.b32.xlu0 %v2482_v26, %s9371_s30  ;;  %v5351_v44 = vadd.f32 %v10771_v16, %v5273_v51  ;;  %v6427_v15 = vsel %vm5463_vm3, %v6425_v55, %v6426_v36  ;;  %v6431_v57 = vrot.slane %v7969_v25, 2  ;;  %v6432_v19 = vrot.slane %v7972_v63, 2  ;;  %v7816_v16 = vld [vmem:[%s9554_s0 + $0xb8] sm:$0x1]  ;;  %8624 = vmatprep.subr.bf16.mxu1 %v9228_v4  ;;  %v5170_v63 = vld [vmem:[%s9554_s0 + $0x98] sm:$0xfe] }
 0x2d1   : > { %v5490_v49 = vsel %vm5463_vm3, %v5488_v37, %v5489_v12  ;;  %v5566_v62 = vadd.f32 %v5484_v50, %v5349_v10  ;;  %v5567_v58 = vadd.f32 %v5487_v60, %v5350_v33  ;;  %v5746_v18 = vrot.slane %v7811_v45, 1  ;;  %v7861_v37 = vld [vmem:[%s9554_s0 + $0xa0] sm:$0xfc]  ;;  %v5169_v12 = vld [vmem:[%s9554_s0 + $0x90] sm:$0xfe]  ;;  %8625 = vmatpush3.bf16.msra.mxu1 %v9228_v4 }
 0x2d2   : > { %7005 = vrot.lane.b32.xlu1 %v2479_v6, %s9371_s30  ;;  %v5747_v24 = vrot.slane %v7814_v41, 1  ;;  %v10972_v48 = vmul.f32 %v6561_v32, %v10854_v46  ;;  %v10975_v56 = vmul.f32 %v6561_v32, %v10856_v61  ;;  %v5749_v47 = vrot.slane %v7812_v13, 1  ;;  %v7862_v61 = vld [vmem:[%s9554_s0 + $0xa8] sm:$0x3]  ;;  %v7864_v25 = vld [vmem:[%s9554_s0 + $0xb8] sm:$0x3] }
 0x2d3   : > { %v5750_v53 = vrot.slane %v7815_v21, 1  ;;  %v10984_v40 = vmul.f32 %v6561_v32, %v10885_v39  ;;  %v6306_v46 = vadd.f32 %v10918_v38, %v6090_v20  ;;  %v5568_v26 = vadd.f32 %v5490_v49, %v5351_v44  ;;  %v5172_v39 = vld [vmem:[%s9554_s0 + $0xa8] sm:$0x1]  ;;  %v9229_v38 = vld [vmem:[%s12311_s10 + $0x50] sm:$0xff]   ;;  %v5171_v60 = vld [vmem:[%s9554_s0 + $0xa0] sm:$0xfe] }
 0x2d4   : > { %7007 = vrot.lane.b32.xlu0 %v2480_v43, %s9371_s30  ;;  %v5752_v23 = vrot.slane %v7813_v22, 1  ;;  %v6307_v55 = vadd.f32 %v6217_v3, %v6091_v31  ;;  %v6430_v0 = vsel %vm5463_vm3, %v6428_v2, %v6429_v17  ;;  %v10990_v36 = vadd.f32 %v6427_v15, %v6305_v7  ;;  %v5173_v10 = vld [vmem:[%s9554_s0 + $0xb0] sm:$0x1]  ;;  %8626 = vmatprep.subr.bf16.mxu1 %v9229_v38  ;;  %v5174_v43 = vld [vmem:[%s9554_s0 + $0xb8] sm:$0x1]  ;;  %s12423_s30 = smov %s12422_s27 }
 0x2d5   : > { %12385 = vst [vmem:[#allocation15_spill] sm:$0xff] %v10984_v40  ;;  %v5753_v51 = vrot.slane %v7816_v16, 1  ;;  %v6433_v20 = vsel %vm5463_vm3, %v6431_v57, %v6432_v19  ;;  %v5614_v52 = vadd.f32 %v10795_v34, %v5566_v62  ;;  %v5615_v6 = vadd.f32 %v10805_v9, %v5567_v58  ;;  %v9230_v44 = vld [vmem:[%s12311_s10 + $0x58] sm:$0xff]   ;;  %v7931_v15 = vld [vmem:[%s9554_s0 + $0xc0] sm:$0xfe]  ;;  %8627 = vmatpush3.bf16.msra.mxu1 %v9229_v38 }
 0x2d6   : > { %v5748_v7 = vsel %vm645_vm0, %v5746_v18, %v5747_v24  ;;  %v5751_v33 = vsel %vm645_vm0, %v5749_v47, %v5750_v53  ;;  %v5962_v31 = vrot.slane %v7859_v1, 2  ;;  %v5963_v2 = vrot.slane %v7862_v61, 2  ;;  %v5385_v49 = vld [vmem:[%s9554_s0 + $0x90] sm:$0xfc]  ;;  %v5388_v22 = vld [vmem:[%s9554_s0 + $0xa8] sm:$0x3]  ;;  %8628 = vmatprep.subr.bf16.mxu1 %v9230_v44 }
 0x2d7   : > { %v5965_v50 = vrot.slane %v10978_v59, 2  ;;  %v5616_v45 = vadd.f32 %v10817_v14, %v5568_v26  ;;  %v5966_v41 = vrot.slane %v7863_v11, 2  ;;  %v5274_v3 = vrot.slane %v5169_v12, 1  ;;  %v5386_v18 = vld [vmem:[%s9554_s0 + $0x98] sm:$0xfc] }
 0x2d8   : > { %v5275_v17 = vrot.slane %v5172_v39, 1  ;;  %v11013_v13 = vadd.f32 %v6430_v0, %v6306_v46  ;;  %v5754_v21 = vsel %vm645_vm0, %v5752_v23, %v5753_v51  ;;  %v5277_v57 = vrot.slane %v5170_v63, 1  ;;  %v5389_v24 = vld [vmem:[%s9554_s0 + $0xb0] sm:$0x3]  ;;  %v7934_v53 = vld [vmem:[%s9554_s0 + $0xd8] sm:$0x1] }
 0x2d9   : > { %v5278_v19 = vrot.slane %v5173_v10, 1  ;;  %v11019_v32 = vadd.f32 %v6433_v20, %v6307_v55  ;;  %v5830_v62 = vadd.f32 %v5748_v7, %v5614_v52  ;;  %v5968_v58 = vrot.slane %v7861_v37, 2  ;;  %v9231_v46 = vld [vmem:[%s12311_s10] sm:$0xff]   ;;  %v5390_v11 = vld [vmem:[%s9554_s0 + $0xb8] sm:$0x3]  ;;  %8629 = vmatpush3.bf16.msra.mxu1 %v9230_v44 }
 0x2da   : > { %v5969_v16 = vrot.slane %v7864_v25, 2  ;;  %v5831_v1 = vadd.f32 %v5751_v33, %v5615_v6  ;;  %v5964_v47 = vsel %vm5463_vm3, %v5962_v31, %v5963_v2  ;;  %v5280_v59 = vrot.slane %v5171_v60, 1  ;;  %v5387_v61 = vld [vmem:[%s9554_s0 + $0xa0] sm:$0xfc]  ;;  %v7932_v37 = vld [vmem:[%s9554_s0 + $0xc8] sm:$0xfe]  ;;  %8638 = vmatprep.subr.bf16.mxu1 %v9231_v46 }
 0x2db   : > { %v5281_v4 = vrot.slane %v5174_v43, 1  ;;  %v5832_v26 = vadd.f32 %v5754_v21, %v5616_v45  ;;  %v5276_v23 = vsel %vm645_vm0, %v5274_v3, %v5275_v17  ;;  %v5491_v55 = vrot.slane %v5385_v49, 2  ;;  %v7933_v6 = vld [vmem:[%s9554_s0 + $0xd0] sm:$0xfe]  ;;  %v7935_v7 = vld [vmem:[%s9554_s0 + $0xe0] sm:$0x1] }
 0x2dc   : > { %v5492_v0 = vrot.slane %v5388_v22, 2  ;;  %v5967_v51 = vsel %vm5463_vm3, %v5965_v50, %v5966_v41  ;;  %v5279_v12 = vsel %vm645_vm0, %v5277_v57, %v5278_v19  ;;  %v5494_v39 = vrot.slane %v5386_v18, 2  ;;  %v7936_v10 = vld [vmem:[%s9554_s0 + $0xe8] sm:$0x1]  ;;  %v11041_v45 = vld [vmem:[%s9554_s0 + $0xc0] sm:$0xff] }
 0x2dd   : > { %v5495_v38 = vrot.slane %v5389_v24, 2  ;;  %v5970_v20 = vsel %vm5463_vm3, %v5968_v58, %v5969_v16  ;;  %v6046_v52 = vadd.f32 %v5964_v47, %v5830_v62  ;;  %v6227_v25 = vrot.slane %v7931_v15, 1  ;;  %v7979_v43 = vld [vmem:[%s9554_s0 + $0xc0] sm:$0xfc]  ;;  %v7982_v3 = vld [vmem:[%s9554_s0 + $0xd8] sm:$0x3]  ;;  %v11055_v24 = vpop.permute.xlu0 %6555 }
 0x2de   : > { %v6228_v63 = vrot.slane %v7934_v53, 1  ;;  %v5282_v33 = vsel %vm645_vm0, %v5280_v59, %v5281_v4  ;;  %v5352_v31 = vadd.f32 %v10795_v34, %v5276_v23  ;;  %v5497_v2 = vrot.slane %v5387_v61, 2  ;;  %v7817_v19 = vld [vmem:[%s9554_s0 + $0xc0] sm:$0xfe]  ;;  %v7820_v49 = vld [vmem:[%s9554_s0 + $0xd8] sm:$0x1] }
 0x2df   : > { %v5498_v50 = vrot.slane %v5390_v11, 2  ;;  %v6047_v60 = vadd.f32 %v5967_v51, %v5831_v1  ;;  %v6230_v41 = vrot.slane %v7932_v37, 1  ;;  %v5353_v17 = vadd.f32 %v10805_v9, %v5279_v12  ;;  %v7818_v16 = vld [vmem:[%s9554_s0 + $0xc8] sm:$0xfe]  ;;  %v7821_v18 = vld [vmem:[%s9554_s0 + $0xe0] sm:$0x1] }
 0x2e0   : > { %v5493_v44 = vsel %vm5463_vm3, %v5491_v55, %v5492_v0  ;;  %v6048_v34 = vadd.f32 %v5970_v20, %v5832_v26  ;;  %v6231_v21 = vrot.slane %v7935_v7, 1  ;;  %v6233_v15 = vrot.slane %v7933_v6, 1  ;;  %v11058_v1 = vld [vmem:[%s9554_s0 + $0xc8] sm:$0xff]  ;;  %v11061_v47 = vld [vmem:[%s9554_s0 + $0xd0] sm:$0xff]  ;;  %v7865_v20 = vld [vmem:[%s9554_s0 + $0xc0] sm:$0xfc] }
 0x2e1   : > { %v5496_v57 = vsel %vm5463_vm3, %v5494_v39, %v5495_v38  ;;  %v6095_v22 = vadd.f32 %v11041_v45, %v6046_v52  ;;  %v6229_v62 = vsel %vm645_vm0, %v6227_v25, %v6228_v63  ;;  %v6234_v58 = vrot.slane %v7936_v10, 1  ;;  %v11064_v53 = vld [vmem:[%s9554_s0 + $0xc8] sm:$0xfc]  ;;  %v7819_v61 = vld [vmem:[%s9554_s0 + $0xd0] sm:$0xfe] }
 0x2e2   : > { %v5354_v9 = vadd.f32 %v10817_v14, %v5282_v33  ;;  %v6443_v59 = vrot.slane %v7979_v43, 2  ;;  %v6444_v4 = vrot.slane %v7982_v3, 2  ;;  %v5499_v46 = vsel %vm5463_vm3, %v5497_v2, %v5498_v50  ;;  %v7822_v11 = vld [vmem:[%s9554_s0 + $0xe8] sm:$0x1]  ;;  %v11076_v12 = vld [vmem:[%s9554_s0 + $0xd0] sm:$0xfc] }
 0x2e3   : > { %v5569_v26 = vadd.f32 %v5493_v44, %v5352_v31  ;;  %v11069_v14 = vmul.f32 %v11055_v24, %v10990_v36  ;;  %v5570_v23 = vadd.f32 %v5496_v57, %v5353_v17  ;;  %v5755_v55 = vrot.slane %v7817_v19, 1  ;;  %v7868_v36 = vld [vmem:[%s9554_s0 + $0xd8] sm:$0x3]  ;;  %v7983_v25 = vld [vmem:[%s9554_s0 + $0xe0] sm:$0x3] }
 0x2e4   : > { %v5756_v0 = vrot.slane %v7820_v49, 1  ;;  %v6096_v51 = vadd.f32 %v11058_v1, %v6047_v60  ;;  %v6232_v37 = vsel %vm645_vm0, %v6230_v41, %v6231_v21  ;;  %v5758_v39 = vrot.slane %v7818_v16, 1  ;;  %v7866_v10 = vld [vmem:[%s9554_s0 + $0xc8] sm:$0xfc]  ;;  %v7869_v33 = vld [vmem:[%s9554_s0 + $0xe0] sm:$0x3] }
 0x2e5   : > { %v5759_v38 = vrot.slane %v7821_v18, 1  ;;  %v6097_v52 = vadd.f32 %v11061_v47, %v6048_v34  ;;  %v6235_v6 = vsel %vm645_vm0, %v6233_v15, %v6234_v58  ;;  %v6311_v7 = vadd.f32 %v6229_v62, %v6095_v22  ;;  %v7984_v31 = vld [vmem:[%s9554_s0 + $0xe8] sm:$0x3]  ;;  %v7867_v17 = vld [vmem:[%s9554_s0 + $0xd0] sm:$0xfc] }
 0x2e6   : > { %v5571_v63 = vadd.f32 %v5499_v46, %v5354_v9  ;;  %v6446_v2 = vrot.slane %v11064_v53, 2  ;;  %v5617_v50 = vadd.f32 %v11041_v45, %v5569_v26  ;;  %v5761_v60 = vrot.slane %v7819_v61, 1  ;;  %v7870_v44 = vld [vmem:[%s9554_s0 + $0xe8] sm:$0x3]  ;;  %v5178_v46 = vld [vmem:[%s9554_s0 + $0xd8] sm:$0x1] }
 0x2e7   : > { %v5762_v41 = vrot.slane %v7822_v11, 1  ;;  %v5618_v43 = vadd.f32 %v11058_v1, %v5570_v23  ;;  %v5757_v3 = vsel %vm645_vm0, %v5755_v55, %v5756_v0  ;;  %v5971_v34 = vrot.slane %v7865_v20, 2  ;;  %v7937_v55 = vld [vmem:[%s9554_s0 + $0xf0] sm:$0xfe]  ;;  %v7938_v0 = vld [vmem:[%s9554_s0 + $0xf8] sm:$0xfe] }
 0x2e8   : > { %v5972_v21 = vrot.slane %v7868_v36, 2  ;;  %v6445_v15 = vsel %vm5463_vm3, %v6443_v59, %v6444_v4  ;;  %v5760_v57 = vsel %vm645_vm0, %v5758_v39, %v5759_v38  ;;  %v5974_v19 = vrot.slane %v7866_v10, 2  ;;  %v5175_v4 = vld [vmem:[%s9554_s0 + $0xc0] sm:$0xfe]  ;;  %v5177_v10 = vld [vmem:[%s9554_s0 + $0xd0] sm:$0xfe] }
 0x2e9   : > { %v5975_v49 = vrot.slane %v7869_v33, 2  ;;  %v6447_v22 = vrot.slane %v7983_v25, 2  ;;  %v6449_v62 = vrot.slane %v11076_v12, 2  ;;  %v6450_v58 = vrot.slane %v7984_v31, 2  ;;  %v7940_v12 = vld [vmem:[%s9554_s0 + $0x108] sm:$0x1] }
 0x2ea   : > { %v5619_v9 = vadd.f32 %v11061_v47, %v5571_v63  ;;  %v5763_v16 = vsel %vm645_vm0, %v5761_v60, %v5762_v41  ;;  %v5833_v18 = vadd.f32 %v5757_v3, %v5617_v50  ;;  %v5977_v53 = vrot.slane %v7867_v17, 2  ;;  %v11115_v36 = vld [vmem:[%s9554_s0 + $0x100] sm:$0xfe]  ;;  %v7941_v25 = vld [vmem:[%s9554_s0 + $0x110] sm:$0x1] }
 0x2eb   : > { %v5978_v59 = vrot.slane %v7870_v44, 2  ;;  %v11101_v26 = vmul.f32 %v11055_v24, %v11013_v13  ;;  %v5834_v61 = vadd.f32 %v5760_v57, %v5618_v43  ;;  %v5973_v11 = vsel %vm5463_vm3, %v5971_v34, %v5972_v21  ;;  %v5176_v63 = vld [vmem:[%s9554_s0 + $0xc8] sm:$0xfe]  ;;  %v5179_v50 = vld [vmem:[%s9554_s0 + $0xe0] sm:$0x1]  ;;  %v11130_v44 = vld [vmem:[%s9554_s0 + $0xf0] sm:$0xff] }
 0x2ec   : > { %v6312_v39 = vadd.f32 %v6232_v37, %v6096_v51  ;;  %v11109_v38 = vadd.f32 %v6235_v6, %v6097_v52  ;;  %v11111_v20 = vadd.f32 %v6445_v15, %v6311_v7  ;;  %v5976_v13 = vsel %vm5463_vm3, %v5974_v19, %v5975_v49  ;;  %v5180_v51 = vld [vmem:[%s9554_s0 + $0xe8] sm:$0x1]  ;;  %v7942_v60 = vld [vmem:[%s9554_s0 + $0x118] sm:$0x1]  ;;  %v7985_v3 = vld [vmem:[%s9554_s0 + $0xf0] sm:$0xfc] }
 0x2ed   : > { %v6448_v33 = vsel %vm5463_vm3, %v6446_v2, %v6447_v22  ;;  %v5835_v31 = vadd.f32 %v5763_v16, %v5619_v9  ;;  %v5283_v37 = vrot.slane %v5175_v4, 1  ;;  %v5284_v52 = vrot.slane %v5178_v46, 1  ;;  %v5391_v15 = vld [vmem:[%s9554_s0 + $0xc0] sm:$0xfc]  ;;  %v5394_v57 = vld [vmem:[%s9554_s0 + $0xd8] sm:$0x3] }
 0x2ee   : > { %v5979_v6 = vsel %vm5463_vm3, %v5977_v53, %v5978_v59  ;;  %v6049_v7 = vadd.f32 %v5973_v11, %v5833_v18  ;;  %v6236_v41 = vrot.slane %v7937_v55, 1  ;;  %v6237_v43 = vrot.slane %v7940_v12, 1  ;;  %v7988_v19 = vld [vmem:[%s9554_s0 + $0x108] sm:$0x3]  ;;  %v5392_v4 = vld [vmem:[%s9554_s0 + $0xc8] sm:$0xfc] }
 0x2ef   : > { %v11127_v17 = vsel %vm5463_vm3, %v6449_v62, %v6450_v58  ;;  %v6050_v2 = vadd.f32 %v5976_v13, %v5834_v61  ;;  %v6239_v34 = vrot.slane %v7938_v0, 1  ;;  %v6240_v21 = vrot.slane %v7941_v25, 1  ;;  %v11136_v58 = vld [vmem:[%s9554_s0 + $0xf8] sm:$0xff]  ;;  %v5393_v46 = vld [vmem:[%s9554_s0 + $0xd0] sm:$0xfc] }
 0x2f0   : > { %v5286_v49 = vrot.slane %v5176_v63, 1  ;;  %v5287_v22 = vrot.slane %v5179_v50, 1  ;;  %v5289_v9 = vrot.slane %v5177_v10, 1  ;;  %v5290_v16 = vrot.slane %v5180_v51, 1  ;;  %v5395_v55 = vld [vmem:[%s9554_s0 + $0xe0] sm:$0x3] }
 0x2f1   : > { %v6528_v18 = vadd.f32 %v6448_v33, %v6312_v39  ;;  %v6051_v62 = vadd.f32 %v5979_v6, %v5835_v31  ;;  %v6242_v53 = vrot.slane %v11115_v36, 1  ;;  %v5285_v59 = vsel %vm645_vm0, %v5283_v37, %v5284_v52  ;;  %v5396_v0 = vld [vmem:[%s9554_s0 + $0xe8] sm:$0x3]  ;;  %v7986_v63 = vld [vmem:[%s9554_s0 + $0xf8] sm:$0xfc] }
 0x2f2   : > { %v6098_v61 = vadd.f32 %v11130_v44, %v6049_v7  ;;  %v6238_v11 = vsel %vm645_vm0, %v6236_v41, %v6237_v43  ;;  %v5500_v12 = vrot.slane %v5391_v15, 2  ;;  %v5501_v39 = vrot.slane %v5394_v57, 2  ;;  %v7989_v10 = vld [vmem:[%s9554_s0 + $0x110] sm:$0x3]  ;;  %v7987_v31 = vld [vmem:[%s9554_s0 + $0x100] sm:$0xfc]  ;;  %v11160_v57 = vpop.permute.xlu1 %6565 }
 0x2f3   : > { %v6099_v13 = vadd.f32 %v11136_v58, %v6050_v2  ;;  %v6241_v25 = vsel %vm645_vm0, %v6239_v34, %v6240_v21  ;;  %v6243_v36 = vrot.slane %v7942_v60, 1  ;;  %v6452_v33 = vrot.slane %v7985_v3, 2  ;;  %v7990_v50 = vld [vmem:[%s9554_s0 + $0x118] sm:$0x3]  ;;  %v11156_v7 = vld [vmem:[%s9554_s0 + $0x100] sm:$0xff]  ;;  %12386 = vst [vmem:[#allocation16_spill] sm:$0xff] %v11160_v57 }
 0x2f4   : > { %v6453_v51 = vrot.slane %v7988_v19, 2  ;;  %v5288_v37 = vsel %vm645_vm0, %v5286_v49, %v5287_v22  ;;  %v5291_v52 = vsel %vm645_vm0, %v5289_v9, %v5290_v16  ;;  %v5355_v6 = vadd.f32 %v11041_v45, %v5285_v59  ;;  %v7823_v9 = vld [vmem:[%s9554_s0 + $0xf0] sm:$0xfe]  ;;  %v7826_v16 = vld [vmem:[%s9554_s0 + $0x108] sm:$0x1] }
 0x2f5   : > { %v5503_v41 = vrot.slane %v5392_v4, 2  ;;  %v5504_v43 = vrot.slane %v5395_v55, 2  ;;  %v5506_v2 = vrot.slane %v5393_v46, 2  ;;  %v5507_v60 = vrot.slane %v5396_v0, 2  ;;  %v7824_v0 = vld [vmem:[%s9554_s0 + $0xf8] sm:$0xfe] }
 0x2f6   : > { %v6100_v34 = vadd.f32 %v11156_v7, %v6051_v62  ;;  %v6455_v3 = vrot.slane %v7986_v63, 2  ;;  %v6456_v21 = vrot.slane %v7989_v10, 2  ;;  %v5502_v15 = vsel %vm5463_vm3, %v5500_v12, %v5501_v39  ;;  %v7827_v12 = vld [vmem:[%s9554_s0 + $0x110] sm:$0x1] }
 0x2f7   : > { %v6244_v19 = vsel %vm645_vm0, %v6242_v53, %v6243_v36  ;;  %v6314_v45 = vadd.f32 %v6238_v11, %v6098_v61  ;;  %v6458_v49 = vrot.slane %v7987_v31, 2  ;;  %v6459_v22 = vrot.slane %v7990_v50, 2  ;;  %v11178_v36 = vld [vmem:[%s9554_s0 + $0x100] sm:$0xfe]  ;;  %v11190_v31 = vld [vmem:[%s9554_s0 + $0xf0] sm:$0xfc] }
 0x2f8   : > { %v11167_v62 = vmul.f32 %v11160_v57, %v11111_v20  ;;  %v6454_v59 = vsel %vm5463_vm3, %v6452_v33, %v6453_v51  ;;  %v5356_v4 = vadd.f32 %v11058_v1, %v5288_v37  ;;  %v5357_v46 = vadd.f32 %v11061_v47, %v5291_v52  ;;  %v7828_v1 = vld [vmem:[%s9554_s0 + $0x118] sm:$0x1]  ;;  %v11193_v50 = vld [vmem:[%s9554_s0 + $0xf8] sm:$0xfc]  ;;  %v7874_v51 = vld [vmem:[%s9554_s0 + $0x108] sm:$0x3] }
 0x2f9   : > { %v6315_v55 = vadd.f32 %v6241_v25, %v6099_v13  ;;  %v5505_v53 = vsel %vm5463_vm3, %v5503_v41, %v5504_v43  ;;  %v5508_v61 = vsel %vm5463_vm3, %v5506_v2, %v5507_v60  ;;  %v5572_v11 = vadd.f32 %v5502_v15, %v5355_v6  ;;  %v11389_v23 = vld [vmem:[%s9554_s0 + $0x170] sm:$0x1] }
 0x2fa   : > { %v6316_v39 = vadd.f32 %v6244_v19, %v6100_v34  ;;  %v6457_v20 = vsel %vm5463_vm3, %v6455_v3, %v6456_v21  ;;  %v5764_v47 = vrot.slane %v7823_v9, 1  ;;  %v5765_v13 = vrot.slane %v7826_v16, 1  ;;  %v11205_v34 = vld [vmem:[%s9554_s0 + $0x100] sm:$0xfc]  ;;  %v11208_v3 = vld [vmem:[%s9554_s0 + $0x110] sm:$0x3] }
 0x2fb   : > { %v11183_v25 = vadd.f32 %v11127_v17, %v11109_v38  ;;  %v11186_v63 = vmul.f32 %v11160_v57, %v6528_v18  ;;  %v6460_v10 = vsel %vm5463_vm3, %v6458_v49, %v6459_v22  ;;  %v6530_v33 = vadd.f32 %v6454_v59, %v6314_v45  ;;  %v11197_v17 = vld [vmem:[%s9554_s0 + $0xf0] sm:$0xfe]  ;;  %v5184_v18 = vld [vmem:[%s9554_s0 + $0x108] sm:$0x1]  ;;  %v5182_v49 = vld [vmem:[%s9554_s0 + $0xf8] sm:$0xfe] }
 0x2fc   : > { %v5573_v37 = vadd.f32 %v5505_v53, %v5356_v4  ;;  %v5574_v52 = vadd.f32 %v5508_v61, %v5357_v46  ;;  %v5767_v6 = vrot.slane %v7824_v0, 1  ;;  %v5768_v38 = vrot.slane %v7827_v12, 1  ;;  %v5185_v22 = vld [vmem:[%s9554_s0 + $0x110] sm:$0x1]  ;;  %v11217_v9 = vld [vmem:[%s9554_s0 + $0x118] sm:$0x3]  ;;  %v11270_v12 = vpop.permute.xlu0 %6570 }
 0x2fd   : > { %v11200_v41 = vadd.f32 %v6457_v20, %v6315_v55  ;;  %v5620_v43 = vadd.f32 %v11130_v44, %v5572_v11  ;;  %v5770_v2 = vrot.slane %v11178_v36, 1  ;;  %v5771_v60 = vrot.slane %v7828_v1, 1  ;;  %v11225_v61 = vld [vmem:[%s9554_s0 + $0xf0] sm:$0xfc]  ;;  %v11228_v11 = vld [vmem:[%s9554_s0 + $0x108] sm:$0x3] }
 0x2fe   : > { %v11210_v21 = vadd.f32 %v6460_v10, %v6316_v39  ;;  %v5766_v15 = vsel %vm645_vm0, %v5764_v47, %v5765_v13  ;;  %v5980_v19 = vrot.slane %v11190_v31, 2  ;;  %v5981_v45 = vrot.slane %v7874_v51, 2  ;;  %12389 = vst [vmem:[#allocation18_spill] sm:$0xff] %v11270_v12  ;;  %v11274_v36 = vld [vmem:[%s9554_s0 + $0x120] sm:$0xfe] }
 0x2ff   : > { %v5292_v16 = vrot.slane %v11197_v17, 1  ;;  %v5293_v59 = vrot.slane %v5184_v18, 1  ;;  %v5621_v4 = vadd.f32 %v11136_v58, %v5573_v37  ;;  %v5622_v46 = vadd.f32 %v11156_v7, %v5574_v52  ;;  %v5183_v1 = vld [vmem:[%s9554_s0 + $0x100] sm:$0xfe]  ;;  %v5186_v47 = vld [vmem:[%s9554_s0 + $0x118] sm:$0x1] }
 0x300   : > { %12387 = vst [vmem:[#allocation17_spill] sm:$0xff] %v11210_v21  ;;  %v5769_v55 = vsel %vm645_vm0, %v5767_v6, %v5768_v38  ;;  %v5983_v53 = vrot.slane %v11193_v50, 2  ;;  %v12388_v0 = vmov 0.0   ;;  %v5772_v39 = vsel %vm645_vm0, %v5770_v2, %v5771_v60  ;;  %v5398_v52 = vld [vmem:[%s9554_s0 + $0xf8] sm:$0xfc] }
 0x301   : > { %3737 = vst.msk [vmem:[#allocation4] sm:$0xff] %vm3736_vm4, %v12388_v0  ;;  %3740 = vst.msk [vmem:[#allocation4 + $0x10] sm:$0xff] %vm3736_vm4, %v12388_v0  ;;  %v5836_v20 = vadd.f32 %v5766_v15, %v5620_v43  ;;  %v5295_v13 = vrot.slane %v5182_v49, 1  ;;  %v5296_v10 = vrot.slane %v5185_v22, 1  ;;  %v11279_v31 = vmul.f32 %v11270_v12, %v6530_v33  ;;  %v5401_v6 = vld [vmem:[%s9554_s0 + $0x110] sm:$0x3] }
 0x302   : > { %3742 = vst.msk [vmem:[#allocation4 + $0x20] sm:$0xff] %vm3736_vm4, %v12388_v0  ;;  %3744 = vst.msk [vmem:[#allocation4 + $0x30] sm:$0xff] %vm3736_vm4, %v12388_v0  ;;  %v5982_v50 = vsel %vm5463_vm3, %v5980_v19, %v5981_v45  ;;  %v5984_v51 = vrot.slane %v11208_v3, 2  ;;  %v5986_v37 = vrot.slane %v11205_v34, 2  ;;  %v5987_v38 = vrot.slane %v11217_v9, 2 }
 0x303   : > { %3746 = vst.msk [vmem:[#allocation4 + $0x40] sm:$0xff] %vm3736_vm4, %v12388_v0  ;;  %3748 = vst.msk [vmem:[#allocation4 + $0x50] sm:$0xff] %vm3736_vm4, %v12388_v0  ;;  %v7946_v17 = vld [vmem:[%s9554_s0 + $0x138] sm:$0x1]  ;;  %v5294_v18 = vsel %vm645_vm0, %v5292_v16, %v5293_v59  ;;  %v5509_v43 = vrot.slane %v11225_v61, 2  ;;  %v5510_v33 = vrot.slane %v11228_v11, 2  ;;  %v5837_v2 = vadd.f32 %v5769_v55, %v5621_v4 }
 0x304   : > { %3750 = vst.msk [vmem:[#allocation4 + $0x60] sm:$0xff] %vm3736_vm4, %v12388_v0  ;;  %3752 = vst.msk [vmem:[#allocation4 + $0x70] sm:$0xff] %vm3736_vm4, %v12388_v0  ;;  %v5838_v60 = vadd.f32 %v5772_v39, %v5622_v46  ;;  %v7944_v3 = vld [vmem:[%s9554_s0 + $0x128] sm:$0xfe]  ;;  %v7947_v15 = vld [vmem:[%s9554_s0 + $0x140] sm:$0x1]  ;;  %v6052_v45 = vadd.f32 %v5982_v50, %v5836_v20  ;;  %v5297_v49 = vsel %vm645_vm0, %v5295_v13, %v5296_v10 }
 0x305   : > { %3754 = vst.msk [vmem:[#allocation4 + $0x80] sm:$0xff] %vm3736_vm4, %v12388_v0  ;;  %3756 = vst.msk [vmem:[#allocation4 + $0x90] sm:$0xff] %vm3736_vm4, %v12388_v0  ;;  %v5298_v34 = vrot.slane %v5183_v1, 1  ;;  %v5299_v19 = vrot.slane %v5186_v47, 1  ;;  %v5399_v22 = vld [vmem:[%s9554_s0 + $0x100] sm:$0xfc]  ;;  %v5985_v61 = vsel %vm5463_vm3, %v5983_v53, %v5984_v51  ;;  %v5358_v11 = vadd.f32 %v11130_v44, %v5294_v18 }
 0x306   : > { %3745 = vst.msk [vmem:[#allocation4 + $0x38] sm:$0x3] %vm3738_vm5, %v12388_v0  ;;  %3739 = vst.msk [vmem:[#allocation4 + $0x8] sm:$0x3] %vm3738_vm5, %v12388_v0  ;;  %v5402_v9 = vld [vmem:[%s9554_s0 + $0x118] sm:$0x3]  ;;  %v5988_v39 = vsel %vm5463_vm3, %v5986_v37, %v5987_v38  ;;  %v5511_v13 = vsel %vm5463_vm3, %v5509_v43, %v5510_v33  ;;  %v5359_v50 = vadd.f32 %v11136_v58, %v5297_v49 }
 0x307   : > { %3741 = vst.msk [vmem:[#allocation4 + $0x18] sm:$0x3] %vm3738_vm5, %v12388_v0  ;;  %3743 = vst.msk [vmem:[#allocation4 + $0x28] sm:$0x3] %vm3738_vm5, %v12388_v0  ;;  %v5512_v16 = vrot.slane %v5398_v52, 2  ;;  %v5513_v59 = vrot.slane %v5401_v6, 2  ;;  %v11322_v6 = vmul.f32 %v11270_v12, %v11200_v41  ;;  %v6053_v38 = vadd.f32 %v5985_v61, %v5837_v2 }
 0x308   : > { %3747 = vst.msk [vmem:[#allocation4 + $0x48] sm:$0x3] %vm3738_vm5, %v12388_v0  ;;  %3749 = vst.msk [vmem:[#allocation4 + $0x58] sm:$0x3] %vm3738_vm5, %v12388_v0  ;;  %v11301_v4 = vld [vmem:[%s9554_s0 + $0x130] sm:$0xfe] }
 0x309   : > { %3751 = vst.msk [vmem:[#allocation4 + $0x68] sm:$0x3] %vm3738_vm5, %v12388_v0  ;;  %3753 = vst.msk [vmem:[#allocation4 + $0x78] sm:$0x3] %vm3738_vm5, %v12388_v0  ;;  %v6245_v46 = vrot.slane %v11274_v36, 1  ;;  %v6246_v55 = vrot.slane %v7946_v17, 1  ;;  %v5300_v36 = vsel %vm645_vm0, %v5298_v34, %v5299_v19  ;;  %v5514_v58 = vsel %vm5463_vm3, %v5512_v16, %v5513_v59 }
 0x30a   : > { %3755 = vst.msk [vmem:[#allocation4 + $0x88] sm:$0x3] %vm3738_vm5, %v12388_v0  ;;  %3757 = vst.msk [vmem:[#allocation4 + $0x98] sm:$0x3] %vm3738_vm5, %v12388_v0  ;;  %v11298_v0 = vld [vmem:[%s9554_s0 + $0x120] sm:$0xff]  ;;  %v6248_v1 = vrot.slane %v7944_v3, 1  ;;  %v6054_v3 = vadd.f32 %v5988_v39, %v5838_v60  ;;  %v5575_v19 = vadd.f32 %v5511_v13, %v5358_v11  ;;  %v5576_v11 = vadd.f32 %v5514_v58, %v5359_v50 }
 0x30b   : > { %v11307_v20 = vld [vmem:[%s9554_s0 + $0x148] sm:$0x1]  ;;  %v6249_v53 = vrot.slane %v7947_v15, 1  ;;  %v11310_v47 = vld [vmem:[%s9554_s0 + $0x120] sm:$0xfc]  ;;  %v5515_v44 = vrot.slane %v5399_v22, 2  ;;  %v6101_v17 = vadd.f32 %v11298_v0, %v6052_v45  ;;  %v6247_v59 = vsel %vm645_vm0, %v6245_v46, %v6246_v55 }
 0x30c   : > { %v11314_v10 = vld [vmem:[%s9554_s0 + $0x128] sm:$0xfc]  ;;  %v5516_v51 = vrot.slane %v5402_v9, 2  ;;  %v7829_v37 = vld [vmem:[%s9554_s0 + $0x120] sm:$0xfe]  ;;  %v6251_v15 = vrot.slane %v11301_v4, 1  ;;  %v5360_v9 = vadd.f32 %v11156_v7, %v5300_v36 }
 0x30d   : > { %v7832_v52 = vld [vmem:[%s9554_s0 + $0x138] sm:$0x1]  ;;  %v11326_v18 = vld [vmem:[%s9554_s0 + $0x130] sm:$0xfc]  ;;  %v7995_v33 = vld [vmem:[%s9554_s0 + $0x140] sm:$0x3]  ;;  %v6250_v61 = vsel %vm645_vm0, %v6248_v1, %v6249_v53  ;;  %v5623_v1 = vadd.f32 %v11298_v0, %v5575_v19 }
 0x30e   : > { %12390 = vst [vmem:[#allocation19_spill] sm:$0xff] %v11326_v18  ;;  %v7994_v43 = vld [vmem:[%s9554_s0 + $0x138] sm:$0x3]  ;;  %v6252_v34 = vrot.slane %v11307_v20, 1  ;;  %v7830_v41 = vld [vmem:[%s9554_s0 + $0x128] sm:$0xfe]  ;;  %v5517_v4 = vsel %vm5463_vm3, %v5515_v44, %v5516_v51 }
 0x30f   : > { %v7833_v49 = vld [vmem:[%s9554_s0 + $0x140] sm:$0x1]  ;;  %v11336_v2 = vld [vmem:[%s9554_s0 + $0x128] sm:$0xff]  ;;  %v6461_v22 = vrot.slane %v11310_v47, 2  ;;  %v5773_v60 = vrot.slane %v7829_v37, 1  ;;  %v5774_v16 = vrot.slane %v7832_v52, 1  ;;  %v5577_v44 = vadd.f32 %v5517_v4, %v5360_v9 }
 0x310   : > { %v11339_v45 = vld [vmem:[%s9554_s0 + $0x148] sm:$0x3]  ;;  %v7831_v39 = vld [vmem:[%s9554_s0 + $0x130] sm:$0xfe]  ;;  %v7877_v20 = vld [vmem:[%s9554_s0 + $0x120] sm:$0xfc]  ;;  %v6102_v37 = vadd.f32 %v11336_v2, %v6053_v38 }
 0x311   : > { %12391 = vst [vmem:[#allocation20_spill] sm:$0xff] %v11339_v45  ;;  %v7880_v13 = vld [vmem:[%s9554_s0 + $0x138] sm:$0x3]  ;;  %v6462_v27 = vrot.slane %v7994_v43, 2  ;;  %v6464_v47 = vrot.slane %v11314_v10, 2  ;;  %v5776_v7 = vrot.slane %v7830_v41, 1  ;;  %v5775_v51 = vsel %vm645_vm0, %v5773_v60, %v5774_v16 }
 0x312   : > { %v5777_v36 = vrot.slane %v7833_v49, 1  ;;  %v6465_v46 = vrot.slane %v7995_v33, 2  ;;  %v7878_v53 = vld [vmem:[%s9554_s0 + $0x128] sm:$0xfc]  ;;  %v7881_v50 = vld [vmem:[%s9554_s0 + $0x140] sm:$0x3]  ;;  %v5624_v33 = vadd.f32 %v11336_v2, %v5576_v11  ;;  %v6317_v41 = vadd.f32 %v6247_v59, %v6101_v17 }
 0x313   : > { %v5989_v52 = vrot.slane %v7877_v20, 2  ;;  %v5990_v43 = vrot.slane %v7880_v13, 2  ;;  %v11358_v10 = vld [vmem:[%s9554_s0 + $0x130] sm:$0xff]  ;;  %v5779_v58 = vrot.slane %v7831_v39, 1  ;;  %v5780_v19 = vrot.slane %v7834_v8, 1 }
 0x314   : > { %v5778_v49 = vsel %vm645_vm0, %v5776_v7, %v5777_v36  ;;  %v7879_v9 = vld [vmem:[%s9554_s0 + $0x130] sm:$0xfc]  ;;  %v7882_v60 = vld [vmem:[%s9554_s0 + $0x148] sm:$0x3]  ;;  %v5992_v16 = vrot.slane %v7878_v53, 2  ;;  %v5993_v4 = vrot.slane %v7881_v50, 2  ;;  %v11366_v20 = vadd.f32 %v11358_v10, %v6054_v3 }
 0x315   : > { %v6318_v13 = vadd.f32 %v6250_v61, %v6102_v37  ;;  %v6463_v11 = vsel %vm5463_vm3, %v6461_v22, %v6462_v27  ;;  %v5839_v55 = vadd.f32 %v5775_v51, %v5623_v1  ;;  %v11370_v39 = vld [vmem:[%s9554_s0 + $0x150] sm:$0xfe]  ;;  %v11373_v8 = vld [vmem:[%s9554_s0 + $0x158] sm:$0xfe]  ;;  %v7952_v17 = vld [vmem:[%s9554_s0 + $0x168] sm:$0x1]  ;;  %v11379_v36 = vsel %vm645_vm0, %v6251_v15, %v6252_v34 }
 0x316   : > { %12392 = vst [vmem:[#allocation21_spill] sm:$0xff] %v11366_v20  ;;  %v5187_v59 = vld [vmem:[%s9554_s0 + $0x120] sm:$0xfe]  ;;  %v5190_v7 = vld [vmem:[%s9554_s0 + $0x138] sm:$0x1]  ;;  %12393 = vst [vmem:[#allocation22_spill] sm:$0xff] %v11379_v36  ;;  %v6466_v3 = vsel %vm5463_vm3, %v6464_v47, %v6465_v46  ;;  %v5625_v61 = vadd.f32 %v11358_v10, %v5577_v44  ;;  %v5991_v27 = vsel %vm5463_vm3, %v5989_v52, %v5990_v43 }
 0x317   : > { %v5188_v22 = vld [vmem:[%s9554_s0 + $0x128] sm:$0xfe]  ;;  %v5189_v37 = vld [vmem:[%s9554_s0 + $0x130] sm:$0xfe]  ;;  %v5191_v1 = vld [vmem:[%s9554_s0 + $0x140] sm:$0x1]  ;;  %v5781_v53 = vsel %vm645_vm0, %v5779_v58, %v5780_v19  ;;  %v5840_v50 = vadd.f32 %v5778_v49, %v5624_v33  ;;  %v6533_v47 = vadd.f32 %v6463_v11, %v6317_v41  ;;  %v5994_v46 = vsel %vm5463_vm3, %v5992_v16, %v5993_v4 }
 0x318   : > { %v5995_v51 = vrot.slane %v7879_v9, 2  ;;  %v5996_v38 = vrot.slane %v7882_v60, 2  ;;  %v5192_v15 = vld [vmem:[%s9554_s0 + $0x148] sm:$0x1]  ;;  %v5403_v34 = vld [vmem:[%s9554_s0 + $0x120] sm:$0xfc]  ;;  %v11400_v58 = vadd.f32 %v6466_v3, %v6318_v13  ;;  %v6055_v19 = vadd.f32 %v5991_v27, %v5839_v55 }
 0x319   : > { %v5301_v44 = vrot.slane %v5187_v59, 1  ;;  %v5302_v52 = vrot.slane %v5190_v7, 1  ;;  %v11395_v43 = vld [vmem:[%s9554_s0 + $0x128] sm:$0xfc]  ;;  %v9249_v33 = vld [vmem:[%s12314_s13 + $0x40] sm:$0xff]   ;;  %v5304_v9 = vrot.slane %v5188_v22, 1  ;;  %v5841_v4 = vadd.f32 %v5781_v53, %v5625_v61 }
 0x31a   : > { %v11403_v49 = vld [vmem:[%s9554_s0 + $0x150] sm:$0xfc]  ;;  %v5305_v41 = vrot.slane %v5191_v1, 1  ;;  %v5406_v60 = vld [vmem:[%s9554_s0 + $0x138] sm:$0x3]  ;;  %v9250_v16 = vld [vmem:[%s12314_s13] sm:$0xff]   ;;  %8278 = vmatprep.subr.bf16.mxu0 %v9249_v33  ;;  %v5997_v3 = vsel %vm5463_vm3, %v5995_v51, %v5996_v38  ;;  %v6056_v27 = vadd.f32 %v5994_v46, %v5840_v50  ;;  %v11424_v50 = vpop.permute.xlu1 %6575 }
 0x31b   : > { %v11410_v11 = vld [vmem:[%s9554_s0 + $0x150] sm:$0xff]  ;;  %v6254_v59 = vrot.slane %v11370_v39, 1  ;;  %v6255_v13 = vrot.slane %v7952_v17, 1  ;;  %v6257_v7 = vrot.slane %v11373_v8, 1  ;;  %v5407_v55 = vld [vmem:[%s9554_s0 + $0x140] sm:$0x3]  ;;  %8279 = vmatpush3.bf16.msra.mxu0 %v9250_v16  ;;  %v5303_v39 = vsel %vm645_vm0, %v5301_v44, %v5302_v52 }
 0x31c   : > { %v8000_v22 = vld [vmem:[%s9554_s0 + $0x168] sm:$0x3]  ;;  %v5307_v1 = vrot.slane %v5189_v37, 1  ;;  %v5308_v40 = vrot.slane %v5192_v15, 1  ;;  %v5405_v18 = vld [vmem:[%s9554_s0 + $0x130] sm:$0xfc]  ;;  %v6104_v37 = vadd.f32 %v11410_v11, %v6055_v19  ;;  %v11436_v44 = vmul.f32 %v11424_v50, %v6533_v47 }
 0x31d   : > { %v6258_v61 = vrot.slane %v11389_v23, 1  ;;  %v5408_v17 = vld [vmem:[%s9554_s0 + $0x148] sm:$0x3]  ;;  %v5518_v53 = vrot.slane %v5403_v34, 2  ;;  %v5519_v8 = vrot.slane %v5406_v60, 2  ;;  %12394 = vst [vmem:[#allocation23_spill] sm:$0xff] %v11424_v50  ;;  %v5306_v23 = vsel %vm645_vm0, %v5304_v9, %v5305_v41 }
 0x31e   : > { %v9252_v38 = vld [vmem:[%s12314_s13 + $0x48] sm:$0xff]   ;;  %v11428_v51 = vld [vmem:[%s9554_s0 + $0x160] sm:$0xfe]  ;;  %v5521_v15 = vrot.slane %v11395_v43, 2  ;;  %v5522_v46 = vrot.slane %v5407_v55, 2  ;;  %v11439_v52 = vld [vmem:[%s9554_s0 + $0x158] sm:$0xff]  ;;  %v6256_v33 = vsel %vm645_vm0, %v6254_v59, %v6255_v13  ;;  %v5309_v16 = vsel %vm645_vm0, %v5307_v1, %v5308_v40 }
 0x31f   : > { %v9253_v34 = vld [vmem:[%s12314_s13 + $0x8] sm:$0xff]   ;;  %v7998_v19 = vld [vmem:[%s9554_s0 + $0x158] sm:$0xfc]  ;;  %v6470_v60 = vrot.slane %v11403_v49, 2  ;;  %v6471_v9 = vrot.slane %v8000_v22, 2  ;;  %8280 = vmatprep.subr.bf16.mxu0 %v9252_v38  ;;  %v5361_v55 = vadd.f32 %v11298_v0, %v5303_v39  ;;  %v5524_v47 = vrot.slane %v5405_v18, 2 }
 0x320   : > { %v11445_v43 = vld [vmem:[%s9554_s0 + $0x178] sm:$0x1]  ;;  %v8001_v41 = vld [vmem:[%s9554_s0 + $0x170] sm:$0x3]  ;;  %v5525_v45 = vrot.slane %v5408_v17, 2  ;;  %8281 = vmatpush3.bf16.msra.mxu0 %v9253_v34  ;;  %v11451_v59 = vadd.f32 %v5997_v3, %v5841_v4  ;;  %v5362_v13 = vadd.f32 %v11336_v2, %v5306_v23  ;;  %v5520_v22 = vsel %vm5463_vm3, %v5518_v53, %v5519_v8 }
 0x321   : > { %v7835_v12 = vld [vmem:[%s9554_s0 + $0x150] sm:$0xfe]  ;;  %v7836_v38 = vld [vmem:[%s9554_s0 + $0x158] sm:$0xfe]  ;;  %v7838_v40 = vld [vmem:[%s9554_s0 + $0x168] sm:$0x1]  ;;  %v6105_v18 = vadd.f32 %v11439_v52, %v6056_v27  ;;  %v6259_v4 = vsel %vm645_vm0, %v6257_v7, %v6258_v61  ;;  %v6320_v3 = vadd.f32 %v6256_v33, %v6104_v37  ;;  %v5523_v1 = vsel %vm5463_vm3, %v5521_v15, %v5522_v46 }
 0x322   : > { %v9255_v0 = vld [vmem:[%s12314_s13 + $0x50] sm:$0xff]   ;;  %v5194_v2 = vld [vmem:[%s9554_s0 + $0x158] sm:$0xfe]  ;;  %v6472_v53 = vsel %vm5463_vm3, %v6470_v60, %v6471_v9  ;;  %v6473_v8 = vrot.slane %v7998_v19, 2  ;;  %v6474_v23 = vrot.slane %v8001_v41, 2  ;;  %v5363_v27 = vadd.f32 %v11358_v10, %v5309_v16 }
 0x323   : > { %v5197_v39 = vld [vmem:[%s9554_s0 + $0x170] sm:$0x1]  ;;  %v11472_v7 = vld [vmem:[%s9554_s0 + $0x160] sm:$0xfe]  ;;  %v11476_v37 = vld [vmem:[%s9554_s0 + $0x178] sm:$0x1]  ;;  %8282 = vmatprep.subr.bf16.mxu0 %v9255_v0  ;;  %v5526_v15 = vsel %vm5463_vm3, %v5524_v47, %v5525_v45  ;;  %v5578_v46 = vadd.f32 %v5520_v22, %v5361_v55  ;;  %v5579_v10 = vadd.f32 %v5523_v1, %v5362_v13  ;;  %v6321_v45 = vadd.f32 %v6259_v4, %v6105_v18 }
 0x324   : > { %v9256_v17 = vld [vmem:[%s12314_s13 + $0x10] sm:$0xff]   ;;  %v5782_v34 = vrot.slane %v7835_v12, 1  ;;  %v5783_v33 = vrot.slane %v7838_v40, 1  ;;  %v5196_v19 = vld [vmem:[%s9554_s0 + $0x168] sm:$0x1]  ;;  %v6261_v9 = vrot.slane %v11445_v43, 1  ;;  %v6536_v55 = vadd.f32 %v6472_v53, %v6320_v3 }
 0x325   : > { %v7839_v61 = vld [vmem:[%s9554_s0 + $0x170] sm:$0x1]  ;;  %v5193_v60 = vld [vmem:[%s9554_s0 + $0x150] sm:$0xfe]  ;;  %8283 = vmatpush3.bf16.msra.mxu0 %v9256_v17  ;;  %v7884_v16 = vld [vmem:[%s9554_s0 + $0x158] sm:$0xfc]  ;;  %v6475_v40 = vsel %vm5463_vm3, %v6473_v8, %v6474_v23  ;;  %v5580_v1 = vadd.f32 %v5526_v15, %v5363_v27  ;;  %v5626_v18 = vadd.f32 %v11410_v11, %v5578_v46  ;;  %v5627_v8 = vadd.f32 %v11439_v52, %v5579_v10 }
 0x326   : > { %v11483_v41 = vld [vmem:[%s9554_s0 + $0x150] sm:$0xfc]  ;;  %v5313_v49 = vrot.slane %v5194_v2, 1  ;;  %v5314_v21 = vrot.slane %v5197_v39, 1  ;;  %v5410_v0 = vld [vmem:[%s9554_s0 + $0x158] sm:$0xfc]  ;;  %v5784_v4 = vsel %vm645_vm0, %v5782_v34, %v5783_v33 }
 0x327   : > { %v9258_v12 = vld [vmem:[%s12314_s13 + $0x58] sm:$0xff]   ;;  %v5785_v47 = vrot.slane %v7836_v38, 1  ;;  %v5786_v22 = vrot.slane %v7839_v61, 1  ;;  %v5413_v43 = vld [vmem:[%s9554_s0 + $0x170] sm:$0x3]  ;;  %v5310_v17 = vrot.slane %v5193_v60, 1 }
 0x328   : > { %v9259_v13 = vld [vmem:[%s12314_s13 + $0x18] sm:$0xff]   ;;  %v7886_v2 = vld [vmem:[%s9554_s0 + $0x168] sm:$0x3]  ;;  %v7887_v39 = vld [vmem:[%s9554_s0 + $0x170] sm:$0x3]  ;;  %v5311_v36 = vrot.slane %v5196_v19, 1  ;;  %8284 = vmatprep.subr.bf16.mxu0 %v9258_v12  ;;  %v5315_v23 = vsel %vm645_vm0, %v5313_v49, %v5314_v21 }
 0x329   : > { %v5788_v38 = vrot.slane %v11472_v7, 1  ;;  %v5789_v3 = vrot.slane %v11476_v37, 1  ;;  %v5409_v53 = vld [vmem:[%s9554_s0 + $0x150] sm:$0xfc]  ;;  %v5412_v61 = vld [vmem:[%s9554_s0 + $0x168] sm:$0x3]  ;;  %8285 = vmatpush3.bf16.msra.mxu0 %v9259_v13  ;;  %v5787_v34 = vsel %vm645_vm0, %v5785_v47, %v5786_v22 }
 0x32a   : > { %v5530_v27 = vrot.slane %v5410_v0, 2  ;;  %v5531_v15 = vrot.slane %v5413_v43, 2  ;;  %v9261_v46 = vld [vmem:[%s12314_s13 + $0x60] sm:$0xff]   ;;  %v5998_v7 = vrot.slane %v11483_v41, 2  ;;  %v6001_v37 = vrot.slane %v7884_v16, 2 }
 0x32b   : > { %v6002_v33 = vrot.slane %v7887_v39, 2  ;;  %v9262_v60 = vld [vmem:[%s12314_s13 + $0x20] sm:$0xff]   ;;  %v5999_v21 = vrot.slane %v7886_v2, 2  ;;  %v5312_v49 = vsel %vm645_vm0, %v5310_v17, %v5311_v36  ;;  %v5527_v10 = vrot.slane %v5409_v53, 2  ;;  %8286 = vmatprep.subr.bf16.mxu0 %v9261_v46  ;;  %v11530_v22 = vld [vmem:[%s9554_s0 + $0x178] sm:$0x3] }
 0x32c   : > { %v11514_v19 = vld [vmem:[%s9554_s0 + $0x160] sm:$0xff]  ;;  %v5528_v0 = vrot.slane %v5412_v61, 2  ;;  %v11519_v41 = vmul.f32 %v11424_v50, %v11400_v58  ;;  %v5365_v36 = vadd.f32 %v11439_v52, %v5315_v23  ;;  %v12396_v43 = vrot.slane %v11428_v51, 1  ;;  %v5198_v17 = vld [vmem:[%s9554_s0 + $0x178] sm:$0x1]  ;;  %v9264_v51 = vld [vmem:[%s12314_s13 + $0x68] sm:$0xff]  }
 0x32d   : > { %v11523_v16 = vadd.f32 %v11514_v19, %v11451_v59  ;;  %v5628_v12 = vadd.f32 %v11514_v19, %v5580_v1  ;;  %v11527_v47 = vld [vmem:[%s9554_s0 + $0x160] sm:$0xfc]  ;;  %8287 = vmatpush3.bf16.msra.mxu0 %v9262_v60  ;;  %v5790_v59 = vsel %vm645_vm0, %v5788_v38, %v5789_v3  ;;  %v5843_v13 = vadd.f32 %v5787_v34, %v5627_v8  ;;  %v11540_v1 = vld [vmem:[%s9554_s0 + $0x188] sm:$0xfe]  ;;  %v11543_v2 = vld [vmem:[%s9554_s0 + $0x1a0] sm:$0x1]  ;;  %v11553_v38 = vpop.permute.xlu0 %6580 }
 0x32e   : > { %v11536_v58 = vsel %vm645_vm0, %v12396_v43, %v6261_v9  ;;  %v5195_v39 = vld [vmem:[%s9554_s0 + $0x160] sm:$0xfe]  ;;  %v5532_v52 = vsel %vm5463_vm3, %v5530_v27, %v5531_v15  ;;  %v11551_v9 = vadd.f32 %v6475_v40, %v6321_v45  ;;  %v5842_v3 = vadd.f32 %v5784_v4, %v5626_v18  ;;  %v11560_v8 = vld [vmem:[%s9554_s0 + $0x198] sm:$0x1]  ;;  %v7842_v27 = vld [vmem:[%s9554_s0 + $0x188] sm:$0xfe]  ;;  %8288 = vmatprep.subr.bf16.mxu0 %v9264_v51 }
 0x32f   : > { %12395 = vst [vmem:[#allocation24_spill] sm:$0xff] %v11523_v16  ;;  %12397 = vst [vmem:[#allocation25_spill] sm:$0xff] %v11536_v58  ;;  %v6003_v53 = vsel %vm5463_vm3, %v6001_v37, %v6002_v33  ;;  %v11557_v61 = vld [vmem:[%s9554_s0 + $0x180] sm:$0xfe]  ;;  %v5364_v23 = vadd.f32 %v11410_v11, %v5312_v49  ;;  %v7845_v15 = vld [vmem:[%s9554_s0 + $0x1a0] sm:$0x1]  ;;  %v11569_v40 = vmul.f32 %v11553_v38, %v6536_v55 }
 0x330   : > { %v9265_v45 = vld [vmem:[%s12314_s13 + $0x28] sm:$0xff]   ;;  %v6000_v18 = vsel %vm5463_vm3, %v5998_v7, %v5999_v21  ;;  %v11575_v34 = vld [vmem:[%s9554_s0 + $0x160] sm:$0xfc]  ;;  %v5414_v11 = vld [vmem:[%s9554_s0 + $0x178] sm:$0x3]  ;;  %v5529_v37 = vsel %vm5463_vm3, %v5527_v10, %v5528_v0  ;;  %v11580_v33 = vadd.f32 %v5790_v59, %v5628_v12  ;;  %v5316_v60 = vrot.slane %v5195_v39, 1 }
 0x331   : > { %v7914_v46 = vld [vmem:[%s9554_s0 + $0x188] sm:$0xff]  ;;  %v5317_v55 = vrot.slane %v5198_v17, 1  ;;  %v5582_v49 = vadd.f32 %v5532_v52, %v5365_v36  ;;  %v7841_v7 = vld [vmem:[%s9554_s0 + $0x180] sm:$0xfe]  ;;  %v7844_v21 = vld [vmem:[%s9554_s0 + $0x198] sm:$0x1]  ;;  %8289 = vmatpush3.bf16.msra.mxu0 %v9265_v45  ;;  %v6059_v4 = vadd.f32 %v6003_v53, %v5843_v13  ;;  %v6058_v36 = vadd.f32 %v6000_v18, %v5842_v3 }
 0x332   : > { %v6005_v43 = vrot.slane %v11530_v22, 2  ;;  %v7913_v50 = vld [vmem:[%s9554_s0 + $0x180] sm:$0xff]  ;;  %v11587_v58 = vld [vmem:[%s9554_s0 + $0x188] sm:$0xfc]  ;;  %v5794_v10 = vrot.slane %v7842_v27, 1  ;;  %v5795_v0 = vrot.slane %v7845_v15, 1  ;;  %v5581_v17 = vadd.f32 %v5529_v37, %v5364_v23  ;;  %v11606_v27 = vpop.permute.xlu1 %6585 }
 0x333   : > { %v7890_v51 = vld [vmem:[%s9554_s0 + $0x188] sm:$0xfc]  ;;  %v9267_v12 = vld [vmem:[%s12314_s13 + $0x70] sm:$0xff]   ;;  %v6266_v59 = vrot.slane %v11540_v1, 1  ;;  %v6267_v39 = vrot.slane %v11543_v2, 1  ;;  %v6263_v52 = vrot.slane %v11557_v61, 1  ;;  %v5318_v23 = vsel %vm645_vm0, %v5316_v60, %v5317_v55 }
 0x334   : > { %v7893_v22 = vld [vmem:[%s9554_s0 + $0x1a0] sm:$0x3]  ;;  %v9268_v13 = vld [vmem:[%s12314_s13 + $0x30] sm:$0xff]   ;;  %v6264_v53 = vrot.slane %v11560_v8, 1  ;;  %v5791_v1 = vrot.slane %v7841_v7, 1  ;;  %v5792_v2 = vrot.slane %v7844_v21, 1  ;;  %8290 = vmatprep.subr.bf16.mxu0 %v9267_v12  ;;  %v5630_v18 = vadd.f32 %v7914_v46, %v5582_v49  ;;  %v11613_v7 = vpop.permute.xlu0 %6590 }
 0x335   : > { %v8007_v3 = vld [vmem:[%s9554_s0 + $0x1a0] sm:$0x3]  ;;  %v5533_v15 = vrot.slane %v11575_v34, 2  ;;  %v5534_v45 = vrot.slane %v5414_v11, 2  ;;  %v7889_v37 = vld [vmem:[%s9554_s0 + $0x180] sm:$0xfc]  ;;  %8291 = vmatpush3.bf16.msra.mxu0 %v9268_v13  ;;  %v6108_v61 = vadd.f32 %v7914_v46, %v6059_v4  ;;  %v5796_v8 = vsel %vm645_vm0, %v5794_v10, %v5795_v0 }
 0x336   : > { %v7892_v16 = vld [vmem:[%s9554_s0 + $0x198] sm:$0x3]  ;;  %v6010_v20 = vrot.slane %v7890_v51, 2  ;;  %v6011_v57 = vrot.slane %v7893_v22, 2  ;;  %v6268_v34 = vsel %vm645_vm0, %v6266_v59, %v6267_v39  ;;  %v8003_v11 = vld [vmem:[%s9554_s0 + $0x180] sm:$0xfc]  ;;  %v5629_v21 = vadd.f32 %v7913_v50, %v5581_v17 }
 0x337   : > { %v9270_v60 = vld [vmem:[%s12314_s13 + $0x78] sm:$0xff]   ;;  %v6482_v55 = vrot.slane %v11587_v58, 2  ;;  %v6483_v49 = vrot.slane %v8007_v3, 2  ;;  %v5366_v10 = vadd.f32 %v11514_v19, %v5318_v23  ;;  %v5793_v0 = vsel %vm645_vm0, %v5791_v1, %v5792_v2  ;;  %v11628_v59 = vld [vmem:[%s9554_s0 + $0x160] sm:$0xfc] }
 0x338   : > { %v9271_v4 = vld [vmem:[%s12314_s13 + $0x38] sm:$0xff]   ;;  %v6007_v51 = vrot.slane %v7889_v37, 2  ;;  %v6008_v12 = vrot.slane %v7892_v16, 2  ;;  %8292 = vmatprep.subr.bf16.mxu0 %v9270_v60  ;;  %v12398_v58 = vrot.slane %v11527_v47, 2  ;;  %v5535_v17 = vsel %vm5463_vm3, %v5533_v15, %v5534_v45  ;;  %v7843_v1 = vld [vmem:[%s9554_s0 + $0x190] sm:$0xfe] }
 0x339   : > { %v8006_v46 = vld [vmem:[%s9554_s0 + $0x198] sm:$0x3]  ;;  %v5846_v22 = vadd.f32 %v5796_v8, %v5630_v18  ;;  %8293 = vmatpush3.bf16.msra.mxu0 %v9271_v4  ;;  %v6618_v19 = vpack.c.bf16 %v10975_v56, %v11101_v26  ;;  %v6107_v13 = vadd.f32 %v7913_v50, %v6058_v36  ;;  %v6265_v16 = vsel %vm645_vm0, %v6263_v52, %v6264_v53  ;;  %v7846_v2 = vld [vmem:[%s9554_s0 + $0x1a8] sm:$0x1]  ;;  %v9273_v23 = vld [vmem:[%s12314_s13 + $0x80] sm:$0xff]  }
 0x33a   : > { %v6006_v39 = vsel %vm5463_vm3, %v12398_v58, %v6005_v43  ;;  %v6479_v3 = vrot.slane %v8003_v11, 2  ;;  %v6012_v47 = vsel %vm5463_vm3, %v6010_v20, %v6011_v57  ;;  %v11640_v43 = vpop.permute.xlu1 %7001  ;;  %v6324_v15 = vadd.f32 %v6268_v34, %v6108_v61  ;;  %v7962_v56 = vld [vmem:[%s9554_s0 + $0x1b8] sm:$0xfe]  ;;  %v7965_v26 = vld [vmem:[%s9554_s0 + $0x1d0] sm:$0x1]  ;;  %8798 = vmatprep.subr.bf16.mxu0 %v9273_v23 }
 0x33b   : > { %v6480_v45 = vrot.slane %v8006_v46, 2  ;;  %v5845_v18 = vadd.f32 %v5793_v0, %v5629_v21  ;;  %v12399_v50 = vmax.f32 %v10126_v42, 0.0  ;;  %6853 = vmatprep.mubr.bf16.mxu0 %v6618_v19  ;;  %v6476_v57 = vrot.slane %v11628_v59, 2  ;;  %v11653_v20 = vld [vmem:[%s9554_s0 + $0x190] sm:$0xff]  ;;  %v11661_v42 = vpop.permute.xlu0 %7003  ;;  %v8010_v58 = vld [vmem:[%s9554_s0 + $0x1b8] sm:$0xfc] }
 0x33c   : > { %v6484_v52 = vsel %vm5463_vm3, %v6482_v55, %v6483_v49  ;;  %v5583_v53 = vadd.f32 %v5535_v17, %v5366_v10  ;;  %v6009_v37 = vsel %vm5463_vm3, %v6007_v51, %v6008_v12  ;;  %v12400_v61 = vpack.c.bf16 %v10972_v48, %v11069_v14  ;;  %v7961_v11 = vld [vmem:[%s9554_s0 + $0x1b0] sm:$0xfe]  ;;  %v7964_v55 = vld [vmem:[%s9554_s0 + $0x1c8] sm:$0x1]  ;;  %v7917_v14 = vld [vmem:[%s9554_s0 + $0x1b8] sm:$0xff] }
 0x33d   : > { %v7087_v36 = vsel %vm3736_vm4, %v12399_v50, %v11640_v43  ;;  %v5797_v8 = vrot.slane %v7843_v1, 1  ;;  %v5798_v60 = vrot.slane %v7846_v2, 1  ;;  %v6062_v34 = vadd.f32 %v6012_v47, %v5846_v22  ;;  %v11710_v47 = vld [vmem:[%s12309_s8] ss:$0 sm:$0xff] }
 0x33e   : > { %7116 = vst [vmem:[%s11658_s19 + $0x30] sm:$0xff] %v7087_v36  ;;  %6854 = vmatmul.mubr.bf16.vlgmr.msra.gmra.mrb[32].mxu0 %v12400_v61  ;;  %v12401_v49 = vmax.f32 %v10131_v54, 0.0  ;;  %v11674_v4 = vmul.f32 %v11553_v38, %v11551_v9  ;;  %v11677_v48 = vadd.f32 %v6006_v39, %v11580_v33  ;;  %v6275_v46 = vrot.slane %v7962_v56, 1  ;;  %v11681_v0 = vpop.permute.xlu1 %6997  ;;  %v9275_v54 = vld [vmem:[%s12314_s13 + $0x88] sm:$0xff]   ;;  %v7916_v33 = vld [vmem:[%s9554_s0 + $0x1b0] sm:$0xff]  ;;  %v9303_v59 = vld [vmem:[%s12311_s10] sm:$0xff]  }
 0x33f   : > { %8799 = vmatpush3.bf16.msra.mxu0 %v9273_v23  ;;  %v6276_v10 = vrot.slane %v7965_v26, 1  ;;  %v11686_v51 = vadd.f32 %v6265_v16, %v6107_v13  ;;  %v11689_v9 = vsel %vm5463_vm3, %v6479_v3, %v6480_v45  ;;  %v6061_v12 = vadd.f32 %v6009_v37, %v5845_v18  ;;  %v8013_v39 = vld [vmem:[%s9554_s0 + $0x1d0] sm:$0x3]  ;;  %v11702_v13 = vld [vmem:[%s9554_s0 + $0x190] sm:$0xfc]  ;;  %v11705_v2 = vpop.permute.xlu0 %6999  ;;  %v8612_v37 = vpop.f32.mrb[24].mxu0 }
 0x340   : > { %v7088_v21 = vsel %vm3736_vm4, %v12401_v49, %v11661_v42  ;;  %v12402_v17 = vmax.f32 %v10110_v29, 0.0  ;;  %v11698_v19 = vadd.f32 %v6484_v52, %v6324_v15  ;;  %v5631_v1 = vadd.f32 %v11653_v20, %v5583_v53  ;;  %8800 = vmatprep.subr.bf16.mxu0 %v9275_v54  ;;  %v8009_v15 = vld [vmem:[%s9554_s0 + $0x1b0] sm:$0xfc]  ;;  %v8012_v45 = vld [vmem:[%s9554_s0 + $0x1c8] sm:$0x3]  ;;  %v3659_v49 = vpop.f32.mrb[25].mxu0 }
 0x341   : > { %7119 = vst [vmem:[%s11658_s19 + $0x48] sm:$0xff] %v7088_v21  ;;  %v6272_v16 = vrot.slane %v7961_v11, 1  ;;  %v6273_v3 = vrot.slane %v7964_v55, 1  ;;  %v5799_v29 = vsel %vm645_vm0, %v5797_v8, %v5798_v60  ;;  %v6111_v23 = vadd.f32 %v7917_v14, %v6062_v34  ;;  %v11728_v61 = vld [vmem:[%s12310_s9] ss:$0 sm:$0xff] }
 0x342   : > { %v7085_v22 = vsel %vm3736_vm4, %v12402_v17, %v11681_v0  ;;  %v12403_v18 = vmax.f32 %v10115_v35, 0.0  ;;  %v6621_v26 = vpack.c.bf16 %v11322_v6, %v11186_v63  ;;  %v6277_v50 = vsel %vm645_vm0, %v6275_v46, %v6276_v10  ;;  %v11723_v53 = vpop.permute.xlu1 %7009  ;;  %v9277_v63 = vld [vmem:[%s12314_s13 + $0x90] sm:$0xff]   ;;  %v7894_v6 = vld [vmem:[%s9554_s0 + $0x1a8] sm:$0x3]  ;;  %v8613_v10 = vpop.f32.mrb[26].mxu0 }
 0x343   : > { %7110 = vst [vmem:[%s11658_s19] sm:$0xff] %v7085_v22  ;;  %8801 = vmatpush3.bf16.msra.mxu0 %v9275_v54  ;;  %v6491_v36 = vrot.slane %v8010_v58, 2  ;;  %v6492_v52 = vrot.slane %v8013_v39, 2  ;;  %v6620_v35 = vpack.c.bf16 %v11279_v31, %v11167_v62  ;;  %v6013_v8 = vrot.slane %v11702_v13, 2  ;;  %v11745_v46 = vpop.permute.xlu0 %7011  ;;  %v3662_v39 = vpop.f32.mrb[27].mxu0 }
 0x344   : > { %v7086_v56 = vsel %vm3736_vm4, %v12403_v18, %v11705_v2  ;;  %v6110_v60 = vadd.f32 %v7916_v33, %v6061_v12  ;;  %v12404_v34 = vmax.f32 %v10197_v30, 0.0  ;;  %v3707_v55 = vmul.f32 %v8612_v37, %v11710_v47  ;;  %6861 = vmatprep.mubr.bf16.mxu0 %v6621_v26  ;;  %8802 = vmatprep.subr.bf16.mxu0 %v9277_v63 }
 0x345   : > { %7113 = vst [vmem:[%s11658_s19 + $0x18] sm:$0xff] %v7086_v56  ;;  %v6274_v21 = vsel %vm645_vm0, %v6272_v16, %v6273_v3  ;;  %v6488_v62 = vrot.slane %v8009_v15, 2  ;;  %v6489_v31 = vrot.slane %v8012_v45, 2  ;;  %v3705_v14 = vmul.f32 %v11710_v47, %v3659_v49 }
 0x346   : > { %v7091_v11 = vsel %vm3736_vm4, %v12404_v34, %v11723_v53  ;;  %6862 = vmatmul.mubr.bf16.gmra.mrb[36].mxu0 %v6620_v35  ;;  %v6327_v30 = vadd.f32 %v6277_v50, %v6111_v23  ;;  %v3722_v54 = vadd.f32 %v11728_v61, %v3707_v55  ;;  %v12405_v12 = vmax.f32 %v10204_v5, 0.0  ;;  %v11757_v3 = vpop.permute.xlu1 %7005  ;;  %v9279_v5 = vld [vmem:[%s12314_s13 + $0x98] sm:$0xff]   ;;  %v7957_v50 = vld [vmem:[%s9554_s0 + $0x190] sm:$0xfe]  ;;  %v12407_v34 = vld [vmem:[#allocation14_spill] sm:$0xff] }
 0x347   : > { %7128 = vst [vmem:[%s11658_s19 + $0x90] sm:$0xff] %v7091_v11  ;;  %v3708_v58 = vmul.f32 %v8613_v10, %v11710_v47  ;;  %8803 = vmatpush3.bf16.msra.mxu0 %v9277_v63  ;;  %v6014_v17 = vrot.slane %v7894_v6, 2  ;;  %v6493_v22 = vsel %vm5463_vm3, %v6491_v36, %v6492_v52  ;;  %v3720_v13 = vadd.f32 %v11728_v61, %v3705_v14  ;;  %v11763_v23 = vld [vmem:[%s9554_s0 + $0x178] sm:$0x3]  ;;  %v11774_v63 = vpop.permute.xlu0 %7007  ;;  %v7960_v6 = vld [vmem:[%s9554_s0 + $0x1a8] sm:$0x1] }
 0x348   : > { %v7092_v33 = vsel %vm3736_vm4, %v12405_v12, %v11745_v46  ;;  %v3706_v16 = vmul.f32 %v11710_v47, %v3662_v39  ;;  %v6326_v15 = vadd.f32 %v6274_v21, %v6110_v60  ;;  %v3730_v45 = vmax.f32 %v3722_v54, 0.0  ;;  %8804 = vmatprep.subr.bf16.mxu0 %v9279_v5  ;;  %v9281_v14 = vld [vmem:[%s12314_s13 + $0xa0] sm:$0xff]  }
 0x349   : > { %7131 = vst [vmem:[%s11658_s19 + $0xa8] sm:$0xff] %v7092_v33  ;;  %v3723_v18 = vadd.f32 %v11728_v61, %v3708_v58  ;;  %v12406_v56 = vmax.f32 %v10150_v28, 0.0  ;;  %v5847_v36 = vadd.f32 %v5799_v29, %v5631_v1  ;;  %v6490_v52 = vsel %vm5463_vm3, %v6488_v62, %v6489_v31  ;;  %v8616_v62 = vpop.f32.mrb[28].mxu0  ;;  %v11808_v58 = vld [vmem:[%s9554_s0 + $0x190] sm:$0xfc] }
 0x34a   : > { %v3728_v37 = vmax.f32 %v3720_v13, 0.0  ;;  %v3721_v35 = vadd.f32 %v11728_v61, %v3706_v16  ;;  %v6543_v60 = vadd.f32 %v6493_v22, %v6327_v30  ;;  %3761 = vst.msk [vmem:[#allocation4 + $0x31] sm:$0xff] %vm3736_vm4, %v3730_v45  ;;  %v12408_v1 = vmax.f32 %v12407_v34, 0.0  ;;  %v7966_v30 = vld [vmem:[%s9554_s0 + $0x1d8] sm:$0x1]  ;;  %v3675_v12 = vpop.f32.mrb[29].mxu0 }
 0x34b   : > { %v7089_v26 = vsel %vm3736_vm4, %v12406_v56, %v11757_v3  ;;  %v3731_v28 = vmax.f32 %v3723_v18, 0.0  ;;  %8805 = vmatpush3.bf16.msra.mxu0 %v9279_v5  ;;  %v6624_v11 = vpack.c.bf16 %v11674_v4, %v11519_v41  ;;  %v6477_v55 = vrot.slane %v11763_v23, 2  ;;  %v7963_v4 = vld [vmem:[%s9554_s0 + $0x1c0] sm:$0xfe]  ;;  %v8617_v33 = vpop.f32.mrb[30].mxu0  ;;  %v9283_v18 = vld [vmem:[%s12314_s13 + $0xa8] sm:$0xff]  }
 0x34c   : > { %7122 = vst [vmem:[%s11658_s19 + $0x60] sm:$0xff] %v7089_v26  ;;  %v7090_v29 = vsel %vm3736_vm4, %v12408_v1, %v11774_v63  ;;  %v6015_v49 = vsel %vm5463_vm3, %v6013_v8, %v6014_v17  ;;  %3759 = vst.msk [vmem:[#allocation4 + $0x11] sm:$0xff] %vm3736_vm4, %v3728_v37  ;;  %v3729_v21 = vmax.f32 %v3721_v35, 0.0  ;;  %v6623_v31 = vpack.c.bf16 %v11569_v40, %v11436_v44  ;;  %v3678_v22 = vpop.f32.mrb[31].mxu0  ;;  %v7918_v13 = vld [vmem:[%s9554_s0 + $0x1c0] sm:$0xff]  ;;  %v9233_v23 = vld [vmem:[%s12311_s10 + $0x10] sm:$0xff]  }
 0x34d   : > { %7125 = vst [vmem:[%s11658_s19 + $0x78] sm:$0xff] %v7090_v29  ;;  %v6269_v10 = vrot.slane %v7957_v50, 1  ;;  %v6539_v41 = vadd.f32 %v11689_v9, %v11686_v51  ;;  %v6542_v8 = vadd.f32 %v6490_v52, %v6326_v15  ;;  %3762 = vst.msk [vmem:[#allocation4 + $0x41] sm:$0xff] %vm3736_vm4, %v3731_v28  ;;  %v3711_v54 = vmul.f32 %v8616_v62, %v11710_v47  ;;  %v8011_v26 = vld [vmem:[%s9554_s0 + $0x1c0] sm:$0xfc] }
 0x34e   : > { %6869 = vmatprep.mubr.bf16.mxu0 %v6624_v11  ;;  %v11801_v44 = vadd.f32 %v11653_v20, %v11677_v48  ;;  %v6270_v40 = vrot.slane %v7960_v6, 1  ;;  %v6612_v51 = vmul.f32 %v11606_v27, %v11698_v19  ;;  %3760 = vst.msk [vmem:[#allocation4 + $0x21] sm:$0xff] %vm3736_vm4, %v3729_v21  ;;  %v3709_v9 = vmul.f32 %v11710_v47, %v3675_v12  ;;  %v11814_v19 = vld [vmem:[%s9554_s0 + $0x1a8] sm:$0x3] }
 0x34f   : > { %6870 = vmatmul.mubr.bf16.gmra.mrb[40].mxu0 %v6623_v31  ;;  %8806 = vmatprep.subr.bf16.mxu0 %v9281_v14  ;;  %v6063_v39 = vadd.f32 %v6015_v49, %v5847_v36  ;;  %v6615_v17 = vmul.f32 %v11613_v7, %v6543_v60  ;;  %v3726_v20 = vadd.f32 %v11728_v61, %v3711_v54  ;;  %v6278_v16 = vrot.slane %v7963_v4, 1  ;;  %v3791_v37 = vld [vmem:[#allocation4 + $0x1] sm:$0xff]  ;;  %v8014_v60 = vld [vmem:[%s9554_s0 + $0x1d8] sm:$0x3]  ;;  %s9308_s0 = sshll.u32 %s9373_s22, 4  ;;  %s9309_s0 = int_to_ptr.vmem [resolvable:$false] %s9308_s0 }
 0x350   : > { %v3712_v48 = vmul.f32 %v8617_v33, %v11710_v47  ;;  %8807 = vmatpush3.bf16.msra.mxu0 %v9281_v14  ;;  %v6279_v5 = vrot.slane %v7966_v30, 1  ;;  %v3724_v15 = vadd.f32 %v11728_v61, %v3709_v9  ;;  %v3710_v45 = vmul.f32 %v11710_v47, %v3678_v22  ;;  %v12409_v9 = vld [vmem:[#allocation16_spill] sm:$0xff]  ;;  %s9310_s2 = scalar_lea.vmem %s9309_s0, 6144  ;;  %p9311_p0 = scmp.lt.s32.totalorder %s12248_s17, %s9309_s0 }
 0x351   : > { %v6611_v56 = vmul.f32 %v11606_v27, %v6539_v41  ;;  %v6614_v50 = vmul.f32 %v11613_v7, %v6542_v8  ;;  %v3734_v36 = vmax.f32 %v3726_v20, 0.0  ;;  %v6271_v35 = vsel %vm645_vm0, %v6269_v10, %v6270_v40  ;;  %8808 = vmatprep.subr.bf16.mxu0 %v9283_v18  ;;  %v11834_v49 = vld [vmem:[#allocation4 + $0x31] sm:$0xff]  ;;  %p9312_p1 = scmp.lt.s32.totalorder %s9310_s2, %s9304_s21 }
 0x352   : > { %v3727_v52 = vadd.f32 %v11728_v61, %v3712_v48  ;;  %v6485_v6 = vrot.slane %v11808_v58, 2  ;;  %v3732_v28 = vmax.f32 %v3724_v15, 0.0  ;;  %v3725_v47 = vadd.f32 %v11728_v61, %v3710_v45  ;;  %v11841_v41 = vld [vmem:[#allocation4 + $0x32] sm:$0xff]  ;;  %v9232_v48 = vld [vmem:[%s12311_s10 + $0x8] sm:$0xff]  }
 0x353   : > { %v6486_v34 = vrot.slane %v11814_v19, 2  ;;  %v6112_v1 = vadd.f32 %v7918_v13, %v6063_v39  ;;  %3765 = vst.msk [vmem:[#allocation4 + $0x71] sm:$0xff] %vm3736_vm4, %v3734_v36  ;;  %v11832_v11 = vld [vmem:[#allocation4 + $0x11] sm:$0xff]  ;;  %v6627_v21 = vpack.c.bf16 %v6615_v17, %v6612_v51  ;;  %v6280_v62 = vsel %vm645_vm0, %v6278_v16, %v6279_v5  ;;  %v12411_v39 = vld [vmem:[#allocation22_spill] sm:$0xff]  ;;  %v12416_v16 = vld [vmem:[#allocation19_spill] sm:$0xff]  ;;  %p9313_p2 = por %p9312_p1, %p9311_p0 }
 0x354   : > { %v3735_v29 = vmax.f32 %v3727_v52, 0.0  ;;  %8809 = vmatpush3.bf16.msra.mxu0 %v9283_v18  ;;  %v6494_v31 = vrot.slane %v8011_v26, 2  ;;  %3763 = vst.msk [vmem:[#allocation4 + $0x51] sm:$0xff] %vm3736_vm4, %v3732_v28  ;;  %v3733_v14 = vmax.f32 %v3725_v47, 0.0  ;;  %v3799_v61 = vpack.c.bf16 %v11832_v11, %v3791_v37  ;;  %v11839_v10 = vld [vmem:[#allocation4 + $0x41] sm:$0xff]  ;;  %v12410_v58 = vld [vmem:[#allocation21_spill] sm:$0xff] }
 0x355   : > { %v11843_v4 = vld [vmem:[#allocation4 + $0x42] sm:$0xff]  ;;  %v6495_v30 = vrot.slane %v8014_v60, 2  ;;  %v4343_v54 = vpack.c.bf16 %v11839_v10, %v11834_v49  ;;  %6877 = vmatprep.mubr.bf16.mxu0 %v6627_v21  ;;  %v6626_v40 = vpack.c.bf16 %v6614_v50, %v6611_v56  ;;  %v6595_v51 = vmul.f32 %v11055_v24, %v11019_v32  ;;  %v9285_v32 = vld [vmem:[%s12314_s13 + $0xb0] sm:$0xff]   ;;  %v12412_v24 = vld [vmem:[#allocation17_spill] sm:$0xff]  ;;  %p9314_p3 = pnand %p9313_p2, %p9307_p13 }
 0x356   : > { %3766 = vst.msk [vmem:[#allocation4 + $0x81] sm:$0xff] %vm3736_vm4, %v3735_v29  ;;  %v11846_v8 = vld [vmem:[#allocation4 + $0x21] sm:$0xff]  ;;  %v4489_v12 = vpack.c.bf16 %v11843_v4, %v11841_v41  ;;  %v6601_v33 = vmul.f32 %v12409_v9, %v11183_v25  ;;  %v6319_v17 = vadd.f32 %v12411_v39, %v12410_v58  ;;  %3764 = vst.msk [vmem:[#allocation4 + $0x61] sm:$0xff] %vm3736_vm4, %v3733_v14  ;;  %8630 = vmatprep.mubr.msk.bf16.mxu1 %vm3736_vm4, %v3799_v61  ;;  %v12414_v19 = vld [vmem:[#allocation20_spill] sm:$0xff] }
 0x357   : > { %v11862_v20 = vpack.c.bf16 %v11834_v49, %v11846_v8  ;;  %v12413_v25 = vld [vmem:[#allocation18_spill] sm:$0xff]  ;;  %v12415_v13 = vrot.slane %v12414_v19, 2  ;;  %v12417_v5 = vrot.slane %v12416_v16, 2  ;;  %v12418_v45 = vld [vmem:[#allocation24_spill] sm:$0xff]  ;;  %v12419_v18 = vld [vmem:[#allocation25_spill] sm:$0xff]  ;;  %v4342_v26 = vpack.c.bf16 %v11846_v8, %v11832_v11  ;;  %6878 = vmatmul.mubr.bf16.gmra.mrb[44].mxu0 %v6626_v40  ;;  %8810 = vmatprep.subr.bf16.mxu0 %v9285_v32 }
 0x358   : > { %v6604_v22 = vmul.f32 %v12413_v25, %v12412_v24  ;;  %v6322_v56 = vadd.f32 %v12419_v18, %v12418_v45  ;;  %v6478_v50 = vsel %vm5463_vm3, %v6476_v57, %v6477_v55  ;;  %v6325_v36 = vadd.f32 %v6271_v35, %v11801_v44  ;;  %v9287_v37 = vld [vmem:[%s12314_s13 + $0xb8] sm:$0xff]   ;;  %8811 = vmatpush3.bf16.msra.mxu0 %v9285_v32  ;;  %v12420_v35 = vld [vmem:[#allocation15_spill] sm:$0xff]  ;;  %v3767_v21 = vld [vmem:[#allocation4] sm:$0xff] }
 0x359   : > { %v6469_v15 = vsel %vm5463_vm3, %v12417_v5, %v12415_v13  ;;  %v6328_v52 = vadd.f32 %v6280_v62, %v6112_v1  ;;  %8631 = vmatmul.mubr.msk.bf16.vlgmr.msra.gmra.mrb[8].mxu1 %vm3736_vm4, %v11862_v20  ;;  %v6487_v60 = vsel %vm5463_vm3, %v6485_v6, %v6486_v34  ;;  %v6496_v28 = vsel %vm5463_vm3, %v6494_v31, %v6495_v30  ;;  %v11907_v62 = vld [vmem:[#allocation4 + $0x10] sm:$0xff]  ;;  %v12421_v30 = vld [vmem:[#allocation23_spill] sm:$0xff]  ;;  %v9234_v9 = vld [vmem:[%s12311_s10 + $0x18] sm:$0xff]  }
 0x35a   : > { %8639 = vmatpush3.bf16.msra.mxu1 %v9303_v59  ;;  %v6535_v57 = vadd.f32 %v6469_v15, %v6319_v17  ;;  %8812 = vmatprep.subr.bf16.mxu0 %v9287_v37  ;;  %v6538_v55 = vadd.f32 %v6478_v50, %v6322_v56  ;;  %v6619_v6 = vpack.c.bf16 %v12420_v35, %v6595_v51  ;;  %v11911_v14 = vld [vmem:[#allocation4 + $0x71] sm:$0xff]  ;;  %v3769_v19 = vld [vmem:[#allocation4 + $0x20] sm:$0xff]  ;;  %v9238_v45 = vld [vmem:[%s12311_s10 + $0x68] sm:$0xff]  }
 0x35b   : > { %8640 = vmatprep.subr.bf16.mxu1 %v9232_v48  ;;  %v11900_v44 = vld [vmem:[#allocation4 + $0x51] sm:$0xff]  ;;  %v6622_v47 = vpack.c.bf16 %v6604_v22, %v6601_v33  ;;  %v6541_v34 = vadd.f32 %v6487_v60, %v6325_v36  ;;  %v6544_v1 = vadd.f32 %v6496_v28, %v6328_v52  ;;  %v3775_v39 = vpack.c.bf16 %v11907_v62, %v3767_v21  ;;  %v3771_v15 = vld [vmem:[#allocation4 + $0x40] sm:$0xff]  ;;  %v9276_v49 = vld [vmem:[%s12311_s10 + $0x108] sm:$0xff]  }
 0x35c   : > { %v11905_v29 = vpack.c.bf16 %v11900_v44, %v11839_v10  ;;  %8813 = vmatpush3.bf16.msra.mxu0 %v9287_v37  ;;  %v6607_v40 = vmul.f32 %v12421_v30, %v6535_v57  ;;  %v11925_v33 = vld [vmem:[#allocation4 + $0x52] sm:$0xff]  ;;  %v6610_v58 = vmul.f32 %v11553_v38, %v6538_v55  ;;  %8814 = vmatprep.mubr.bf16.mxu0 %v6619_v6  ;;  %v9235_v38 = vld [vmem:[%s12311_s10 + $0x20] sm:$0xff]  }
 0x35d   : > { %v11909_v31 = vld [vmem:[#allocation4 + $0x61] sm:$0xff]  ;;  %v6613_v32 = vmul.f32 %v11606_v27, %v6541_v34  ;;  %v6616_v24 = vmul.f32 %v11613_v7, %v6544_v1  ;;  %v11947_v13 = vld [vmem:[#allocation4 + $0x50] sm:$0xff]  ;;  %v9240_v28 = vld [vmem:[%s12311_s10 + $0x78] sm:$0xff]   ;;  %v11998_v34 = vpack.c.bf16 %v11925_v33, %v11843_v4 }
 0x35e   : > { %8641 = vmatpush3.bf16.msra.mxu1 %v9232_v48  ;;  %v11913_v61 = vld [vmem:[#allocation4 + $0x62] sm:$0xff]  ;;  %8634 = vmatprep.mubr.msk.bf16.mxu1 %vm3736_vm4, %v11905_v29  ;;  %v11920_v51 = vpack.c.bf16 %v11911_v14, %v11909_v31  ;;  %v4344_v17 = vpack.c.bf16 %v11909_v31, %v11900_v44  ;;  %v6625_v25 = vpack.c.bf16 %v6610_v58, %v6607_v40  ;;  %v11949_v16 = vld [vmem:[#allocation4 + $0x30] sm:$0xff]  ;;  %v9272_v11 = vld [vmem:[%s12311_s10 + $0xf8] sm:$0xff]  }
 0x35f   : > { %8642 = vmatprep.subr.bf16.mxu1 %v9233_v23  ;;  %v4490_v48 = vpack.c.bf16 %v11913_v61, %v11925_v33  ;;  %8815 = vmatmul.mubr.bf16.vlgmr.msra.gmra.mrb[48].mxu0 %v6622_v47  ;;  %v6628_v22 = vpack.c.bf16 %v6616_v24, %v6613_v32  ;;  %v9236_v27 = vld [vmem:[%s12311_s10 + $0x28] sm:$0xff]   ;;  %v9237_v7 = vld [vmem:[%s12311_s10 + $0x60] sm:$0xff]   ;;  %v11952_v5 = vpack.c.bf16 %v11949_v16, %v3769_v19  ;;  %v9239_v56 = vld [vmem:[%s12311_s10 + $0x70] sm:$0xff]  }
 0x360   : > { %8818 = vmatprep.mubr.bf16.mxu0 %v6625_v25  ;;  %v11958_v18 = vpack.c.bf16 %v11947_v13, %v3771_v15  ;;  %v3773_v50 = vld [vmem:[#allocation4 + $0x60] sm:$0xff]  ;;  %v11967_v52 = vld [vmem:[#allocation4 + $0x12] sm:$0xff]  ;;  %v9246_v40 = vld [vmem:[%s12311_s10 + $0xa8] sm:$0xff]   ;;  %v4197_v32 = vpack.c.bf16 %v3771_v15, %v11949_v16 }
 0x361   : > { %8635 = vmatmul.mubr.msk.bf16.gmra.mrb[12].mxu1 %vm3736_vm4, %v11920_v51  ;;  %v4042_v36 = vld [vmem:[#allocation4 + $0x2] sm:$0xff]  ;;  %v3774_v37 = vld [vmem:[#allocation4 + $0x70] sm:$0xff]  ;;  %v9244_v47 = vld [vmem:[%s12311_s10 + $0x98] sm:$0xff]  }
 0x362   : > { %8643 = vmatpush3.bf16.msra.mxu1 %v9233_v23  ;;  %8650 = vmatprep.mubr.msk.bf16.mxu1 %vm3736_vm4, %v3775_v39  ;;  %v11969_v60 = vpack.c.bf16 %v3774_v37, %v3773_v50  ;;  %v4050_v59 = vpack.c.bf16 %v11967_v52, %v4042_v36  ;;  %v9241_v57 = vld [vmem:[%s12311_s10 + $0x80] sm:$0xff]   ;;  %v9242_v23 = vld [vmem:[%s12311_s10 + $0x88] sm:$0xff]   ;;  %v9243_v55 = vld [vmem:[%s12311_s10 + $0x90] sm:$0xff]  }
 0x363   : > { %8644 = vmatprep.subr.bf16.mxu1 %v9234_v9  ;;  %v11987_v35 = vld [vmem:[#allocation4 + $0x22] sm:$0xff]  ;;  %v12007_v21 = vld [vmem:[#allocation4 + $0x72] sm:$0xff] }
 0x364   : > { %v11991_v6 = vpack.c.bf16 %v11841_v41, %v11987_v35  ;;  %v9245_v1 = vld [vmem:[%s12311_s10 + $0xa0] sm:$0xff]   ;;  %v12011_v30 = vpack.c.bf16 %v12007_v21, %v11913_v61  ;;  %v9247_v58 = vld [vmem:[%s12311_s10 + $0xb0] sm:$0xff]   ;;  %v9248_v39 = vld [vmem:[%s12311_s10 + $0xb8] sm:$0xff]   ;;  %v4488_v10 = vpack.c.bf16 %v11987_v35, %v11967_v52 }
 0x365   : > { %v9254_v24 = vld [vmem:[%s12311_s10 + $0xc8] sm:$0xff]   ;;  %v9257_v25 = vld [vmem:[%s12311_s10 + $0xd0] sm:$0xff]   ;;  %v9274_v8 = vld [vmem:[%s12311_s10 + $0x100] sm:$0xff]  }
 0x366   : > { %8645 = vmatpush3.bf16.msra.mxu1 %v9234_v9  ;;  %v4196_v9 = vpack.c.bf16 %v3769_v19, %v11907_v62  ;;  %v9251_v62 = vld [vmem:[%s12311_s10 + $0xc0] sm:$0xff]   ;;  %v9269_v16 = vld [vmem:[%s12311_s10 + $0xf0] sm:$0xff]   ;;  %v9280_v44 = vld [vmem:[%s12311_s10 + $0x118] sm:$0xff]  }
 0x367   : > { %8646 = vmatprep.subr.bf16.mxu1 %v9235_v38  ;;  %8819 = vmatmul.mubr.bf16.gmra.mrb[52].mxu0 %v6628_v22  ;;  %v12039_v22 = vld [vmem:[#allocation4 + $0x80] sm:$0xff]  ;;  %v9288_v41 = vld [vmem:[%s12311_s10 + $0x138] sm:$0xff]   ;;  %v9291_v61 = vld [vmem:[%s12311_s10 + $0x150] sm:$0xff]  }
 0x368   : > { %v9263_v19 = vld [vmem:[%s12311_s10 + $0xe0] sm:$0xff]   ;;  %v9292_v33 = vld [vmem:[%s12311_s10 + $0x158] sm:$0xff]   ;;  %v9294_v36 = vld [vmem:[%s12311_s10 + $0x168] sm:$0xff]  }
 0x369   : > { %v9282_v31 = vld [vmem:[%s12311_s10 + $0x120] sm:$0xff]   ;;  %v9296_v52 = vld [vmem:[%s12311_s10 + $0x178] sm:$0xff]  }
 0x36a   : > { %8647 = vmatpush3.bf16.msra.mxu1 %v9235_v38  ;;  %v4198_v38 = vpack.c.bf16 %v3773_v50, %v11947_v13  ;;  %v9266_v13 = vld [vmem:[%s12311_s10 + $0xe8] sm:$0xff]   ;;  %v9289_v4 = vld [vmem:[%s12311_s10 + $0x140] sm:$0xff]  }
 0x36b   : > { %8648 = vmatprep.subr.bf16.mxu1 %v9236_v27 }
 0x36e   : > { %8649 = vmatpush3.bf16.msra.mxu1 %v9236_v27  ;;  %v4199_v27 = vpack.c.bf16 %v12039_v22, %v3774_v37  ;;  %v9297_v37 = vld [vmem:[%s12311_s10 + $0x180] sm:$0xff]  }
 0x36f   : > { %8658 = vmatprep.subr.bf16.mxu1 %v9237_v7 }
 0x371   : > { %8651 = vmatmul.mubr.msk.bf16.vlgmr.msra.gmra.mrb[8].mxu1 %vm3736_vm4, %v11952_v5 }
 0x372   : > { %8654 = vmatprep.mubr.msk.bf16.mxu1 %vm3736_vm4, %v11958_v18  ;;  %8659 = vmatpush3.bf16.msra.mxu1 %v9237_v7  ;;  %v9260_v7 = vld [vmem:[%s12311_s10 + $0xd8] sm:$0xff]  }
 0x373   : > { %8660 = vmatprep.subr.bf16.mxu1 %v9238_v45 }
 0x376   : > { %8661 = vmatpush3.bf16.msra.mxu1 %v9238_v45  ;;  %v12107_v45 = vld [vmem:[#allocation4 + $0x82] sm:$0xff] }
 0x377   : > { %8662 = vmatprep.subr.bf16.mxu1 %v9239_v56 }
 0x379   : > { %8655 = vmatmul.mubr.msk.bf16.gmra.mrb[12].mxu1 %vm3736_vm4, %v11969_v60 }
 0x37a   : > { %8663 = vmatpush3.bf16.msra.mxu1 %v9239_v56  ;;  %8670 = vmatprep.mubr.msk.bf16.mxu1 %vm3736_vm4, %v4050_v59  ;;  %v4491_v56 = vpack.c.bf16 %v12107_v45, %v12007_v21 }
 0x37b   : > { %8664 = vmatprep.subr.bf16.mxu1 %v9240_v28 }
 0x37e   : > { %8665 = vmatpush3.bf16.msra.mxu1 %v9240_v28  ;;  %v4780_v28 = vld [vmem:[#allocation4 + $0x91] sm:$0xff] }
 0x37f   : > { %8666 = vmatprep.subr.bf16.mxu1 %v9241_v57 }
 0x382   : > { %8667 = vmatpush3.bf16.msra.mxu1 %v9241_v57  ;;  %v9300_v57 = vld [vmem:[%s12311_s10 + $0x198] sm:$0xff]  }
 0x383   : > { %8668 = vmatprep.subr.bf16.mxu1 %v9242_v23 }
 0x386   : > { %8669 = vmatpush3.bf16.msra.mxu1 %v9242_v23 }
 0x387   : > { %8678 = vmatprep.subr.bf16.mxu1 %v9243_v55 }
 0x389   : > { %8671 = vmatmul.mubr.msk.bf16.vlgmr.msra.gmra.mrb[8].mxu1 %vm3736_vm4, %v11991_v6 }
 0x38a   : > { %8674 = vmatprep.mubr.msk.bf16.mxu1 %vm3736_vm4, %v11998_v34  ;;  %8679 = vmatpush3.bf16.msra.mxu1 %v9243_v55 }
 0x38b   : > { %8680 = vmatprep.subr.bf16.mxu1 %v9244_v47 }
 0x38e   : > { %8681 = vmatpush3.bf16.msra.mxu1 %v9244_v47 }
 0x38f   : > { %8682 = vmatprep.subr.bf16.mxu1 %v9245_v1 }
 0x391   : > { %8675 = vmatmul.mubr.msk.bf16.gmra.mrb[12].mxu1 %vm3736_vm4, %v12011_v30 }
 0x392   : > { %8683 = vmatpush3.bf16.msra.mxu1 %v9245_v1  ;;  %8690 = vmatprep.mubr.msk.bf16.mxu1 %vm3736_vm4, %v4196_v9  ;;  %v4926_v9 = vld [vmem:[#allocation4 + $0x92] sm:$0xff] }
 0x393   : > { %8684 = vmatprep.subr.bf16.mxu1 %v9246_v40 }
 0x396   : > { %8685 = vmatpush3.bf16.msra.mxu1 %v9246_v40 }
 0x397   : > { %8686 = vmatprep.subr.bf16.mxu1 %v9247_v58 }
 0x39a   : > { %8687 = vmatpush3.bf16.msra.mxu1 %v9247_v58 }
 0x39b   : > { %8688 = vmatprep.subr.bf16.mxu1 %v9248_v39 }
 0x39e   : > { %8689 = vmatpush3.bf16.msra.mxu1 %v9248_v39 }
 0x39f   : > { %8698 = vmatprep.subr.bf16.mxu1 %v9251_v62 }
 0x3a1   : > { %8691 = vmatmul.mubr.msk.bf16.vlgmr.msra.gmra.mrb[8].mxu1 %vm3736_vm4, %v4197_v32 }
 0x3a2   : > { %8694 = vmatprep.mubr.msk.bf16.mxu1 %vm3736_vm4, %v4198_v38  ;;  %8699 = vmatpush3.bf16.msra.mxu1 %v9251_v62 }
 0x3a3   : > { %8700 = vmatprep.subr.bf16.mxu1 %v9254_v24 }
 0x3a6   : > { %8701 = vmatpush3.bf16.msra.mxu1 %v9254_v24  ;;  %v4930_v24 = vpack.c.bf16 %v4926_v9, %v12107_v45 }
 0x3a7   : > { %8702 = vmatprep.subr.bf16.mxu1 %v9257_v25 }
 0x3a9   : > { %8695 = vmatmul.mubr.msk.bf16.gmra.mrb[12].mxu1 %vm3736_vm4, %v4199_v27 }
 0x3aa   : > { %8703 = vmatpush3.bf16.msra.mxu1 %v9257_v25  ;;  %8710 = vmatprep.mubr.msk.bf16.mxu1 %vm3736_vm4, %v4342_v26  ;;  %v12073_v26 = vld [vmem:[#allocation4 + $0x81] sm:$0xff] }
 0x3ab   : > { %8704 = vmatprep.subr.bf16.mxu1 %v9260_v7  ;;  %v4345_v15 = vpack.c.bf16 %v12073_v26, %v11911_v14  ;;  %v9284_v14 = vld [vmem:[%s12311_s10 + $0x128] sm:$0xff]   ;;  %v4784_v59 = vpack.c.bf16 %v4780_v28, %v12073_v26 }
 0x3ae   : > { %8705 = vmatpush3.bf16.msra.mxu1 %v9260_v7 }
 0x3af   : > { %8706 = vmatprep.subr.bf16.mxu1 %v9263_v19 }
 0x3b2   : > { %8707 = vmatpush3.bf16.msra.mxu1 %v9263_v19 }
 0x3b3   : > { %8708 = vmatprep.subr.bf16.mxu1 %v9266_v13 }
 0x3b6   : > { %8709 = vmatpush3.bf16.msra.mxu1 %v9266_v13 }
 0x3b7   : > { %8718 = vmatprep.subr.bf16.mxu1 %v9269_v16 }
 0x3b9   : > { %8711 = vmatmul.mubr.msk.bf16.vlgmr.msra.gmra.mrb[8].mxu1 %vm3736_vm4, %v4343_v54  ;;  %v9278_v54 = vld [vmem:[%s12311_s10 + $0x110] sm:$0xff]  }
 0x3ba   : > { %8714 = vmatprep.mubr.msk.bf16.mxu1 %vm3736_vm4, %v4344_v17  ;;  %8719 = vmatpush3.bf16.msra.mxu1 %v9269_v16  ;;  %v9286_v17 = vld [vmem:[%s12311_s10 + $0x130] sm:$0xff]  }
 0x3bb   : > { %8720 = vmatprep.subr.bf16.mxu1 %v9272_v11 }
 0x3be   : > { %8721 = vmatpush3.bf16.msra.mxu1 %v9272_v11 }
 0x3bf   : > { %8722 = vmatprep.subr.bf16.mxu1 %v9274_v8 }
 0x3c1   : > { %8715 = vmatmul.mubr.msk.bf16.gmra.mrb[12].mxu1 %vm3736_vm4, %v4345_v15  ;;  %v8039_v15 = vld [vmem:[%s12315_s14] ss:$0 sm:$0xff] }
 0x3c2   : > { %8723 = vmatpush3.bf16.msra.mxu1 %v9274_v8  ;;  %8730 = vmatprep.mubr.msk.bf16.mxu1 %vm3736_vm4, %v4488_v10 }
 0x3c3   : > { %8724 = vmatprep.subr.bf16.mxu1 %v9276_v49 }
 0x3c6   : > { %8725 = vmatpush3.bf16.msra.mxu1 %v9276_v49 }
 0x3c7   : > { %8726 = vmatprep.subr.bf16.mxu1 %v9278_v54 }
 0x3ca   : > { %8727 = vmatpush3.bf16.msra.mxu1 %v9278_v54 }
 0x3cb   : > { %8728 = vmatprep.subr.bf16.mxu1 %v9280_v44 }
 0x3ce   : > { %8729 = vmatpush3.bf16.msra.mxu1 %v9280_v44 }
 0x3cf   : > { %8738 = vmatprep.subr.bf16.mxu1 %v9282_v31 }
 0x3d1   : > { %8731 = vmatmul.mubr.msk.bf16.vlgmr.msra.gmra.mrb[8].mxu1 %vm3736_vm4, %v4489_v12  ;;  %v9290_v12 = vld [vmem:[%s12311_s10 + $0x148] sm:$0xff]  }
 0x3d2   : > { %8734 = vmatprep.mubr.msk.bf16.mxu1 %vm3736_vm4, %v4490_v48  ;;  %8739 = vmatpush3.bf16.msra.mxu1 %v9282_v31  ;;  %v9293_v48 = vld [vmem:[%s12311_s10 + $0x160] sm:$0xff]  }
 0x3d3   : > { %8740 = vmatprep.subr.bf16.mxu1 %v9284_v14  ;;  %v8040_v31 = vld [vmem:[%s12316_s15] ss:$0 sm:$0xff] }
 0x3d6   : > { %8741 = vmatpush3.bf16.msra.mxu1 %v9284_v14 }
 0x3d7   : > { %8742 = vmatprep.subr.bf16.mxu1 %v9286_v17 }
 0x3d9   : > { %8735 = vmatmul.mubr.msk.bf16.gmra.mrb[12].mxu1 %vm3736_vm4, %v4491_v56 }
 0x3da   : > { %8743 = vmatpush3.bf16.msra.mxu1 %v9286_v17  ;;  %8750 = vmatprep.mubr.msk.bf16.mxu1 %vm3736_vm4, %v11952_v5  ;;  %v4634_v5 = vld [vmem:[#allocation4 + $0x90] sm:$0xff] }
 0x3db   : > { %8744 = vmatprep.subr.bf16.mxu1 %v9288_v41  ;;  %v4638_v50 = vpack.c.bf16 %v4634_v5, %v12039_v22 }
 0x3de   : > { %8745 = vmatpush3.bf16.msra.mxu1 %v9288_v41 }
 0x3df   : > { %8746 = vmatprep.subr.bf16.mxu1 %v9289_v4 }
 0x3e2   : > { %8747 = vmatpush3.bf16.msra.mxu1 %v9289_v4 }
 0x3e3   : > { %8748 = vmatprep.subr.bf16.mxu1 %v9290_v12 }
 0x3e6   : > { %8749 = vmatpush3.bf16.msra.mxu1 %v9290_v12 }
 0x3e7   : > { %8758 = vmatprep.subr.bf16.mxu1 %v9291_v61 }
 0x3e9   : > { %8751 = vmatmul.mubr.msk.bf16.vlgmr.msra.gmra.mrb[8].mxu1 %vm3736_vm4, %v11958_v18  ;;  %v9295_v18 = vld [vmem:[%s12311_s10 + $0x170] sm:$0xff]  }
 0x3ea   : > { %8754 = vmatprep.mubr.msk.bf16.mxu1 %vm3736_vm4, %v11969_v60  ;;  %8759 = vmatpush3.bf16.msra.mxu1 %v9291_v61  ;;  %v9299_v60 = vld [vmem:[%s12311_s10 + $0x190] sm:$0xff]  }
 0x3eb   : > { %8760 = vmatprep.subr.bf16.mxu1 %v9292_v33 }
 0x3ee   : > { %8761 = vmatpush3.bf16.msra.mxu1 %v9292_v33 }
 0x3ef   : > { %8762 = vmatprep.subr.bf16.mxu1 %v9293_v48 }
 0x3f1   : > { %8755 = vmatmul.mubr.msk.bf16.gmra.mrb[12].mxu1 %vm3736_vm4, %v4638_v50 }
 0x3f2   : > { %8763 = vmatpush3.bf16.msra.mxu1 %v9293_v48  ;;  %8770 = vmatprep.mubr.msk.bf16.mxu1 %vm3736_vm4, %v11862_v20  ;;  %v9298_v20 = vld [vmem:[%s12311_s10 + $0x188] sm:$0xff]  }
 0x3f3   : > { %8764 = vmatprep.subr.bf16.mxu1 %v9294_v36 }
 0x3f6   : > { %8765 = vmatpush3.bf16.msra.mxu1 %v9294_v36 }
 0x3f7   : > { %8766 = vmatprep.subr.bf16.mxu1 %v9295_v18 }
 0x3fa   : > { %8767 = vmatpush3.bf16.msra.mxu1 %v9295_v18 }
 0x3fb   : > { %8768 = vmatprep.subr.bf16.mxu1 %v9296_v52 }
 0x3fe   : > { %8769 = vmatpush3.bf16.msra.mxu1 %v9296_v52 }
 0x3ff   : > { %8778 = vmatprep.subr.bf16.mxu1 %v9297_v37 }
 0x401   : > { %8771 = vmatmul.mubr.msk.bf16.vlgmr.msra.gmra.mrb[8].mxu1 %vm3736_vm4, %v11905_v29  ;;  %v9301_v29 = vld [vmem:[%s12311_s10 + $0x1a0] sm:$0xff]  }
 0x402   : > { %8774 = vmatprep.mubr.msk.bf16.mxu1 %vm3736_vm4, %v11920_v51  ;;  %8779 = vmatpush3.bf16.msra.mxu1 %v9297_v37  ;;  %v9302_v51 = vld [vmem:[%s12311_s10 + $0x1a8] sm:$0xff]  }
 0x403   : > { %8780 = vmatprep.subr.bf16.mxu1 %v9298_v20 }
 0x406   : > { %8781 = vmatpush3.bf16.msra.mxu1 %v9298_v20 }
 0x407   : > { %8782 = vmatprep.subr.bf16.mxu1 %v9299_v60 }
 0x409   : > { %8775 = vmatmul.mubr.msk.bf16.gmra.mrb[12].mxu1 %vm3736_vm4, %v4784_v59 }
 0x40a   : > { %8783 = vmatpush3.bf16.msra.mxu1 %v9299_v60  ;;  %8790 = vmatprep.mubr.msk.bf16.mxu1 %vm3736_vm4, %v11991_v6 }
 0x40b   : > { %8784 = vmatprep.subr.bf16.mxu1 %v9300_v57 }
 0x40e   : > { %8785 = vmatpush3.bf16.msra.mxu1 %v9300_v57 }
 0x40f   : > { %8786 = vmatprep.subr.bf16.mxu1 %v9301_v29 }
 0x411   : > { %v8294_v23 = vpop.f32.mrb[32].mxu0 }
 0x412   : > { %8787 = vmatpush3.bf16.msra.mxu1 %v9301_v29  ;;  %v8295_v55 = vpop.f32.mrb[33].mxu0 }
 0x413   : > { %8788 = vmatprep.subr.bf16.mxu1 %v9302_v51  ;;  %v8296_v35 = vadd.f32 %v8295_v55, %v8294_v23  ;;  %v8297_v47 = vpop.f32.mrb[34].mxu0 }
 0x414   : > { %v8298_v1 = vpop.f32.mrb[35].mxu0 }
 0x415   : > { %v8299_v6 = vadd.f32 %v8298_v1, %v8297_v47 }
 0x416   : > { %8789 = vmatpush3.bf16.msra.mxu1 %v9302_v51 }
 0x419   : > { %8791 = vmatmul.mubr.msk.bf16.vlgmr.msra.gmra.mrb[8].mxu1 %vm3736_vm4, %v11998_v34  ;;  %v8300_v21 = vpop.f32.mrb[36].mxu0 }
 0x41a   : > { %8794 = vmatprep.mubr.msk.bf16.mxu1 %vm3736_vm4, %v12011_v30  ;;  %v8301_v40 = vpop.f32.mrb[37].mxu0 }
 0x41b   : > { %v8302_v58 = vadd.f32 %v8301_v40, %v8300_v21  ;;  %v8303_v39 = vpop.f32.mrb[38].mxu0 }
 0x41c   : > { %v8304_v62 = vpop.f32.mrb[39].mxu0 }
 0x41d   : > { %v8305_v32 = vadd.f32 %v8304_v62, %v8303_v39  ;;  %v7773_v39 = vld [vmem:[%s12312_s11] ss:$0 sm:$0xff] }
 0x421   : > { %8795 = vmatmul.mubr.msk.bf16.gmra.mrb[12].mxu1 %vm3736_vm4, %v4930_v24 }
 0x422   : > { %v8306_v38 = vpop.f32.mrb[40].mxu0 }
 0x423   : > { %v8307_v25 = vpop.f32.mrb[41].mxu0 }
 0x424   : > { %v8308_v22 = vadd.f32 %v8307_v25, %v8306_v38  ;;  %v8309_v27 = vpop.f32.mrb[42].mxu0 }
 0x425   : > { %v8310_v7 = vpop.f32.mrb[43].mxu0 }
 0x426   : > { %v8311_v34 = vadd.f32 %v8310_v7, %v8309_v27 }
 0x42a   : > { %v8312_v19 = vpop.f32.mrb[44].mxu0 }
 0x42b   : > { %v8313_v13 = vpop.f32.mrb[45].mxu0 }
 0x42c   : > { %v8314_v30 = vadd.f32 %v8313_v13, %v8312_v19  ;;  %v8315_v16 = vpop.f32.mrb[46].mxu0 }
 0x42d   : > { %v8316_v11 = vpop.f32.mrb[47].mxu0 }
 0x42e   : > { %v8317_v8 = vadd.f32 %v8316_v11, %v8315_v16 }
 0x432   : > { %v8816_v26 = vpop.f32.mrb[48].mxu0 }
 0x433   : > { %v6929_v49 = vadd.f32 %v8816_v26, %v8302_v58  ;;  %v6920_v10 = vpop.f32.mrb[49].mxu0 }
 0x434   : > { %v6921_v54 = vadd.f32 %v8296_v35, %v6920_v10  ;;  %v8817_v44 = vpop.f32.mrb[50].mxu0 }
 0x435   : > { %v6960_v14 = vmul.f32 %v8039_v15, %v6929_v49  ;;  %v6932_v17 = vadd.f32 %v8817_v44, %v8305_v32  ;;  %v6923_v45 = vpop.f32.mrb[51].mxu0  ;;  %v7774_v32 = vld [vmem:[%s12313_s12] ss:$0 sm:$0xff] }
 0x436   : > { %v6958_v56 = vmul.f32 %v8039_v15, %v6921_v54  ;;  %v6924_v41 = vadd.f32 %v8299_v6, %v6923_v45 }
 0x437   : > { %v6961_v4 = vmul.f32 %v8039_v15, %v6932_v17  ;;  %v6975_v12 = vadd.f32 %v8040_v31, %v6960_v14 }
 0x438   : > { %v6959_v61 = vmul.f32 %v8039_v15, %v6924_v41  ;;  %v6973_v33 = vadd.f32 %v8040_v31, %v6958_v56 }
 0x439   : > { %v6983_v48 = vmax.f32 %v6975_v12, 0.0  ;;  %v6976_v5 = vadd.f32 %v8040_v31, %v6961_v4 }
 0x43a   : > { %v8820_v50 = vpop.f32.mrb[52].mxu0  ;;  %v6974_v36 = vadd.f32 %v8040_v31, %v6959_v61  ;;  %v6981_v20 = vmax.f32 %v6973_v33, 0.0 }
 0x43b   : > { %v6945_v18 = vadd.f32 %v8820_v50, %v8314_v30  ;;  %v6936_v52 = vpop.f32.mrb[53].mxu0  ;;  %7065 = vrot.lane.b32.xlu1 %v6983_v48, %s9372_s18  ;;  %v6984_v37 = vmax.f32 %v6976_v5, 0.0 }
 0x43c   : > { %v6937_v60 = vadd.f32 %v8308_v22, %v6936_v52  ;;  %v8821_v28 = vpop.f32.mrb[54].mxu0  ;;  %v6982_v51 = vmax.f32 %v6974_v36, 0.0 }
 0x43d   : > { %v6964_v59 = vmul.f32 %v8039_v15, %v6945_v18  ;;  %v6948_v57 = vadd.f32 %v8821_v28, %v8317_v8  ;;  %v6939_v29 = vpop.f32.mrb[55].mxu0  ;;  %7067 = vrot.lane.b32.xlu0 %v6984_v37, %s9372_s18 }
 0x43e   : > { %v6962_v23 = vmul.f32 %v8039_v15, %v6937_v60  ;;  %v6940_v55 = vadd.f32 %v8311_v34, %v6939_v29 }
 0x43f   : > { %v6965_v35 = vmul.f32 %v8039_v15, %v6948_v57  ;;  %7061 = vrot.lane.b32.xlu1 %v6981_v20, %s9372_s18  ;;  %v6979_v6 = vadd.f32 %v8040_v31, %v6964_v59 }
 0x440   : > { %v6963_v47 = vmul.f32 %v8039_v15, %v6940_v55  ;;  %v6977_v1 = vadd.f32 %v8040_v31, %v6962_v23 }
 0x441   : > { %7063 = vrot.lane.b32.xlu0 %v6982_v51, %s9372_s18  ;;  %v6980_v21 = vadd.f32 %v8040_v31, %v6965_v35  ;;  %v6987_v50 = vmax.f32 %v6979_v6, 0.0 }
 0x442   : > { %v6985_v40 = vmax.f32 %v6977_v1, 0.0  ;;  %v6978_v9 = vadd.f32 %v8040_v31, %v6963_v47 }
 0x443   : > { %v6988_v36 = vmax.f32 %v6980_v21, 0.0 }
 0x444   : > { %7069 = vrot.lane.b32.xlu1 %v6985_v40, %s9372_s18  ;;  %v6986_v58 = vmax.f32 %v6978_v9, 0.0 }
 0x446   : > { %7071 = vrot.lane.b32.xlu0 %v6986_v58, %s9372_s18 }
 0x4ad   : > { %v7066_v18 = vpop.permute.xlu1 %7065 }
 0x4af   : > { %v7068_v52 = vpop.permute.xlu0 %7067 }
 0x4b1   : > { %v7062_v37 = vpop.permute.xlu1 %7061 }
 0x4b3   : > { %v7064_v20 = vpop.permute.xlu0 %7063 }
 0x4b6   : > { %v7070_v60 = vpop.permute.xlu1 %7069 }
 0x4b8   : > { %v7072_v28 = vpop.permute.xlu0 %7071 }
 0x4ec   : > { %v8792_v62 = vpop.f32.mrb[8].mxu1 }
 0x4ed   : > { %v5074_v24 = vmul.f32 %v8792_v62, %v7773_v39  ;;  %v5026_v38 = vpop.f32.mrb[9].mxu1 }
 0x4ee   : > { %v5072_v25 = vmul.f32 %v7773_v39, %v5026_v38  ;;  %v8793_v22 = vpop.f32.mrb[10].mxu1 }
 0x4ef   : > { %v5089_v27 = vadd.f32 %v7774_v32, %v5074_v24  ;;  %v5075_v7 = vmul.f32 %v8793_v22, %v7773_v39  ;;  %v5029_v34 = vpop.f32.mrb[11].mxu1 }
 0x4f0   : > { %v5073_v19 = vmul.f32 %v7773_v39, %v5029_v34  ;;  %v5087_v30 = vadd.f32 %v7774_v32, %v5072_v25 }
 0x4f1   : > { %v5097_v13 = vmax.f32 %v5089_v27, 0.0  ;;  %v5090_v16 = vadd.f32 %v7774_v32, %v5075_v7 }
 0x4f2   : > { %v5088_v8 = vadd.f32 %v7774_v32, %v5073_v19  ;;  %v5095_v15 = vmax.f32 %v5087_v30, 0.0 }
 0x4f3   : > { %v5098_v11 = vmax.f32 %v5090_v16, 0.0  ;;  %7033 = vrot.lane.b32.xlu1 %v5097_v13, %s9370_s20 }
 0x4f4   : > { %v8796_v26 = vpop.f32.mrb[12].mxu1  ;;  %v5096_v31 = vmax.f32 %v5088_v8, 0.0 }
 0x4f5   : > { %v5078_v49 = vmul.f32 %v8796_v26, %v7773_v39  ;;  %v5042_v10 = vpop.f32.mrb[13].mxu1  ;;  %7035 = vrot.lane.b32.xlu0 %v5098_v11, %s9370_s20 }
 0x4f6   : > { %v5076_v54 = vmul.f32 %v7773_v39, %v5042_v10  ;;  %v8797_v44 = vpop.f32.mrb[14].mxu1 }
 0x4f7   : > { %v5093_v14 = vadd.f32 %v7774_v32, %v5078_v49  ;;  %v5079_v17 = vmul.f32 %v8797_v44, %v7773_v39  ;;  %7029 = vrot.lane.b32.xlu1 %v5095_v15, %s9370_s20  ;;  %v5045_v45 = vpop.f32.mrb[15].mxu1 }
 0x4f8   : > { %v5077_v56 = vmul.f32 %v7773_v39, %v5045_v45  ;;  %v5091_v4 = vadd.f32 %v7774_v32, %v5076_v54 }
 0x4f9   : > { %v5101_v41 = vmax.f32 %v5093_v14, 0.0  ;;  %v5094_v12 = vadd.f32 %v7774_v32, %v5079_v17  ;;  %7031 = vrot.lane.b32.xlu0 %v5096_v31, %s9370_s20 }
 0x4fa   : > { %v5092_v33 = vadd.f32 %v7774_v32, %v5077_v56  ;;  %v5099_v48 = vmax.f32 %v5091_v4, 0.0 }
 0x4fb   : > { %v5102_v61 = vmax.f32 %v5094_v12, 0.0  ;;  %7041 = vrot.lane.b32.xlu1 %v5101_v41, %s9370_s20 }
 0x4fc   : > { %v5100_v5 = vmax.f32 %v5092_v33, 0.0 }
 0x4fd   : > { %7043 = vrot.lane.b32.xlu0 %v5102_v61, %s9370_s20 }
 0x4ff   : > { %7037 = vrot.lane.b32.xlu1 %v5099_v48, %s9370_s20 }
 0x501   : > { %7039 = vrot.lane.b32.xlu0 %v5100_v5, %s9370_s20  ;;  %s9032_s20 = smul.u32 3072, %s9487_s28 }
 0x503   : > { %7073 = vrot.lane.b32.xlu1 %v6987_v50, %s9372_s18 }
 0x505   : > { %7075 = vrot.lane.b32.xlu0 %v6988_v36, %s9372_s18  ;;  %s12254_s18 = scalar_lea.hbm %s12422_s27, %s9032_s20 }
 0x565   : > { %v7034_v59 = vpop.permute.xlu1 %7033 }
 0x566   : > { %v7095_v57 = vsel %vm1260_vm1, %v11640_v43, %v7034_v59  ;;  %v7104_v29 = vsel %vm7101_vm6, %v7034_v59, %v7066_v18 }
 0x567   : > { %7117 = vst [vmem:[%s11658_s19 + $0x38] sm:$0xff] %v7095_v57  ;;  %7118 = vst [vmem:[%s11658_s19 + $0x40] sm:$0xff] %v7104_v29  ;;  %v7036_v51 = vpop.permute.xlu0 %7035 }
 0x568   : > { %v7096_v23 = vsel %vm1260_vm1, %v11661_v42, %v7036_v51  ;;  %v7105_v55 = vsel %vm7101_vm6, %v7036_v51, %v7068_v52 }
 0x569   : > { %7120 = vst [vmem:[%s11658_s19 + $0x50] sm:$0xff] %v7096_v23  ;;  %7121 = vst [vmem:[%s11658_s19 + $0x58] sm:$0xff] %v7105_v55  ;;  %v7030_v35 = vpop.permute.xlu1 %7029 }
 0x56a   : > { %v7093_v43 = vsel %vm1260_vm1, %v11681_v0, %v7030_v35  ;;  %v7102_v47 = vsel %vm7101_vm6, %v7030_v35, %v7062_v37 }
 0x56b   : > { %7111 = vst [vmem:[%s11658_s19 + $0x8] sm:$0xff] %v7093_v43  ;;  %7112 = vst [vmem:[%s11658_s19 + $0x10] sm:$0xff] %v7102_v47  ;;  %v7032_v1 = vpop.permute.xlu0 %7031 }
 0x56c   : > { %v7094_v42 = vsel %vm1260_vm1, %v11705_v2, %v7032_v1  ;;  %v7103_v6 = vsel %vm7101_vm6, %v7032_v1, %v7064_v20 }
 0x56d   : > { %7114 = vst [vmem:[%s11658_s19 + $0x20] sm:$0xff] %v7094_v42  ;;  %7115 = vst [vmem:[%s11658_s19 + $0x28] sm:$0xff] %v7103_v6  ;;  %v7042_v21 = vpop.permute.xlu1 %7041 }
 0x56e   : > { %v7099_v0 = vsel %vm1260_vm1, %v11723_v53, %v7042_v21 }
 0x56f   : > { %7129 = vst [vmem:[%s11658_s19 + $0x98] sm:$0xff] %v7099_v0  ;;  %v7044_v40 = vpop.permute.xlu0 %7043 }
 0x570   : > { %v7100_v9 = vsel %vm1260_vm1, %v11745_v46, %v7044_v40 }
 0x571   : > { %7132 = vst [vmem:[%s11658_s19 + $0xb0] sm:$0xff] %v7100_v9  ;;  %v7038_v2 = vpop.permute.xlu1 %7037 }
 0x572   : > { %v7097_v58 = vsel %vm1260_vm1, %v11757_v3, %v7038_v2  ;;  %v7106_v39 = vsel %vm7101_vm6, %v7038_v2, %v7070_v60 }
 0x573   : > { %7123 = vst [vmem:[%s11658_s19 + $0x68] sm:$0xff] %v7097_v58  ;;  %7124 = vst [vmem:[%s11658_s19 + $0x70] sm:$0xff] %v7106_v39  ;;  %v7040_v62 = vpop.permute.xlu0 %7039 }
 0x574   : > { %v7098_v53 = vsel %vm1260_vm1, %v11774_v63, %v7040_v62  ;;  %v7107_v46 = vsel %vm7101_vm6, %v7040_v62, %v7072_v28 }
 0x575   : > { %7126 = vst [vmem:[%s11658_s19 + $0x80] sm:$0xff] %v7098_v53  ;;  %7127 = vst [vmem:[%s11658_s19 + $0x88] sm:$0xff] %v7107_v46  ;;  %v7074_v32 = vpop.permute.xlu1 %7073 }
 0x576   : > { %v7108_v3 = vsel %vm7101_vm6, %v7042_v21, %v7074_v32 }
 0x577   : > { %7130 = vst [vmem:[%s11658_s19 + $0xa0] sm:$0xff] %v7108_v3  ;;  %v7076_v24 = vpop.permute.xlu0 %7075 }
 0x578   : > { %v7109_v63 = vsel %vm7101_vm6, %v7044_v40, %v7076_v24 }
 0x579   : > { %7133 = vst [vmem:[%s11658_s19 + $0xb8] sm:$0xff] %v7109_v63 }
 0x57a   : > { %9317 = shalt.err (!%p9314_p3)
}
 0x57b   : > { %s9318_s29 = scalar_lea.hbm %s12254_s18, 3072  ;;  %s9322_s28 = scalar_lea.hbm %s12423_s30, 6144 }
 0x57c   : > { %p9319_p4 = scmp.ne.s32.totalorder %s12254_s18, %s9318_s29  ;;  %p9323_p9 = scmp.lt.u32.totalorder %s12254_s18, %s12423_s30 }
 0x57d   : > { %p9324_p10 = scmp.lt.u32.totalorder %s9322_s28, %s9318_s29  ;;  %p9326_p12 = scmp.lt.u32.totalorder %s9318_s29, %s12254_s18 }
 0x57e   : > { %p9320_p7 = pnand %p9319_p4, %p9504_p5 }
 0x57f   : > { %p9325_p11 = por %p9324_p10, %p9323_p9 }
 0x580   : > { %p9321_p8 = pneg %p9320_p7 }
 0x581   : > { %p9327_p13 = por %p9326_p12, %p9325_p11 }
 0x583   : > { %p9328_p0 = pnand %p9327_p13, %p9321_p8 }
 0x585   : > { %9331 = shalt.err (!%p9328_p0)
}
 0x586   : > { %s9374_s2 = smov 384   ;;  %s9375_s21 = smov 24  }
 0x587   : > { %9033 = dma.vmem_to_hbm [thread:$0]  (%p9504_p5), %s12248_s17, 3072, %s12254_s18, %s12260_s26, %s9374_s2, %s9374_s2, %s9375_s21  }
 0x588 PF: > { %s12424_s22 = sld [smem:[#allocation10_spill]]  ;;  %s12425_s0 = sld [smem:[#allocation8_spill]] }
 0x58e   : > { %p9039_p1 = scmp.ge.s32.totalorder %s12424_s22, 2  ;;  %s7163_s20 = sand.u32 1, %s12425_s0  }
 0x58f   : > { %s7164_s29 = scalar_lea.sflag [#allocation6], %s7163_s20 }
 0x590   : > { %p9036_p2 = pnand %p9039_p1, %p9508_p6 }
 0x592   : > { %9349 = dma.done.wait (!%p9036_p2), %s7164_s29, 3072  }
 0x593   : > { %9351 = vsyncadd (!%p9036_p2), %s7164_s29, 4294964224  ;;  %s12427_s27 = sld [smem:[#allocation11_spill]]  ;;  %s12428_s28 = sld [smem:[#allocation9_spill]] }
 0x594   : > { %s12429_s26 = sld [smem:[#allocation12_spill]]  ;;  %s12430_s24 = smov %s9358_s25 }
 0x599   : > { %p27_p3 = scmp.ge.s32.totalorder %s12427_s27, 4   ;;  %s12431_s25 = smov %s12428_s28 }
 0x59b   :  { %29 = sbr.rel (!%p27_p3) target bundleno = 8 (0x8), region = 155 }
 0x5a2   :  { %7169 = vsyncpa [#allocation6], 1 }
 0x5a3   :  { %7171 = vsyncpa [#allocation6 + $0x1], 1 }

</bundles_post_ra>
